<compile_context>
chip_gen: v6e
topology: v6e:2x2x1
jax: 0.10.0
libtpu: 0.0.40
codegen_flags: <defaults>
</compile_context>

<pallas_src>
import jax
import jax.numpy as jnp
from jax.experimental import pallas as pl
from jax.experimental.pallas import tpu as pltpu

BN_EPS = 1e-5


# ---------------------------------------------------------------------------
# BN folding
# ---------------------------------------------------------------------------
def _bn_fold(bn):
    scale = bn["gamma"] / jnp.sqrt(bn["var"] + BN_EPS)
    bias = bn["beta"] - bn["mean"] * scale
    return scale, bias


# ---------------------------------------------------------------------------
# Generic fused conv + folded-BN (+ReLU) Pallas kernel
#   grid = (N, Ho, kh); the kh axis is the reduction ("arbitrary") axis and its
#   index_map shifts by whole rows into the padded input, so no im2col is ever
#   materialized in HBM. kw taps are static contiguous windows of the VMEM row.
# ---------------------------------------------------------------------------
def _make_conv_kernel(kh, kw, Wo, offs, relu):
    def kern(x_ref, w_ref, b_ref, o_ref, acc_ref):
        t = pl.program_id(2)

        @pl.when(t == 0)
        def _init():
            acc_ref[...] = jnp.zeros_like(acc_ref)

        x = x_ref[...]                                  # (WW, Cin) bf16
        part = None
        for dj in range(kw):                            # static unroll
            win = x[offs[dj]:offs[dj] + Wo, :]          # (Wo, Cin)
            d = jnp.dot(win, w_ref[dj],                 # (Cin, Cout) bf16
                        preferred_element_type=jnp.float32)
            part = d if part is None else part + d
        acc_ref[...] += part

        @pl.when(t == kh - 1)
        def _fin():
            y = acc_ref[...] + b_ref[...]
            if relu:
                y = jnp.maximum(y, 0.0)
            o_ref[...] = y.astype(o_ref.dtype)

    return kern


def conv2d_bn_act(x, w, bn, stride=1, padding=0, relu=True,
                  out_dtype=jnp.bfloat16):
    """x: NHWC bf16, w: (kh, kw, Cin, Cout) f32. Conv + folded BN (+ReLU)."""
    N, H, W, Cin = x.shape
    kh, kw, _, Cout = w.shape
    sh, sw = (stride, stride) if isinstance(stride, int) else stride
    if isinstance(padding, int):
        padding = ((padding, padding), (padding, padding))

    scale, bias = _bn_fold(bn)
    wf = (w * scale).astype(jnp.bfloat16)               # fold BN scale into W
    bias = bias.reshape(1, Cout).astype(jnp.float32)

    xp = jnp.pad(x, ((0, 0), padding[0], padding[1], (0, 0)))
    Hp, Wp = xp.shape[1], xp.shape[2]
    Ho = (Hp - kh) // sh + 1
    Wo = (Wp - kw) // sw + 1

    if sw == 1:
        xk = xp
        offs = list(range(kw))
    elif sw == 2:
        # split W into even/odd phases so in-kernel tap windows stay contiguous
        xe = xp[:, :, 0::2, :]
        xo = xp[:, :, 1::2, :]
        We = xe.shape[2]
        xk = jnp.concatenate([xe, xo], axis=2)
        offs = [(dj % 2) * We + dj // 2 for dj in range(kw)]
    else:
        raise NotImplementedError("only stride 1 or 2 supported")
    WW = xk.shape[2]

    kern = _make_conv_kernel(kh, kw, Wo, offs, relu)
    return pl.pallas_call(
        kern,
        out_shape=jax.ShapeDtypeStruct((N, Ho, Wo, Cout), out_dtype),
        grid=(N, Ho, kh),
        in_specs=[
            pl.BlockSpec((None, None, WW, Cin),
                         lambda n, h, t: (n, h * sh + t, 0, 0)),
            pl.BlockSpec((None, kw, Cin, Cout),
                         lambda n, h, t: (t, 0, 0, 0)),
            pl.BlockSpec((1, Cout), lambda n, h, t: (0, 0)),
        ],
        out_specs=pl.BlockSpec((None, None, Wo, Cout),
                               lambda n, h, t: (n, h, 0, 0)),
        scratch_shapes=[pltpu.VMEM((Wo, Cout), jnp.float32)],
        compiler_params=pltpu.CompilerParams(
            dimension_semantics=("parallel", "parallel", "arbitrary")),
    )(xk, wf, bias)


# ---------------------------------------------------------------------------
# ConvTranspose2d(k=3, s=2, p=1, op=1) + BN + ReLU via sub-conv decomposition.
# Output phase (r, c) (r, c in {0,1}) is an ordinary small conv on x; the four
# phase outputs are interleaved in the wrapper. No zero-insertion, no wasted
# MXU cycles on zero rows.
# ---------------------------------------------------------------------------
def deconv2d_bn_relu(x, w_t, bn):
    """x: NHWC bf16, w_t: PyTorch ConvTranspose2d weight (Cin, Cout, 3, 3)."""
    N, H, W, _ = x.shape
    cout = w_t.shape[1]
    wtt = jnp.transpose(w_t, (2, 3, 0, 1))              # (kh, kw, Cin, Cout)

    phases = {}
    for r in (0, 1):
        for c in (0, 1):
            rk = (1,) if r == 0 else (2, 0)             # kernel taps per phase
            ck = (1,) if c == 0 else (2, 0)
            pw = wtt[jnp.array(rk)][:, jnp.array(ck)]   # (len_r, len_c, Cin, Cout)
            pad = ((0, 1 if r else 0), (0, 1 if c else 0))
            phases[(r, c)] = conv2d_bn_act(x, pw, bn, stride=1,
                                           padding=pad, relu=True)

    row0 = jnp.stack([phases[(0, 0)], phases[(0, 1)]], axis=3)  # (N,H,W,2,C)
    row1 = jnp.stack([phases[(1, 0)], phases[(1, 1)]], axis=3)
    out = jnp.stack([row0, row1], axis=2)                       # (N,H,2,W,2,C)
    return out.reshape(N, 2 * H, 2 * W, cout)


# ---------------------------------------------------------------------------
# Fused tail: conv_0 + conv_1 + w_0 + w_1 + 2-way softmax + blend in ONE kernel
# ---------------------------------------------------------------------------
def _make_tail_kernel(kh, kw, Wo, offs):
    def kern(x0_ref, x1_ref, w0_ref, w1_ref, b0_ref, b1_ref,
             wl_ref, wlb_ref, o_ref, acc0_ref, acc1_ref):
        t = pl.program_id(2)

        @pl.when(t == 0)
        def _init():
            acc0_ref[...] = jnp.zeros_like(acc0_ref)
            acc1_ref[...] = jnp.zeros_like(acc1_ref)

        x0 = x0_ref[...]
        x1 = x1_ref[...]
        p0 = p1 = None
        for dj in range(kw):
            win0 = x0[offs[dj]:offs[dj] + Wo, :]
            win1 = x1[offs[dj]:offs[dj] + Wo, :]
            d0 = jnp.dot(win0, w0_ref[dj], preferred_element_type=jnp.float32)
            d1 = jnp.dot(win1, w1_ref[dj], preferred_element_type=jnp.float32)
            p0 = d0 if p0 is None else p0 + d0
            p1 = d1 if p1 is None else p1 + d1
        acc0_ref[...] += p0
        acc1_ref[...] += p1

        @pl.when(t == kh - 1)
        def _fin():
            y0 = jnp.maximum(acc0_ref[...] + b0_ref[...], 0.0)  # x_output_0 row
            y1 = jnp.maximum(acc1_ref[...] + b1_ref[...], 0.0)  # x_output_1 row
            wl = wl_ref[...]                                    # (2, C)
            wlb = wlb_ref[...]                                  # (1, 2)
            # per-pixel 1x1 "weight" convs (cout=1) as lane reductions
            l0 = jnp.sum(y0 * wl[0:1, :], axis=-1, keepdims=True) + wlb[0:1, 0:1]
            l1 = jnp.sum(y1 * wl[1:2, :], axis=-1, keepdims=True) + wlb[0:1, 1:2]
            m = jnp.maximum(l0, l1)
            e0 = jnp.exp(l0 - m)
            e1 = jnp.exp(l1 - m)
            inv = pl.reciprocal(e0 + e1, approx=True)
            o_ref[...] = (y0 * (e0 * inv) + y1 * (e1 * inv)).astype(o_ref.dtype)

    return kern


def fused_output_tail(xm0, xm1, conv0_p, conv1_p, w0_p, w1_p):
    (w0, bn0), (w1, bn1) = conv0_p, conv1_p
    (ww0, bnw0), (ww1, bnw1) = w0_p, w1_p
    N, H, W, Cin = xm0.shape
    kh, kw, _, Cout = w0.shape

    s0, b0 = _bn_fold(bn0)
    s1, b1 = _bn_fold(bn1)
    wf0 = (w0 * s0).astype(jnp.bfloat16)
    wf1 = (w1 * s1).astype(jnp.bfloat16)
    b0 = b0.reshape(1, Cout).astype(jnp.float32)
    b1 = b1.reshape(1, Cout).astype(jnp.float32)

    sw0, bw0 = _bn_fold(bnw0)
    sw1, bw1 = _bn_fold(bnw1)
    wl = jnp.stack([ww0[0, 0, :, 0] * sw0[0],
                    ww1[0, 0, :, 0] * sw1[0]], axis=0).astype(jnp.float32)
    wlb = jnp.stack([bw0[0], bw1[0]]).reshape(1, 2).astype(jnp.float32)

    xp0 = jnp.pad(xm0, ((0, 0), (1, 1), (1, 1), (0, 0)))
    xp1 = jnp.pad(xm1, ((0, 0), (1, 1), (1, 1), (0, 0)))
    Wp = W + 2
    Ho, Wo = H, W
    offs = list(range(kw))

    kern = _make_tail_kernel(kh, kw, Wo, offs)
    return pl.pallas_call(
        kern,
        out_shape=jax.ShapeDtypeStruct((N, Ho, Wo, Cout), jnp.float32),
        grid=(N, Ho, kh),
        in_specs=[
            pl.BlockSpec((None, None, Wp, Cin), lambda n, h, t: (n, h + t, 0, 0)),
            pl.BlockSpec((None, None, Wp, Cin), lambda n, h, t: (n, h + t, 0, 0)),
            pl.BlockSpec((None, kw, Cin, Cout), lambda n, h, t: (t, 0, 0, 0)),
            pl.BlockSpec((None, kw, Cin, Cout), lambda n, h, t: (t, 0, 0, 0)),
            pl.BlockSpec((1, Cout), lambda n, h, t: (0, 0)),
            pl.BlockSpec((1, Cout), lambda n, h, t: (0, 0)),
            pl.BlockSpec((2, Cout), lambda n, h, t: (0, 0)),
            pl.BlockSpec((1, 2), lambda n, h, t: (0, 0)),
        ],
        out_specs=pl.BlockSpec((None, None, Wo, Cout),
                               lambda n, h, t: (n, h, 0, 0)),
        scratch_shapes=[pltpu.VMEM((Wo, Cout), jnp.float32),
                        pltpu.VMEM((Wo, Cout), jnp.float32)],
        compiler_params=pltpu.CompilerParams(
            dimension_semantics=("parallel", "parallel", "arbitrary")),
    )(xp0, xp1, wf0, wf1, b0, b1, wl, wlb)


# ---------------------------------------------------------------------------
# Parameter construction (deterministic, synthetic)
# ---------------------------------------------------------------------------
def _conv_w(key, kh, kw, cin, cout):
    limit = (6.0 / (kh * kw * cin + kh * kw * cout)) ** 0.5
    return jax.random.uniform(key, (kh, kw, cin, cout), jnp.float32, -limit, limit)


def _deconv_w(key, cin, cout, kh, kw):
    limit = (6.0 / (kh * kw * cin + kh * kw * cout)) ** 0.5
    return jax.random.uniform(key, (cin, cout, kh, kw), jnp.float32, -limit, limit)


def _bn_p(key, c):
    k1, k2 = jax.random.split(key)
    return dict(
        gamma=1.0 + 0.1 * jax.random.normal(k1, (c,), jnp.float32),
        beta=0.05 * jax.random.normal(k2, (c,), jnp.float32),
        mean=jnp.zeros((c,), jnp.float32),
        var=jnp.ones((c,), jnp.float32),
    )


def make_params(key, c_in=4, nf=32, nuf=32):
    ns = nf * 2  # num_semantic_filters
    keys = jax.random.split(key, 28)
    ki = iter(keys)
    p = {}
    p["bub0"] = [
        (_conv_w(next(ki), 3, 3, c_in, nf), _bn_p(next(ki), nf)),
        (_conv_w(next(ki), 3, 3, nf, nf), _bn_p(next(ki), nf)),
        (_conv_w(next(ki), 3, 3, nf, nf), _bn_p(next(ki), nf)),
    ]
    p["bub1"] = [
        (_conv_w(next(ki), 3, 3, nf, ns), _bn_p(next(ki), ns)),
        (_conv_w(next(ki), 3, 3, ns, ns), _bn_p(next(ki), ns)),
        (_conv_w(next(ki), 3, 3, ns, ns), _bn_p(next(ki), ns)),
    ]
    p["trans_0"] = (_conv_w(next(ki), 1, 1, nf, nf), _bn_p(next(ki), nf))
    p["trans_1"] = (_conv_w(next(ki), 1, 1, ns, ns), _bn_p(next(ki), ns))
    p["deconv_0"] = (_deconv_w(next(ki), ns, nf, 3, 3), _bn_p(next(ki), nf))
    p["deconv_1"] = (_deconv_w(next(ki), ns, nf, 3, 3), _bn_p(next(ki), nf))
    p["conv_0"] = (_conv_w(next(ki), 3, 3, nf, nuf), _bn_p(next(ki), nuf))
    p["w_0"] = (_conv_w(next(ki), 1, 1, nuf, 1), _bn_p(next(ki), 1))
    p["conv_1"] = (_conv_w(next(ki), 3, 3, nf, nuf), _bn_p(next(ki), nuf))
    p["w_1"] = (_conv_w(next(ki), 1, 1, nuf, 1), _bn_p(next(ki), 1))
    return p


# ---------------------------------------------------------------------------
# SSFA forward
# ---------------------------------------------------------------------------
def ssfa_forward(x_nchw, params):
    # NCHW -> NHWC (channels on the lane axis), bf16 activations everywhere
    x = jnp.transpose(x_nchw, (0, 2, 3, 1)).astype(jnp.bfloat16)

    # bottom_up_block_0 (ZeroPad2d(1)+conv == conv pad=1)
    h = x
    for w, bn in params["bub0"]:
        h = conv2d_bn_act(h, w, bn, stride=1, padding=1, relu=True)
    x_0 = h

    # bottom_up_block_1 (first conv stride 2)
    h = conv2d_bn_act(x_0, *params["bub1"][0], stride=2, padding=1, relu=True)
    h = conv2d_bn_act(h, *params["bub1"][1], stride=1, padding=1, relu=True)
    x_1 = conv2d_bn_act(h, *params["bub1"][2], stride=1, padding=1, relu=True)

    x_trans_0 = conv2d_bn_act(x_0, *params["trans_0"], stride=1, padding=0, relu=True)
    x_trans_1 = conv2d_bn_act(x_1, *params["trans_1"], stride=1, padding=0, relu=True)

    x_middle_0 = deconv2d_bn_relu(x_trans_1, *params["deconv_0"]) + x_trans_0
    x_middle_1 = deconv2d_bn_relu(x_trans_1, *params["deconv_1"])

    # conv_0 / conv_1 / w_0 / w_1 / softmax / blend fused in one Pallas kernel
    out = fused_output_tail(x_middle_0, x_middle_1,
                            params["conv_0"], params["conv_1"],
                            params["w_0"], params["w_1"])

    return jnp.transpose(out, (0, 3, 1, 2))  # NHWC -> NCHW ("spatial_features_2d")


if __name__ == "__main__":
    key = jax.random.PRNGKey(0)
    kx, kp = jax.random.split(key)
    # spatial_features: NCHW, batch=2, input_channels=4, 16x16 BEV grid
    x = jax.random.normal(kx, (2, 4, 16, 16), jnp.float32)
    params = make_params(kp, c_in=4, nf=32, nuf=32)

    fwd = jax.jit(ssfa_forward)
    out = jax.block_until_ready(fwd(x, params))
    assert out.shape == (2, 32, 16, 16), out.shape
    assert jnp.all(jnp.isfinite(out))
    print("KERNEL_OK")
</pallas_src>

<mosaic_0001>
module attributes {stable_mosaic.version = 11 : i64} {
  func.func @kern(%arg0: i32, %arg1: i32, %arg2: i32, %arg3: memref<1x1x18x4xbf16, #tpu.memory_space<vmem>>, %arg4: memref<1x3x4x32xbf16, #tpu.memory_space<vmem>>, %arg5: memref<1x32xf32, #tpu.memory_space<vmem>>, %arg6: memref<1x1x16x32xbf16, #tpu.memory_space<vmem>>, %arg7: memref<16x32xf32, #tpu.memory_space<vmem>>) attributes {dimension_semantics = [#tpu.dimension_semantics<parallel>, #tpu.dimension_semantics<parallel>, #tpu.dimension_semantics<arbitrary>], iteration_bounds = array<i64: 2, 16, 3>, scalar_prefetch = 0 : i64, scratch_operands = 1 : i64, tpu.core_type = #tpu.core_type<tc>, window_params = [{transform_indices = @transform_0, window_bounds = array<i64: 1, 1, 18, 4>}, {transform_indices = @transform_1, window_bounds = array<i64: 1, 3, 4, 32>}, {pipeline_mode = #tpu.pipeline_mode<synchronous>, transform_indices = @transform_2, window_bounds = array<i64: 1, 32>}, {transform_indices = @transform_3, window_bounds = array<i64: 1, 1, 16, 32>}]} {
    %c0_i32 = arith.constant 0 : i32
    %0 = arith.cmpi eq, %arg2, %c0_i32 : i32
    %1 = arith.extui %0 : i1 to i32
    %c0_i32_0 = arith.constant 0 : i32
    %2 = arith.cmpi ne, %1, %c0_i32_0 : i32
    scf.if %2 {
      %cst_21 = arith.constant 0.000000e+00 : f32
      %25 = vector.broadcast %cst_21 : f32 to vector<16x32xf32>
      %c0_22 = arith.constant 0 : index
      %c0_23 = arith.constant 0 : index
      %26 = vector.load %arg7[%c0_22, %c0_23] : memref<16x32xf32, #tpu.memory_space<vmem>>, vector<16x32xf32>
      tpu.vector_store %arg7[%c0_22, %c0_23], %25 {strides = array<i32>} : memref<16x32xf32, #tpu.memory_space<vmem>>, vector<16x32xf32>,
    } else {
    }
    %c0 = arith.constant 0 : index
    %c0_1 = arith.constant 0 : index
    %c0_2 = arith.constant 0 : index
    %c0_3 = arith.constant 0 : index
    %3 = vector.load %arg3[%c0, %c0_1, %c0_2, %c0_3] : memref<1x1x18x4xbf16, #tpu.memory_space<vmem>>, vector<1x1x18x4xbf16>
    %4 = vector.shape_cast %3 : vector<1x1x18x4xbf16> to vector<18x4xbf16>
    %5 = vector.extract_strided_slice %4 {offsets = [0, 0], sizes = [16, 4], strides = [1, 1]} : vector<18x4xbf16> to vector<16x4xbf16>
    %c0_4 = arith.constant 0 : index
    %c0_5 = arith.constant 0 : index
    %c0_6 = arith.constant 0 : index
    %c0_7 = arith.constant 0 : index
    %6 = vector.load %arg4[%c0_4, %c0_5, %c0_6, %c0_7] : memref<1x3x4x32xbf16, #tpu.memory_space<vmem>>, vector<1x1x4x32xbf16>
    %7 = vector.shape_cast %6 : vector<1x1x4x32xbf16> to vector<4x32xbf16>
    %cst = arith.constant dense<0.000000e+00> : vector<16x32xf32>
    %8 = tpu.matmul %5, %7, %cst {dimension_numbers = #tpu.dot_dimension_numbers<[1], [0], [0], [1], [0, 0, 1, 1], [], []>} : vector<16x4xbf16>, vector<4x32xbf16>, vector<16x32xf32> -> vector<16x32xf32>
    %9 = vector.extract_strided_slice %4 {offsets = [1, 0], sizes = [16, 4], strides = [1, 1]} : vector<18x4xbf16> to vector<16x4xbf16>
    %c0_8 = arith.constant 0 : index
    %c1 = arith.constant 1 : index
    %c0_9 = arith.constant 0 : index
    %c0_10 = arith.constant 0 : index
    %10 = vector.load %arg4[%c0_8, %c1, %c0_9, %c0_10] : memref<1x3x4x32xbf16, #tpu.memory_space<vmem>>, vector<1x1x4x32xbf16>
    %11 = vector.shape_cast %10 : vector<1x1x4x32xbf16> to vector<4x32xbf16>
    %cst_11 = arith.constant dense<0.000000e+00> : vector<16x32xf32>
    %12 = tpu.matmul %9, %11, %cst_11 {dimension_numbers = #tpu.dot_dimension_numbers<[1], [0], [0], [1], [0, 0, 1, 1], [], []>} : vector<16x4xbf16>, vector<4x32xbf16>, vector<16x32xf32> -> vector<16x32xf32>
    %13 = arith.addf %8, %12 : vector<16x32xf32>
    %14 = vector.extract_strided_slice %4 {offsets = [2, 0], sizes = [16, 4], strides = [1, 1]} : vector<18x4xbf16> to vector<16x4xbf16>
    %c0_12 = arith.constant 0 : index
    %c2 = arith.constant 2 : index
    %c0_13 = arith.constant 0 : index
    %c0_14 = arith.constant 0 : index
    %15 = vector.load %arg4[%c0_12, %c2, %c0_13, %c0_14] : memref<1x3x4x32xbf16, #tpu.memory_space<vmem>>, vector<1x1x4x32xbf16>
    %16 = vector.shape_cast %15 : vector<1x1x4x32xbf16> to vector<4x32xbf16>
    %cst_15 = arith.constant dense<0.000000e+00> : vector<16x32xf32>
    %17 = tpu.matmul %14, %16, %cst_15 {dimension_numbers = #tpu.dot_dimension_numbers<[1], [0], [0], [1], [0, 0, 1, 1], [], []>} : vector<16x4xbf16>, vector<4x32xbf16>, vector<16x32xf32> -> vector<16x32xf32>
    %18 = arith.addf %13, %17 : vector<16x32xf32>
    %c0_16 = arith.constant 0 : index
    %c0_17 = arith.constant 0 : index
    %19 = vector.load %arg7[%c0_16, %c0_17] : memref<16x32xf32, #tpu.memory_space<vmem>>, vector<16x32xf32>
    %20 = arith.addf %19, %18 : vector<16x32xf32>
    %c0_18 = arith.constant 0 : index
    %c0_19 = arith.constant 0 : index
    %21 = vector.load %arg7[%c0_18, %c0_19] : memref<16x32xf32, #tpu.memory_space<vmem>>, vector<16x32xf32>
    tpu.vector_store %arg7[%c0_18, %c0_19], %20 {strides = array<i32>} : memref<16x32xf32, #tpu.memory_space<vmem>>, vector<16x32xf32>,
    %c2_i32 = arith.constant 2 : i32
    %22 = arith.cmpi eq, %arg2, %c2_i32 : i32
    %23 = arith.extui %22 : i1 to i32
    %c0_i32_20 = arith.constant 0 : i32
    %24 = arith.cmpi ne, %23, %c0_i32_20 : i32
    scf.if %24 {
      %c0_21 = arith.constant 0 : index
      %c0_22 = arith.constant 0 : index
      %25 = vector.load %arg7[%c0_21, %c0_22] : memref<16x32xf32, #tpu.memory_space<vmem>>, vector<16x32xf32>
      %c0_23 = arith.constant 0 : index
      %c0_24 = arith.constant 0 : index
      %26 = vector.load %arg5[%c0_23, %c0_24] : memref<1x32xf32, #tpu.memory_space<vmem>>, vector<1x32xf32>
      %27 = vector.broadcast %26 : vector<1x32xf32> to vector<16x32xf32>
      %28 = arith.addf %25, %27 : vector<16x32xf32>
      %cst_25 = arith.constant 0.000000e+00 : f32
      %29 = vector.broadcast %cst_25 : f32 to vector<16x32xf32>
      %30 = arith.maximumf %28, %29 : vector<16x32xf32>
      %31 = arith.truncf %30 : vector<16x32xf32> to vector<16x32xbf16>
      %c0_26 = arith.constant 0 : index
      %c0_27 = arith.constant 0 : index
      %c0_28 = arith.constant 0 : index
      %c0_29 = arith.constant 0 : index
      %32 = vector.load %arg6[%c0_26, %c0_27, %c0_28, %c0_29] : memref<1x1x16x32xbf16, #tpu.memory_space<vmem>>, vector<1x1x16x32xbf16>
      %33 = vector.shape_cast %32 : vector<1x1x16x32xbf16> to vector<16x32xbf16>
      %34 = vector.shape_cast %31 : vector<16x32xbf16> to vector<1x1x16x32xbf16>
      tpu.vector_store %arg6[%c0_26, %c0_27, %c0_28, %c0_29], %34 {strides = array<i32>} : memref<1x1x16x32xbf16, #tpu.memory_space<vmem>>, vector<1x1x16x32xbf16>,
    } else {
    }
    return
  }
  func.func @transform_0(%arg0: i32, %arg1: i32, %arg2: i32) -> (i32, i32, i32, i32) {
    %c1_i32 = arith.constant 1 : i32
    %0 = arith.muli %arg1, %c1_i32 : i32
    %1 = arith.addi %0, %arg2 : i32
    %c0_i32 = arith.constant 0 : i32
    %c0_i32_0 = arith.constant 0 : i32
    %c0_i32_1 = arith.constant 0 : i32
    return %arg0, %1, %c0_i32, %c0_i32_0 : i32, i32, i32, i32
  }
  func.func @transform_1(%arg0: i32, %arg1: i32, %arg2: i32) -> (i32, i32, i32, i32) {
    %c0_i32 = arith.constant 0 : i32
    %c0_i32_0 = arith.constant 0 : i32
    %c0_i32_1 = arith.constant 0 : i32
    %c0_i32_2 = arith.constant 0 : i32
    return %arg2, %c0_i32, %c0_i32_0, %c0_i32_1 : i32, i32, i32, i32
  }
  func.func @transform_2(%arg0: i32, %arg1: i32, %arg2: i32) -> (i32, i32) {
    %c0_i32 = arith.constant 0 : i32
    %c0_i32_0 = arith.constant 0 : i32
    %c0_i32_1 = arith.constant 0 : i32
    return %c0_i32, %c0_i32_0 : i32, i32
  }
  func.func @transform_3(%arg0: i32, %arg1: i32, %arg2: i32) -> (i32, i32, i32, i32) {
    %c0_i32 = arith.constant 0 : i32
    %c0_i32_0 = arith.constant 0 : i32
    %c0_i32_1 = arith.constant 0 : i32
    return %arg0, %arg1, %c0_i32, %c0_i32_0 : i32, i32, i32, i32
  }
}

module attributes {stable_mosaic.version = 11 : i64} {
  func.func @kern(%arg0: i32, %arg1: i32, %arg2: i32, %arg3: memref<1x1x18x32xbf16, #tpu.memory_space<vmem>>, %arg4: memref<1x3x32x32xbf16, #tpu.memory_space<vmem>>, %arg5: memref<1x32xf32, #tpu.memory_space<vmem>>, %arg6: memref<1x1x16x32xbf16, #tpu.memory_space<vmem>>, %arg7: memref<16x32xf32, #tpu.memory_space<vmem>>) attributes {dimension_semantics = [#tpu.dimension_semantics<parallel>, #tpu.dimension_semantics<parallel>, #tpu.dimension_semantics<arbitrary>], iteration_bounds = array<i64: 2, 16, 3>, scalar_prefetch = 0 : i64, scratch_operands = 1 : i64, tpu.core_type = #tpu.core_type<tc>, window_params = [{transform_indices = @transform_0, window_bounds = array<i64: 1, 1, 18, 32>}, {transform_indices = @transform_1, window_bounds = array<i64: 1, 3, 32, 32>}, {pipeline_mode = #tpu.pipeline_mode<synchronous>, transform_indices = @transform_2, window_bounds = array<i64: 1, 32>}, {transform_indices = @transform_3, window_bounds = array<i64: 1, 1, 16, 32>}]} {
    %c0_i32 = arith.constant 0 : i32
    %0 = arith.cmpi eq, %arg2, %c0_i32 : i32
    %1 = arith.extui %0 : i1 to i32
    %c0_i32_0 = arith.constant 0 : i32
    %2 = arith.cmpi ne, %1, %c0_i32_0 : i32
    scf.if %2 {
      %cst_21 = arith.constant 0.000000e+00 : f32
      %25 = vector.broadcast %cst_21 : f32 to vector<16x32xf32>
      %c0_22 = arith.constant 0 : index
      %c0_23 = arith.constant 0 : index
      %26 = vector.load %arg7[%c0_22, %c0_23] : memref<16x32xf32, #tpu.memory_space<vmem>>, vector<16x32xf32>
      tpu.vector_store %arg7[%c0_22, %c0_23], %25 {strides = array<i32>} : memref<16x32xf32, #tpu.memory_space<vmem>>, vector<16x32xf32>,
    } else {
    }
    %c0 = arith.constant 0 : index
    %c0_1 = arith.constant 0 : index
    %c0_2 = arith.constant 0 : index
    %c0_3 = arith.constant 0 : index
    %3 = vector.load %arg3[%c0, %c0_1, %c0_2, %c0_3] : memref<1x1x18x32xbf16, #tpu.memory_space<vmem>>, vector<1x1x18x32xbf16>
    %4 = vector.shape_cast %3 : vector<1x1x18x32xbf16> to vector<18x32xbf16>
    %5 = vector.extract_strided_slice %4 {offsets = [0, 0], sizes = [16, 32], strides = [1, 1]} : vector<18x32xbf16> to vector<16x32xbf16>
    %c0_4 = arith.constant 0 : index
    %c0_5 = arith.constant 0 : index
    %c0_6 = arith.constant 0 : index
    %c0_7 = arith.constant 0 : index
    %6 = vector.load %arg4[%c0_4, %c0_5, %c0_6, %c0_7] : memref<1x3x32x32xbf16, #tpu.memory_space<vmem>>, vector<1x1x32x32xbf16>
    %7 = vector.shape_cast %6 : vector<1x1x32x32xbf16> to vector<32x32xbf16>
    %cst = arith.constant dense<0.000000e+00> : vector<16x32xf32>
    %8 = tpu.matmul %5, %7, %cst {dimension_numbers = #tpu.dot_dimension_numbers<[1], [0], [0], [1], [0, 0, 1, 1], [], []>} : vector<16x32xbf16>, vector<32x32xbf16>, vector<16x32xf32> -> vector<16x32xf32>
    %9 = vector.extract_strided_slice %4 {offsets = [1, 0], sizes = [16, 32], strides = [1, 1]} : vector<18x32xbf16> to vector<16x32xbf16>
    %c0_8 = arith.constant 0 : index
    %c1 = arith.constant 1 : index
    %c0_9 = arith.constant 0 : index
    %c0_10 = arith.constant 0 : index
    %10 = vector.load %arg4[%c0_8, %c1, %c0_9, %c0_10] : memref<1x3x32x32xbf16, #tpu.memory_space<vmem>>, vector<1x1x32x32xbf16>
    %11 = vector.shape_cast %10 : vector<1x1x32x32xbf16> to vector<32x32xbf16>
    %cst_11 = arith.constant dense<0.000000e+00> : vector<16x32xf32>
    %12 = tpu.matmul %9, %11, %cst_11 {dimension_numbers = #tpu.dot_dimension_numbers<[1], [0], [0], [1], [0, 0, 1, 1], [], []>} : vector<16x32xbf16>, vector<32x32xbf16>, vector<16x32xf32> -> vector<16x32xf32>
    %13 = arith.addf %8, %12 : vector<16x32xf32>
    %14 = vector.extract_strided_slice %4 {offsets = [2, 0], sizes = [16, 32], strides = [1, 1]} : vector<18x32xbf16> to vector<16x32xbf16>
    %c0_12 = arith.constant 0 : index
    %c2 = arith.constant 2 : index
    %c0_13 = arith.constant 0 : index
    %c0_14 = arith.constant 0 : index
    %15 = vector.load %arg4[%c0_12, %c2, %c0_13, %c0_14] : memref<1x3x32x32xbf16, #tpu.memory_space<vmem>>, vector<1x1x32x32xbf16>
    %16 = vector.shape_cast %15 : vector<1x1x32x32xbf16> to vector<32x32xbf16>
    %cst_15 = arith.constant dense<0.000000e+00> : vector<16x32xf32>
    %17 = tpu.matmul %14, %16, %cst_15 {dimension_numbers = #tpu.dot_dimension_numbers<[1], [0], [0], [1], [0, 0, 1, 1], [], []>} : vector<16x32xbf16>, vector<32x32xbf16>, vector<16x32xf32> -> vector<16x32xf32>
    %18 = arith.addf %13, %17 : vector<16x32xf32>
    %c0_16 = arith.constant 0 : index
    %c0_17 = arith.constant 0 : index
    %19 = vector.load %arg7[%c0_16, %c0_17] : memref<16x32xf32, #tpu.memory_space<vmem>>, vector<16x32xf32>
    %20 = arith.addf %19, %18 : vector<16x32xf32>
    %c0_18 = arith.constant 0 : index
    %c0_19 = arith.constant 0 : index
    %21 = vector.load %arg7[%c0_18, %c0_19] : memref<16x32xf32, #tpu.memory_space<vmem>>, vector<16x32xf32>
    tpu.vector_store %arg7[%c0_18, %c0_19], %20 {strides = array<i32>} : memref<16x32xf32, #tpu.memory_space<vmem>>, vector<16x32xf32>,
    %c2_i32 = arith.constant 2 : i32
    %22 = arith.cmpi eq, %arg2, %c2_i32 : i32
    %23 = arith.extui %22 : i1 to i32
    %c0_i32_20 = arith.constant 0 : i32
    %24 = arith.cmpi ne, %23, %c0_i32_20 : i32
    scf.if %24 {
      %c0_21 = arith.constant 0 : index
      %c0_22 = arith.constant 0 : index
      %25 = vector.load %arg7[%c0_21, %c0_22] : memref<16x32xf32, #tpu.memory_space<vmem>>, vector<16x32xf32>
      %c0_23 = arith.constant 0 : index
      %c0_24 = arith.constant 0 : index
      %26 = vector.load %arg5[%c0_23, %c0_24] : memref<1x32xf32, #tpu.memory_space<vmem>>, vector<1x32xf32>
      %27 = vector.broadcast %26 : vector<1x32xf32> to vector<16x32xf32>
      %28 = arith.addf %25, %27 : vector<16x32xf32>
      %cst_25 = arith.constant 0.000000e+00 : f32
      %29 = vector.broadcast %cst_25 : f32 to vector<16x32xf32>
      %30 = arith.maximumf %28, %29 : vector<16x32xf32>
      %31 = arith.truncf %30 : vector<16x32xf32> to vector<16x32xbf16>
      %c0_26 = arith.constant 0 : index
      %c0_27 = arith.constant 0 : index
      %c0_28 = arith.constant 0 : index
      %c0_29 = arith.constant 0 : index
      %32 = vector.load %arg6[%c0_26, %c0_27, %c0_28, %c0_29] : memref<1x1x16x32xbf16, #tpu.memory_space<vmem>>, vector<1x1x16x32xbf16>
      %33 = vector.shape_cast %32 : vector<1x1x16x32xbf16> to vector<16x32xbf16>
      %34 = vector.shape_cast %31 : vector<16x32xbf16> to vector<1x1x16x32xbf16>
      tpu.vector_store %arg6[%c0_26, %c0_27, %c0_28, %c0_29], %34 {strides = array<i32>} : memref<1x1x16x32xbf16, #tpu.memory_space<vmem>>, vector<1x1x16x32xbf16>,
    } else {
    }
    return
  }
  func.func @transform_0(%arg0: i32, %arg1: i32, %arg2: i32) -> (i32, i32, i32, i32) {
    %c1_i32 = arith.constant 1 : i32
    %0 = arith.muli %arg1, %c1_i32 : i32
    %1 = arith.addi %0, %arg2 : i32
    %c0_i32 = arith.constant 0 : i32
    %c0_i32_0 = arith.constant 0 : i32
    %c0_i32_1 = arith.constant 0 : i32
    return %arg0, %1, %c0_i32, %c0_i32_0 : i32, i32, i32, i32
  }
  func.func @transform_1(%arg0: i32, %arg1: i32, %arg2: i32) -> (i32, i32, i32, i32) {
    %c0_i32 = arith.constant 0 : i32
    %c0_i32_0 = arith.constant 0 : i32
    %c0_i32_1 = arith.constant 0 : i32
    %c0_i32_2 = arith.constant 0 : i32
    return %arg2, %c0_i32, %c0_i32_0, %c0_i32_1 : i32, i32, i32, i32
  }
  func.func @transform_2(%arg0: i32, %arg1: i32, %arg2: i32) -> (i32, i32) {
    %c0_i32 = arith.constant 0 : i32
    %c0_i32_0 = arith.constant 0 : i32
    %c0_i32_1 = arith.constant 0 : i32
    return %c0_i32, %c0_i32_0 : i32, i32
  }
  func.func @transform_3(%arg0: i32, %arg1: i32, %arg2: i32) -> (i32, i32, i32, i32) {
    %c0_i32 = arith.constant 0 : i32
    %c0_i32_0 = arith.constant 0 : i32
    %c0_i32_1 = arith.constant 0 : i32
    return %arg0, %arg1, %c0_i32, %c0_i32_0 : i32, i32, i32, i32
  }
}

module attributes {stable_mosaic.version = 11 : i64} {
  func.func @kern(%arg0: i32, %arg1: i32, %arg2: i32, %arg3: memref<1x1x18x32xbf16, #tpu.memory_space<vmem>>, %arg4: memref<1x3x32x64xbf16, #tpu.memory_space<vmem>>, %arg5: memref<1x64xf32, #tpu.memory_space<vmem>>, %arg6: memref<1x1x8x64xbf16, #tpu.memory_space<vmem>>, %arg7: memref<8x64xf32, #tpu.memory_space<vmem>>) attributes {dimension_semantics = [#tpu.dimension_semantics<parallel>, #tpu.dimension_semantics<parallel>, #tpu.dimension_semantics<arbitrary>], iteration_bounds = array<i64: 2, 8, 3>, scalar_prefetch = 0 : i64, scratch_operands = 1 : i64, tpu.core_type = #tpu.core_type<tc>, window_params = [{transform_indices = @transform_0, window_bounds = array<i64: 1, 1, 18, 32>}, {transform_indices = @transform_1, window_bounds = array<i64: 1, 3, 32, 64>}, {pipeline_mode = #tpu.pipeline_mode<synchronous>, transform_indices = @transform_2, window_bounds = array<i64: 1, 64>}, {transform_indices = @transform_3, window_bounds = array<i64: 1, 1, 8, 64>}]} {
    %c0_i32 = arith.constant 0 : i32
    %0 = arith.cmpi eq, %arg2, %c0_i32 : i32
    %1 = arith.extui %0 : i1 to i32
    %c0_i32_0 = arith.constant 0 : i32
    %2 = arith.cmpi ne, %1, %c0_i32_0 : i32
    scf.if %2 {
      %cst_21 = arith.constant 0.000000e+00 : f32
      %25 = vector.broadcast %cst_21 : f32 to vector<8x64xf32>
      %c0_22 = arith.constant 0 : index
      %c0_23 = arith.constant 0 : index
      %26 = vector.load %arg7[%c0_22, %c0_23] : memref<8x64xf32, #tpu.memory_space<vmem>>, vector<8x64xf32>
      tpu.vector_store %arg7[%c0_22, %c0_23], %25 {strides = array<i32>} : memref<8x64xf32, #tpu.memory_space<vmem>>, vector<8x64xf32>,
    } else {
    }
    %c0 = arith.constant 0 : index
    %c0_1 = arith.constant 0 : index
    %c0_2 = arith.constant 0 : index
    %c0_3 = arith.constant 0 : index
    %3 = vector.load %arg3[%c0, %c0_1, %c0_2, %c0_3] : memref<1x1x18x32xbf16, #tpu.memory_space<vmem>>, vector<1x1x18x32xbf16>
    %4 = vector.shape_cast %3 : vector<1x1x18x32xbf16> to vector<18x32xbf16>
    %5 = vector.extract_strided_slice %4 {offsets = [0, 0], sizes = [8, 32], strides = [1, 1]} : vector<18x32xbf16> to vector<8x32xbf16>
    %c0_4 = arith.constant 0 : index
    %c0_5 = arith.constant 0 : index
    %c0_6 = arith.constant 0 : index
    %c0_7 = arith.constant 0 : index
    %6 = vector.load %arg4[%c0_4, %c0_5, %c0_6, %c0_7] : memref<1x3x32x64xbf16, #tpu.memory_space<vmem>>, vector<1x1x32x64xbf16>
    %7 = vector.shape_cast %6 : vector<1x1x32x64xbf16> to vector<32x64xbf16>
    %cst = arith.constant dense<0.000000e+00> : vector<8x64xf32>
    %8 = tpu.matmul %5, %7, %cst {dimension_numbers = #tpu.dot_dimension_numbers<[1], [0], [0], [1], [0, 0, 1, 1], [], []>} : vector<8x32xbf16>, vector<32x64xbf16>, vector<8x64xf32> -> vector<8x64xf32>
    %9 = vector.extract_strided_slice %4 {offsets = [9, 0], sizes = [8, 32], strides = [1, 1]} : vector<18x32xbf16> to vector<8x32xbf16>
    %c0_8 = arith.constant 0 : index
    %c1 = arith.constant 1 : index
    %c0_9 = arith.constant 0 : index
    %c0_10 = arith.constant 0 : index
    %10 = vector.load %arg4[%c0_8, %c1, %c0_9, %c0_10] : memref<1x3x32x64xbf16, #tpu.memory_space<vmem>>, vector<1x1x32x64xbf16>
    %11 = vector.shape_cast %10 : vector<1x1x32x64xbf16> to vector<32x64xbf16>
    %cst_11 = arith.constant dense<0.000000e+00> : vector<8x64xf32>
    %12 = tpu.matmul %9, %11, %cst_11 {dimension_numbers = #tpu.dot_dimension_numbers<[1], [0], [0], [1], [0, 0, 1, 1], [], []>} : vector<8x32xbf16>, vector<32x64xbf16>, vector<8x64xf32> -> vector<8x64xf32>
    %13 = arith.addf %8, %12 : vector<8x64xf32>
    %14 = vector.extract_strided_slice %4 {offsets = [1, 0], sizes = [8, 32], strides = [1, 1]} : vector<18x32xbf16> to vector<8x32xbf16>
    %c0_12 = arith.constant 0 : index
    %c2 = arith.constant 2 : index
    %c0_13 = arith.constant 0 : index
    %c0_14 = arith.constant 0 : index
    %15 = vector.load %arg4[%c0_12, %c2, %c0_13, %c0_14] : memref<1x3x32x64xbf16, #tpu.memory_space<vmem>>, vector<1x1x32x64xbf16>
    %16 = vector.shape_cast %15 : vector<1x1x32x64xbf16> to vector<32x64xbf16>
    %cst_15 = arith.constant dense<0.000000e+00> : vector<8x64xf32>
    %17 = tpu.matmul %14, %16, %cst_15 {dimension_numbers = #tpu.dot_dimension_numbers<[1], [0], [0], [1], [0, 0, 1, 1], [], []>} : vector<8x32xbf16>, vector<32x64xbf16>, vector<8x64xf32> -> vector<8x64xf32>
    %18 = arith.addf %13, %17 : vector<8x64xf32>
    %c0_16 = arith.constant 0 : index
    %c0_17 = arith.constant 0 : index
    %19 = vector.load %arg7[%c0_16, %c0_17] : memref<8x64xf32, #tpu.memory_space<vmem>>, vector<8x64xf32>
    %20 = arith.addf %19, %18 : vector<8x64xf32>
    %c0_18 = arith.constant 0 : index
    %c0_19 = arith.constant 0 : index
    %21 = vector.load %arg7[%c0_18, %c0_19] : memref<8x64xf32, #tpu.memory_space<vmem>>, vector<8x64xf32>
    tpu.vector_store %arg7[%c0_18, %c0_19], %20 {strides = array<i32>} : memref<8x64xf32, #tpu.memory_space<vmem>>, vector<8x64xf32>,
    %c2_i32 = arith.constant 2 : i32
    %22 = arith.cmpi eq, %arg2, %c2_i32 : i32
    %23 = arith.extui %22 : i1 to i32
    %c0_i32_20 = arith.constant 0 : i32
    %24 = arith.cmpi ne, %23, %c0_i32_20 : i32
    scf.if %24 {
      %c0_21 = arith.constant 0 : index
      %c0_22 = arith.constant 0 : index
      %25 = vector.load %arg7[%c0_21, %c0_22] : memref<8x64xf32, #tpu.memory_space<vmem>>, vector<8x64xf32>
      %c0_23 = arith.constant 0 : index
      %c0_24 = arith.constant 0 : index
      %26 = vector.load %arg5[%c0_23, %c0_24] : memref<1x64xf32, #tpu.memory_space<vmem>>, vector<1x64xf32>
      %27 = vector.broadcast %26 : vector<1x64xf32> to vector<8x64xf32>
      %28 = arith.addf %25, %27 : vector<8x64xf32>
      %cst_25 = arith.constant 0.000000e+00 : f32
      %29 = vector.broadcast %cst_25 : f32 to vector<8x64xf32>
      %30 = arith.maximumf %28, %29 : vector<8x64xf32>
      %31 = arith.truncf %30 : vector<8x64xf32> to vector<8x64xbf16>
      %c0_26 = arith.constant 0 : index
      %c0_27 = arith.constant 0 : index
      %c0_28 = arith.constant 0 : index
      %c0_29 = arith.constant 0 : index
      %32 = vector.load %arg6[%c0_26, %c0_27, %c0_28, %c0_29] : memref<1x1x8x64xbf16, #tpu.memory_space<vmem>>, vector<1x1x8x64xbf16>
      %33 = vector.shape_cast %32 : vector<1x1x8x64xbf16> to vector<8x64xbf16>
      %34 = vector.shape_cast %31 : vector<8x64xbf16> to vector<1x1x8x64xbf16>
      tpu.vector_store %arg6[%c0_26, %c0_27, %c0_28, %c0_29], %34 {strides = array<i32>} : memref<1x1x8x64xbf16, #tpu.memory_space<vmem>>, vector<1x1x8x64xbf16>,
    } else {
    }
    return
  }
  func.func @transform_0(%arg0: i32, %arg1: i32, %arg2: i32) -> (i32, i32, i32, i32) {
    %c2_i32 = arith.constant 2 : i32
    %0 = arith.muli %arg1, %c2_i32 : i32
    %1 = arith.addi %0, %arg2 : i32
    %c0_i32 = arith.constant 0 : i32
    %c0_i32_0 = arith.constant 0 : i32
    %c0_i32_1 = arith.constant 0 : i32
    return %arg0, %1, %c0_i32, %c0_i32_0 : i32, i32, i32, i32
  }
  func.func @transform_1(%arg0: i32, %arg1: i32, %arg2: i32) -> (i32, i32, i32, i32) {
    %c0_i32 = arith.constant 0 : i32
    %c0_i32_0 = arith.constant 0 : i32
    %c0_i32_1 = arith.constant 0 : i32
    %c0_i32_2 = arith.constant 0 : i32
    return %arg2, %c0_i32, %c0_i32_0, %c0_i32_1 : i32, i32, i32, i32
  }
  func.func @transform_2(%arg0: i32, %arg1: i32, %arg2: i32) -> (i32, i32) {
    %c0_i32 = arith.constant 0 : i32
    %c0_i32_0 = arith.constant 0 : i32
    %c0_i32_1 = arith.constant 0 : i32
    return %c0_i32, %c0_i32_0 : i32, i32
  }
  func.func @transform_3(%arg0: i32, %arg1: i32, %arg2: i32) -> (i32, i32, i32, i32) {
    %c0_i32 = arith.constant 0 : i32
    %c0_i32_0 = arith.constant 0 : i32
    %c0_i32_1 = arith.constant 0 : i32
    return %arg0, %arg1, %c0_i32, %c0_i32_0 : i32, i32, i32, i32
  }
}

module attributes {stable_mosaic.version = 11 : i64} {
  func.func @kern(%arg0: i32, %arg1: i32, %arg2: i32, %arg3: memref<1x1x10x64xbf16, #tpu.memory_space<vmem>>, %arg4: memref<1x3x64x64xbf16, #tpu.memory_space<vmem>>, %arg5: memref<1x64xf32, #tpu.memory_space<vmem>>, %arg6: memref<1x1x8x64xbf16, #tpu.memory_space<vmem>>, %arg7: memref<8x64xf32, #tpu.memory_space<vmem>>) attributes {dimension_semantics = [#tpu.dimension_semantics<parallel>, #tpu.dimension_semantics<parallel>, #tpu.dimension_semantics<arbitrary>], iteration_bounds = array<i64: 2, 8, 3>, scalar_prefetch = 0 : i64, scratch_operands = 1 : i64, tpu.core_type = #tpu.core_type<tc>, window_params = [{transform_indices = @transform_0, window_bounds = array<i64: 1, 1, 10, 64>}, {transform_indices = @transform_1, window_bounds = array<i64: 1, 3, 64, 64>}, {pipeline_mode = #tpu.pipeline_mode<synchronous>, transform_indices = @transform_2, window_bounds = array<i64: 1, 64>}, {transform_indices = @transform_3, window_bounds = array<i64: 1, 1, 8, 64>}]} {
    %c0_i32 = arith.constant 0 : i32
    %0 = arith.cmpi eq, %arg2, %c0_i32 : i32
    %1 = arith.extui %0 : i1 to i32
    %c0_i32_0 = arith.constant 0 : i32
    %2 = arith.cmpi ne, %1, %c0_i32_0 : i32
    scf.if %2 {
      %cst_21 = arith.constant 0.000000e+00 : f32
      %25 = vector.broadcast %cst_21 : f32 to vector<8x64xf32>
      %c0_22 = arith.constant 0 : index
      %c0_23 = arith.constant 0 : index
      %26 = vector.load %arg7[%c0_22, %c0_23] : memref<8x64xf32, #tpu.memory_space<vmem>>, vector<8x64xf32>
      tpu.vector_store %arg7[%c0_22, %c0_23], %25 {strides = array<i32>} : memref<8x64xf32, #tpu.memory_space<vmem>>, vector<8x64xf32>,
    } else {
    }
    %c0 = arith.constant 0 : index
    %c0_1 = arith.constant 0 : index
    %c0_2 = arith.constant 0 : index
    %c0_3 = arith.constant 0 : index
    %3 = vector.load %arg3[%c0, %c0_1, %c0_2, %c0_3] : memref<1x1x10x64xbf16, #tpu.memory_space<vmem>>, vector<1x1x10x64xbf16>
    %4 = vector.shape_cast %3 : vector<1x1x10x64xbf16> to vector<10x64xbf16>
    %5 = vector.extract_strided_slice %4 {offsets = [0, 0], sizes = [8, 64], strides = [1, 1]} : vector<10x64xbf16> to vector<8x64xbf16>
    %c0_4 = arith.constant 0 : index
    %c0_5 = arith.constant 0 : index
    %c0_6 = arith.constant 0 : index
    %c0_7 = arith.constant 0 : index
    %6 = vector.load %arg4[%c0_4, %c0_5, %c0_6, %c0_7] : memref<1x3x64x64xbf16, #tpu.memory_space<vmem>>, vector<1x1x64x64xbf16>
    %7 = vector.shape_cast %6 : vector<1x1x64x64xbf16> to vector<64x64xbf16>
    %cst = arith.constant dense<0.000000e+00> : vector<8x64xf32>
    %8 = tpu.matmul %5, %7, %cst {dimension_numbers = #tpu.dot_dimension_numbers<[1], [0], [0], [1], [0, 0, 1, 1], [], []>} : vector<8x64xbf16>, vector<64x64xbf16>, vector<8x64xf32> -> vector<8x64xf32>
    %9 = vector.extract_strided_slice %4 {offsets = [1, 0], sizes = [8, 64], strides = [1, 1]} : vector<10x64xbf16> to vector<8x64xbf16>
    %c0_8 = arith.constant 0 : index
    %c1 = arith.constant 1 : index
    %c0_9 = arith.constant 0 : index
    %c0_10 = arith.constant 0 : index
    %10 = vector.load %arg4[%c0_8, %c1, %c0_9, %c0_10] : memref<1x3x64x64xbf16, #tpu.memory_space<vmem>>, vector<1x1x64x64xbf16>
    %11 = vector.shape_cast %10 : vector<1x1x64x64xbf16> to vector<64x64xbf16>
    %cst_11 = arith.constant dense<0.000000e+00> : vector<8x64xf32>
    %12 = tpu.matmul %9, %11, %cst_11 {dimension_numbers = #tpu.dot_dimension_numbers<[1], [0], [0], [1], [0, 0, 1, 1], [], []>} : vector<8x64xbf16>, vector<64x64xbf16>, vector<8x64xf32> -> vector<8x64xf32>
    %13 = arith.addf %8, %12 : vector<8x64xf32>
    %14 = vector.extract_strided_slice %4 {offsets = [2, 0], sizes = [8, 64], strides = [1, 1]} : vector<10x64xbf16> to vector<8x64xbf16>
    %c0_12 = arith.constant 0 : index
    %c2 = arith.constant 2 : index
    %c0_13 = arith.constant 0 : index
    %c0_14 = arith.constant 0 : index
    %15 = vector.load %arg4[%c0_12, %c2, %c0_13, %c0_14] : memref<1x3x64x64xbf16, #tpu.memory_space<vmem>>, vector<1x1x64x64xbf16>
    %16 = vector.shape_cast %15 : vector<1x1x64x64xbf16> to vector<64x64xbf16>
    %cst_15 = arith.constant dense<0.000000e+00> : vector<8x64xf32>
    %17 = tpu.matmul %14, %16, %cst_15 {dimension_numbers = #tpu.dot_dimension_numbers<[1], [0], [0], [1], [0, 0, 1, 1], [], []>} : vector<8x64xbf16>, vector<64x64xbf16>, vector<8x64xf32> -> vector<8x64xf32>
    %18 = arith.addf %13, %17 : vector<8x64xf32>
    %c0_16 = arith.constant 0 : index
    %c0_17 = arith.constant 0 : index
    %19 = vector.load %arg7[%c0_16, %c0_17] : memref<8x64xf32, #tpu.memory_space<vmem>>, vector<8x64xf32>
    %20 = arith.addf %19, %18 : vector<8x64xf32>
    %c0_18 = arith.constant 0 : index
    %c0_19 = arith.constant 0 : index
    %21 = vector.load %arg7[%c0_18, %c0_19] : memref<8x64xf32, #tpu.memory_space<vmem>>, vector<8x64xf32>
    tpu.vector_store %arg7[%c0_18, %c0_19], %20 {strides = array<i32>} : memref<8x64xf32, #tpu.memory_space<vmem>>, vector<8x64xf32>,
    %c2_i32 = arith.constant 2 : i32
    %22 = arith.cmpi eq, %arg2, %c2_i32 : i32
    %23 = arith.extui %22 : i1 to i32
    %c0_i32_20 = arith.constant 0 : i32
    %24 = arith.cmpi ne, %23, %c0_i32_20 : i32
    scf.if %24 {
      %c0_21 = arith.constant 0 : index
      %c0_22 = arith.constant 0 : index
      %25 = vector.load %arg7[%c0_21, %c0_22] : memref<8x64xf32, #tpu.memory_space<vmem>>, vector<8x64xf32>
      %c0_23 = arith.constant 0 : index
      %c0_24 = arith.constant 0 : index
      %26 = vector.load %arg5[%c0_23, %c0_24] : memref<1x64xf32, #tpu.memory_space<vmem>>, vector<1x64xf32>
      %27 = vector.broadcast %26 : vector<1x64xf32> to vector<8x64xf32>
      %28 = arith.addf %25, %27 : vector<8x64xf32>
      %cst_25 = arith.constant 0.000000e+00 : f32
      %29 = vector.broadcast %cst_25 : f32 to vector<8x64xf32>
      %30 = arith.maximumf %28, %29 : vector<8x64xf32>
      %31 = arith.truncf %30 : vector<8x64xf32> to vector<8x64xbf16>
      %c0_26 = arith.constant 0 : index
      %c0_27 = arith.constant 0 : index
      %c0_28 = arith.constant 0 : index
      %c0_29 = arith.constant 0 : index
      %32 = vector.load %arg6[%c0_26, %c0_27, %c0_28, %c0_29] : memref<1x1x8x64xbf16, #tpu.memory_space<vmem>>, vector<1x1x8x64xbf16>
      %33 = vector.shape_cast %32 : vector<1x1x8x64xbf16> to vector<8x64xbf16>
      %34 = vector.shape_cast %31 : vector<8x64xbf16> to vector<1x1x8x64xbf16>
      tpu.vector_store %arg6[%c0_26, %c0_27, %c0_28, %c0_29], %34 {strides = array<i32>} : memref<1x1x8x64xbf16, #tpu.memory_space<vmem>>, vector<1x1x8x64xbf16>,
    } else {
    }
    return
  }
  func.func @transform_0(%arg0: i32, %arg1: i32, %arg2: i32) -> (i32, i32, i32, i32) {
    %c1_i32 = arith.constant 1 : i32
    %0 = arith.muli %arg1, %c1_i32 : i32
    %1 = arith.addi %0, %arg2 : i32
    %c0_i32 = arith.constant 0 : i32
    %c0_i32_0 = arith.constant 0 : i32
    %c0_i32_1 = arith.constant 0 : i32
    return %arg0, %1, %c0_i32, %c0_i32_0 : i32, i32, i32, i32
  }
  func.func @transform_1(%arg0: i32, %arg1: i32, %arg2: i32) -> (i32, i32, i32, i32) {
    %c0_i32 = arith.constant 0 : i32
    %c0_i32_0 = arith.constant 0 : i32
    %c0_i32_1 = arith.constant 0 : i32
    %c0_i32_2 = arith.constant 0 : i32
    return %arg2, %c0_i32, %c0_i32_0, %c0_i32_1 : i32, i32, i32, i32
  }
  func.func @transform_2(%arg0: i32, %arg1: i32, %arg2: i32) -> (i32, i32) {
    %c0_i32 = arith.constant 0 : i32
    %c0_i32_0 = arith.constant 0 : i32
    %c0_i32_1 = arith.constant 0 : i32
    return %c0_i32, %c0_i32_0 : i32, i32
  }
  func.func @transform_3(%arg0: i32, %arg1: i32, %arg2: i32) -> (i32, i32, i32, i32) {
    %c0_i32 = arith.constant 0 : i32
    %c0_i32_0 = arith.constant 0 : i32
    %c0_i32_1 = arith.constant 0 : i32
    return %arg0, %arg1, %c0_i32, %c0_i32_0 : i32, i32, i32, i32
  }
}

module attributes {stable_mosaic.version = 11 : i64} {
  func.func @kern(%arg0: i32, %arg1: i32, %arg2: i32, %arg3: memref<1x1x8x64xbf16, #tpu.memory_space<vmem>>, %arg4: memref<1x1x64x64xbf16, #tpu.memory_space<vmem>>, %arg5: memref<1x64xf32, #tpu.memory_space<vmem>>, %arg6: memref<1x1x8x64xbf16, #tpu.memory_space<vmem>>, %arg7: memref<8x64xf32, #tpu.memory_space<vmem>>) attributes {dimension_semantics = [#tpu.dimension_semantics<parallel>, #tpu.dimension_semantics<parallel>, #tpu.dimension_semantics<arbitrary>], iteration_bounds = array<i64: 2, 8, 1>, scalar_prefetch = 0 : i64, scratch_operands = 1 : i64, tpu.core_type = #tpu.core_type<tc>, window_params = [{transform_indices = @transform_0, window_bounds = array<i64: 1, 1, 8, 64>}, {transform_indices = @transform_1, window_bounds = array<i64: 1, 1, 64, 64>}, {pipeline_mode = #tpu.pipeline_mode<synchronous>, transform_indices = @transform_2, window_bounds = array<i64: 1, 64>}, {transform_indices = @transform_3, window_bounds = array<i64: 1, 1, 8, 64>}]} {
    %c0_i32 = arith.constant 0 : i32
    %0 = arith.cmpi eq, %arg2, %c0_i32 : i32
    %1 = arith.extui %0 : i1 to i32
    %c0_i32_0 = arith.constant 0 : i32
    %2 = arith.cmpi ne, %1, %c0_i32_0 : i32
    scf.if %2 {
      %cst_14 = arith.constant 0.000000e+00 : f32
      %14 = vector.broadcast %cst_14 : f32 to vector<8x64xf32>
      %c0_15 = arith.constant 0 : index
      %c0_16 = arith.constant 0 : index
      %15 = vector.load %arg7[%c0_15, %c0_16] : memref<8x64xf32, #tpu.memory_space<vmem>>, vector<8x64xf32>
      tpu.vector_store %arg7[%c0_15, %c0_16], %14 {strides = array<i32>} : memref<8x64xf32, #tpu.memory_space<vmem>>, vector<8x64xf32>,
    } else {
    }
    %c0 = arith.constant 0 : index
    %c0_1 = arith.constant 0 : index
    %c0_2 = arith.constant 0 : index
    %c0_3 = arith.constant 0 : index
    %3 = vector.load %arg3[%c0, %c0_1, %c0_2, %c0_3] : memref<1x1x8x64xbf16, #tpu.memory_space<vmem>>, vector<1x1x8x64xbf16>
    %4 = vector.shape_cast %3 : vector<1x1x8x64xbf16> to vector<8x64xbf16>
    %c0_4 = arith.constant 0 : index
    %c0_5 = arith.constant 0 : index
    %c0_6 = arith.constant 0 : index
    %c0_7 = arith.constant 0 : index
    %5 = vector.load %arg4[%c0_4, %c0_5, %c0_6, %c0_7] : memref<1x1x64x64xbf16, #tpu.memory_space<vmem>>, vector<1x1x64x64xbf16>
    %6 = vector.shape_cast %5 : vector<1x1x64x64xbf16> to vector<64x64xbf16>
    %cst = arith.constant dense<0.000000e+00> : vector<8x64xf32>
    %7 = tpu.matmul %4, %6, %cst {dimension_numbers = #tpu.dot_dimension_numbers<[1], [0], [0], [1], [0, 0, 1, 1], [], []>} : vector<8x64xbf16>, vector<64x64xbf16>, vector<8x64xf32> -> vector<8x64xf32>
    %c0_8 = arith.constant 0 : index
    %c0_9 = arith.constant 0 : index
    %8 = vector.load %arg7[%c0_8, %c0_9] : memref<8x64xf32, #tpu.memory_space<vmem>>, vector<8x64xf32>
    %9 = arith.addf %8, %7 : vector<8x64xf32>
    %c0_10 = arith.constant 0 : index
    %c0_11 = arith.constant 0 : index
    %10 = vector.load %arg7[%c0_10, %c0_11] : memref<8x64xf32, #tpu.memory_space<vmem>>, vector<8x64xf32>
    tpu.vector_store %arg7[%c0_10, %c0_11], %9 {strides = array<i32>} : memref<8x64xf32, #tpu.memory_space<vmem>>, vector<8x64xf32>,
    %c0_i32_12 = arith.constant 0 : i32
    %11 = arith.cmpi eq, %arg2, %c0_i32_12 : i32
    %12 = arith.extui %11 : i1 to i32
    %c0_i32_13 = arith.constant 0 : i32
    %13 = arith.cmpi ne, %12, %c0_i32_13 : i32
    scf.if %13 {
      %c0_14 = arith.constant 0 : index
      %c0_15 = arith.constant 0 : index
      %14 = vector.load %arg7[%c0_14, %c0_15] : memref<8x64xf32, #tpu.memory_space<vmem>>, vector<8x64xf32>
      %c0_16 = arith.constant 0 : index
      %c0_17 = arith.constant 0 : index
      %15 = vector.load %arg5[%c0_16, %c0_17] : memref<1x64xf32, #tpu.memory_space<vmem>>, vector<1x64xf32>
      %16 = vector.broadcast %15 : vector<1x64xf32> to vector<8x64xf32>
      %17 = arith.addf %14, %16 : vector<8x64xf32>
      %cst_18 = arith.constant 0.000000e+00 : f32
      %18 = vector.broadcast %cst_18 : f32 to vector<8x64xf32>
      %19 = arith.maximumf %17, %18 : vector<8x64xf32>
      %20 = arith.truncf %19 : vector<8x64xf32> to vector<8x64xbf16>
      %c0_19 = arith.constant 0 : index
      %c0_20 = arith.constant 0 : index
      %c0_21 = arith.constant 0 : index
      %c0_22 = arith.constant 0 : index
      %21 = vector.load %arg6[%c0_19, %c0_20, %c0_21, %c0_22] : memref<1x1x8x64xbf16, #tpu.memory_space<vmem>>, vector<1x1x8x64xbf16>
      %22 = vector.shape_cast %21 : vector<1x1x8x64xbf16> to vector<8x64xbf16>
      %23 = vector.shape_cast %20 : vector<8x64xbf16> to vector<1x1x8x64xbf16>
      tpu.vector_store %arg6[%c0_19, %c0_20, %c0_21, %c0_22], %23 {strides = array<i32>} : memref<1x1x8x64xbf16, #tpu.memory_space<vmem>>, vector<1x1x8x64xbf16>,
    } else {
    }
    return
  }
  func.func @transform_0(%arg0: i32, %arg1: i32, %arg2: i32) -> (i32, i32, i32, i32) {
    %c1_i32 = arith.constant 1 : i32
    %0 = arith.muli %arg1, %c1_i32 : i32
    %1 = arith.addi %0, %arg2 : i32
    %c0_i32 = arith.constant 0 : i32
    %c0_i32_0 = arith.constant 0 : i32
    %c0_i32_1 = arith.constant 0 : i32
    return %arg0, %1, %c0_i32, %c0_i32_0 : i32, i32, i32, i32
  }
  func.func @transform_1(%arg0: i32, %arg1: i32, %arg2: i32) -> (i32, i32, i32, i32) {
    %c0_i32 = arith.constant 0 : i32
    %c0_i32_0 = arith.constant 0 : i32
    %c0_i32_1 = arith.constant 0 : i32
    %c0_i32_2 = arith.constant 0 : i32
    return %arg2, %c0_i32, %c0_i32_0, %c0_i32_1 : i32, i32, i32, i32
  }
  func.func @transform_2(%arg0: i32, %arg1: i32, %arg2: i32) -> (i32, i32) {
    %c0_i32 = arith.constant 0 : i32
    %c0_i32_0 = arith.constant 0 : i32
    %c0_i32_1 = arith.constant 0 : i32
    return %c0_i32, %c0_i32_0 : i32, i32
  }
  func.func @transform_3(%arg0: i32, %arg1: i32, %arg2: i32) -> (i32, i32, i32, i32) {
    %c0_i32 = arith.constant 0 : i32
    %c0_i32_0 = arith.constant 0 : i32
    %c0_i32_1 = arith.constant 0 : i32
    return %arg0, %arg1, %c0_i32, %c0_i32_0 : i32, i32, i32, i32
  }
}

module attributes {stable_mosaic.version = 11 : i64} {
  func.func @kern(%arg0: i32, %arg1: i32, %arg2: i32, %arg3: memref<1x1x8x64xbf16, #tpu.memory_space<vmem>>, %arg4: memref<1x1x64x32xbf16, #tpu.memory_space<vmem>>, %arg5: memref<1x32xf32, #tpu.memory_space<vmem>>, %arg6: memref<1x1x8x32xbf16, #tpu.memory_space<vmem>>, %arg7: memref<8x32xf32, #tpu.memory_space<vmem>>) attributes {dimension_semantics = [#tpu.dimension_semantics<parallel>, #tpu.dimension_semantics<parallel>, #tpu.dimension_semantics<arbitrary>], iteration_bounds = array<i64: 2, 8, 1>, scalar_prefetch = 0 : i64, scratch_operands = 1 : i64, tpu.core_type = #tpu.core_type<tc>, window_params = [{transform_indices = @transform_0, window_bounds = array<i64: 1, 1, 8, 64>}, {transform_indices = @transform_1, window_bounds = array<i64: 1, 1, 64, 32>}, {pipeline_mode = #tpu.pipeline_mode<synchronous>, transform_indices = @transform_2, window_bounds = array<i64: 1, 32>}, {transform_indices = @transform_3, window_bounds = array<i64: 1, 1, 8, 32>}]} {
    %c0_i32 = arith.constant 0 : i32
    %0 = arith.cmpi eq, %arg2, %c0_i32 : i32
    %1 = arith.extui %0 : i1 to i32
    %c0_i32_0 = arith.constant 0 : i32
    %2 = arith.cmpi ne, %1, %c0_i32_0 : i32
    scf.if %2 {
      %cst_14 = arith.constant 0.000000e+00 : f32
      %14 = vector.broadcast %cst_14 : f32 to vector<8x32xf32>
      %c0_15 = arith.constant 0 : index
      %c0_16 = arith.constant 0 : index
      %15 = vector.load %arg7[%c0_15, %c0_16] : memref<8x32xf32, #tpu.memory_space<vmem>>, vector<8x32xf32>
      tpu.vector_store %arg7[%c0_15, %c0_16], %14 {strides = array<i32>} : memref<8x32xf32, #tpu.memory_space<vmem>>, vector<8x32xf32>,
    } else {
    }
    %c0 = arith.constant 0 : index
    %c0_1 = arith.constant 0 : index
    %c0_2 = arith.constant 0 : index
    %c0_3 = arith.constant 0 : index
    %3 = vector.load %arg3[%c0, %c0_1, %c0_2, %c0_3] : memref<1x1x8x64xbf16, #tpu.memory_space<vmem>>, vector<1x1x8x64xbf16>
    %4 = vector.shape_cast %3 : vector<1x1x8x64xbf16> to vector<8x64xbf16>
    %c0_4 = arith.constant 0 : index
    %c0_5 = arith.constant 0 : index
    %c0_6 = arith.constant 0 : index
    %c0_7 = arith.constant 0 : index
    %5 = vector.load %arg4[%c0_4, %c0_5, %c0_6, %c0_7] : memref<1x1x64x32xbf16, #tpu.memory_space<vmem>>, vector<1x1x64x32xbf16>
    %6 = vector.shape_cast %5 : vector<1x1x64x32xbf16> to vector<64x32xbf16>
    %cst = arith.constant dense<0.000000e+00> : vector<8x32xf32>
    %7 = tpu.matmul %4, %6, %cst {dimension_numbers = #tpu.dot_dimension_numbers<[1], [0], [0], [1], [0, 0, 1, 1], [], []>} : vector<8x64xbf16>, vector<64x32xbf16>, vector<8x32xf32> -> vector<8x32xf32>
    %c0_8 = arith.constant 0 : index
    %c0_9 = arith.constant 0 : index
    %8 = vector.load %arg7[%c0_8, %c0_9] : memref<8x32xf32, #tpu.memory_space<vmem>>, vector<8x32xf32>
    %9 = arith.addf %8, %7 : vector<8x32xf32>
    %c0_10 = arith.constant 0 : index
    %c0_11 = arith.constant 0 : index
    %10 = vector.load %arg7[%c0_10, %c0_11] : memref<8x32xf32, #tpu.memory_space<vmem>>, vector<8x32xf32>
    tpu.vector_store %arg7[%c0_10, %c0_11], %9 {strides = array<i32>} : memref<8x32xf32, #tpu.memory_space<vmem>>, vector<8x32xf32>,
    %c0_i32_12 = arith.constant 0 : i32
    %11 = arith.cmpi eq, %arg2, %c0_i32_12 : i32
    %12 = arith.extui %11 : i1 to i32
    %c0_i32_13 = arith.constant 0 : i32
    %13 = arith.cmpi ne, %12, %c0_i32_13 : i32
    scf.if %13 {
      %c0_14 = arith.constant 0 : index
      %c0_15 = arith.constant 0 : index
      %14 = vector.load %arg7[%c0_14, %c0_15] : memref<8x32xf32, #tpu.memory_space<vmem>>, vector<8x32xf32>
      %c0_16 = arith.constant 0 : index
      %c0_17 = arith.constant 0 : index
      %15 = vector.load %arg5[%c0_16, %c0_17] : memref<1x32xf32, #tpu.memory_space<vmem>>, vector<1x32xf32>
      %16 = vector.broadcast %15 : vector<1x32xf32> to vector<8x32xf32>
      %17 = arith.addf %14, %16 : vector<8x32xf32>
      %cst_18 = arith.constant 0.000000e+00 : f32
      %18 = vector.broadcast %cst_18 : f32 to vector<8x32xf32>
      %19 = arith.maximumf %17, %18 : vector<8x32xf32>
      %20 = arith.truncf %19 : vector<8x32xf32> to vector<8x32xbf16>
      %c0_19 = arith.constant 0 : index
      %c0_20 = arith.constant 0 : index
      %c0_21 = arith.constant 0 : index
      %c0_22 = arith.constant 0 : index
      %21 = vector.load %arg6[%c0_19, %c0_20, %c0_21, %c0_22] : memref<1x1x8x32xbf16, #tpu.memory_space<vmem>>, vector<1x1x8x32xbf16>
      %22 = vector.shape_cast %21 : vector<1x1x8x32xbf16> to vector<8x32xbf16>
      %23 = vector.shape_cast %20 : vector<8x32xbf16> to vector<1x1x8x32xbf16>
      tpu.vector_store %arg6[%c0_19, %c0_20, %c0_21, %c0_22], %23 {strides = array<i32>} : memref<1x1x8x32xbf16, #tpu.memory_space<vmem>>, vector<1x1x8x32xbf16>,
    } else {
    }
    return
  }
  func.func @transform_0(%arg0: i32, %arg1: i32, %arg2: i32) -> (i32, i32, i32, i32) {
    %c1_i32 = arith.constant 1 : i32
    %0 = arith.muli %arg1, %c1_i32 : i32
    %1 = arith.addi %0, %arg2 : i32
    %c0_i32 = arith.constant 0 : i32
    %c0_i32_0 = arith.constant 0 : i32
    %c0_i32_1 = arith.constant 0 : i32
    return %arg0, %1, %c0_i32, %c0_i32_0 : i32, i32, i32, i32
  }
  func.func @transform_1(%arg0: i32, %arg1: i32, %arg2: i32) -> (i32, i32, i32, i32) {
    %c0_i32 = arith.constant 0 : i32
    %c0_i32_0 = arith.constant 0 : i32
    %c0_i32_1 = arith.constant 0 : i32
    %c0_i32_2 = arith.constant 0 : i32
    return %arg2, %c0_i32, %c0_i32_0, %c0_i32_1 : i32, i32, i32, i32
  }
  func.func @transform_2(%arg0: i32, %arg1: i32, %arg2: i32) -> (i32, i32) {
    %c0_i32 = arith.constant 0 : i32
    %c0_i32_0 = arith.constant 0 : i32
    %c0_i32_1 = arith.constant 0 : i32
    return %c0_i32, %c0_i32_0 : i32, i32
  }
  func.func @transform_3(%arg0: i32, %arg1: i32, %arg2: i32) -> (i32, i32, i32, i32) {
    %c0_i32 = arith.constant 0 : i32
    %c0_i32_0 = arith.constant 0 : i32
    %c0_i32_1 = arith.constant 0 : i32
    return %arg0, %arg1, %c0_i32, %c0_i32_0 : i32, i32, i32, i32
  }
}

module attributes {stable_mosaic.version = 11 : i64} {
  func.func @kern(%arg0: i32, %arg1: i32, %arg2: i32, %arg3: memref<1x1x9x64xbf16, #tpu.memory_space<vmem>>, %arg4: memref<1x2x64x32xbf16, #tpu.memory_space<vmem>>, %arg5: memref<1x32xf32, #tpu.memory_space<vmem>>, %arg6: memref<1x1x8x32xbf16, #tpu.memory_space<vmem>>, %arg7: memref<8x32xf32, #tpu.memory_space<vmem>>) attributes {dimension_semantics = [#tpu.dimension_semantics<parallel>, #tpu.dimension_semantics<parallel>, #tpu.dimension_semantics<arbitrary>], iteration_bounds = array<i64: 2, 8, 1>, scalar_prefetch = 0 : i64, scratch_operands = 1 : i64, tpu.core_type = #tpu.core_type<tc>, window_params = [{transform_indices = @transform_0, window_bounds = array<i64: 1, 1, 9, 64>}, {transform_indices = @transform_1, window_bounds = array<i64: 1, 2, 64, 32>}, {pipeline_mode = #tpu.pipeline_mode<synchronous>, transform_indices = @transform_2, window_bounds = array<i64: 1, 32>}, {transform_indices = @transform_3, window_bounds = array<i64: 1, 1, 8, 32>}]} {
    %c0_i32 = arith.constant 0 : i32
    %0 = arith.cmpi eq, %arg2, %c0_i32 : i32
    %1 = arith.extui %0 : i1 to i32
    %c0_i32_0 = arith.constant 0 : i32
    %2 = arith.cmpi ne, %1, %c0_i32_0 : i32
    scf.if %2 {
      %cst_18 = arith.constant 0.000000e+00 : f32
      %20 = vector.broadcast %cst_18 : f32 to vector<8x32xf32>
      %c0_19 = arith.constant 0 : index
      %c0_20 = arith.constant 0 : index
      %21 = vector.load %arg7[%c0_19, %c0_20] : memref<8x32xf32, #tpu.memory_space<vmem>>, vector<8x32xf32>
      tpu.vector_store %arg7[%c0_19, %c0_20], %20 {strides = array<i32>} : memref<8x32xf32, #tpu.memory_space<vmem>>, vector<8x32xf32>,
    } else {
    }
    %c0 = arith.constant 0 : index
    %c0_1 = arith.constant 0 : index
    %c0_2 = arith.constant 0 : index
    %c0_3 = arith.constant 0 : index
    %3 = vector.load %arg3[%c0, %c0_1, %c0_2, %c0_3] : memref<1x1x9x64xbf16, #tpu.memory_space<vmem>>, vector<1x1x9x64xbf16>
    %4 = vector.shape_cast %3 : vector<1x1x9x64xbf16> to vector<9x64xbf16>
    %5 = vector.extract_strided_slice %4 {offsets = [0, 0], sizes = [8, 64], strides = [1, 1]} : vector<9x64xbf16> to vector<8x64xbf16>
    %c0_4 = arith.constant 0 : index
    %c0_5 = arith.constant 0 : index
    %c0_6 = arith.constant 0 : index
    %c0_7 = arith.constant 0 : index
    %6 = vector.load %arg4[%c0_4, %c0_5, %c0_6, %c0_7] : memref<1x2x64x32xbf16, #tpu.memory_space<vmem>>, vector<1x1x64x32xbf16>
    %7 = vector.shape_cast %6 : vector<1x1x64x32xbf16> to vector<64x32xbf16>
    %cst = arith.constant dense<0.000000e+00> : vector<8x32xf32>
    %8 = tpu.matmul %5, %7, %cst {dimension_numbers = #tpu.dot_dimension_numbers<[1], [0], [0], [1], [0, 0, 1, 1], [], []>} : vector<8x64xbf16>, vector<64x32xbf16>, vector<8x32xf32> -> vector<8x32xf32>
    %9 = vector.extract_strided_slice %4 {offsets = [1, 0], sizes = [8, 64], strides = [1, 1]} : vector<9x64xbf16> to vector<8x64xbf16>
    %c0_8 = arith.constant 0 : index
    %c1 = arith.constant 1 : index
    %c0_9 = arith.constant 0 : index
    %c0_10 = arith.constant 0 : index
    %10 = vector.load %arg4[%c0_8, %c1, %c0_9, %c0_10] : memref<1x2x64x32xbf16, #tpu.memory_space<vmem>>, vector<1x1x64x32xbf16>
    %11 = vector.shape_cast %10 : vector<1x1x64x32xbf16> to vector<64x32xbf16>
    %cst_11 = arith.constant dense<0.000000e+00> : vector<8x32xf32>
    %12 = tpu.matmul %9, %11, %cst_11 {dimension_numbers = #tpu.dot_dimension_numbers<[1], [0], [0], [1], [0, 0, 1, 1], [], []>} : vector<8x64xbf16>, vector<64x32xbf16>, vector<8x32xf32> -> vector<8x32xf32>
    %13 = arith.addf %8, %12 : vector<8x32xf32>
    %c0_12 = arith.constant 0 : index
    %c0_13 = arith.constant 0 : index
    %14 = vector.load %arg7[%c0_12, %c0_13] : memref<8x32xf32, #tpu.memory_space<vmem>>, vector<8x32xf32>
    %15 = arith.addf %14, %13 : vector<8x32xf32>
    %c0_14 = arith.constant 0 : index
    %c0_15 = arith.constant 0 : index
    %16 = vector.load %arg7[%c0_14, %c0_15] : memref<8x32xf32, #tpu.memory_space<vmem>>, vector<8x32xf32>
    tpu.vector_store %arg7[%c0_14, %c0_15], %15 {strides = array<i32>} : memref<8x32xf32, #tpu.memory_space<vmem>>, vector<8x32xf32>,
    %c0_i32_16 = arith.constant 0 : i32
    %17 = arith.cmpi eq, %arg2, %c0_i32_16 : i32
    %18 = arith.extui %17 : i1 to i32
    %c0_i32_17 = arith.constant 0 : i32
    %19 = arith.cmpi ne, %18, %c0_i32_17 : i32
    scf.if %19 {
      %c0_18 = arith.constant 0 : index
      %c0_19 = arith.constant 0 : index
      %20 = vector.load %arg7[%c0_18, %c0_19] : memref<8x32xf32, #tpu.memory_space<vmem>>, vector<8x32xf32>
      %c0_20 = arith.constant 0 : index
      %c0_21 = arith.constant 0 : index
      %21 = vector.load %arg5[%c0_20, %c0_21] : memref<1x32xf32, #tpu.memory_space<vmem>>, vector<1x32xf32>
      %22 = vector.broadcast %21 : vector<1x32xf32> to vector<8x32xf32>
      %23 = arith.addf %20, %22 : vector<8x32xf32>
      %cst_22 = arith.constant 0.000000e+00 : f32
      %24 = vector.broadcast %cst_22 : f32 to vector<8x32xf32>
      %25 = arith.maximumf %23, %24 : vector<8x32xf32>
      %26 = arith.truncf %25 : vector<8x32xf32> to vector<8x32xbf16>
      %c0_23 = arith.constant 0 : index
      %c0_24 = arith.constant 0 : index
      %c0_25 = arith.constant 0 : index
      %c0_26 = arith.constant 0 : index
      %27 = vector.load %arg6[%c0_23, %c0_24, %c0_25, %c0_26] : memref<1x1x8x32xbf16, #tpu.memory_space<vmem>>, vector<1x1x8x32xbf16>
      %28 = vector.shape_cast %27 : vector<1x1x8x32xbf16> to vector<8x32xbf16>
      %29 = vector.shape_cast %26 : vector<8x32xbf16> to vector<1x1x8x32xbf16>
      tpu.vector_store %arg6[%c0_23, %c0_24, %c0_25, %c0_26], %29 {strides = array<i32>} : memref<1x1x8x32xbf16, #tpu.memory_space<vmem>>, vector<1x1x8x32xbf16>,
    } else {
    }
    return
  }
  func.func @transform_0(%arg0: i32, %arg1: i32, %arg2: i32) -> (i32, i32, i32, i32) {
    %c1_i32 = arith.constant 1 : i32
    %0 = arith.muli %arg1, %c1_i32 : i32
    %1 = arith.addi %0, %arg2 : i32
    %c0_i32 = arith.constant 0 : i32
    %c0_i32_0 = arith.constant 0 : i32
    %c0_i32_1 = arith.constant 0 : i32
    return %arg0, %1, %c0_i32, %c0_i32_0 : i32, i32, i32, i32
  }
  func.func @transform_1(%arg0: i32, %arg1: i32, %arg2: i32) -> (i32, i32, i32, i32) {
    %c0_i32 = arith.constant 0 : i32
    %c0_i32_0 = arith.constant 0 : i32
    %c0_i32_1 = arith.constant 0 : i32
    %c0_i32_2 = arith.constant 0 : i32
    return %arg2, %c0_i32, %c0_i32_0, %c0_i32_1 : i32, i32, i32, i32
  }
  func.func @transform_2(%arg0: i32, %arg1: i32, %arg2: i32) -> (i32, i32) {
    %c0_i32 = arith.constant 0 : i32
    %c0_i32_0 = arith.constant 0 : i32
    %c0_i32_1 = arith.constant 0 : i32
    return %c0_i32, %c0_i32_0 : i32, i32
  }
  func.func @transform_3(%arg0: i32, %arg1: i32, %arg2: i32) -> (i32, i32, i32, i32) {
    %c0_i32 = arith.constant 0 : i32
    %c0_i32_0 = arith.constant 0 : i32
    %c0_i32_1 = arith.constant 0 : i32
    return %arg0, %arg1, %c0_i32, %c0_i32_0 : i32, i32, i32, i32
  }
}

module attributes {stable_mosaic.version = 11 : i64} {
  func.func @kern(%arg0: i32, %arg1: i32, %arg2: i32, %arg3: memref<1x1x9x64xbf16, #tpu.memory_space<vmem>>, %arg4: memref<1x2x64x32xbf16, #tpu.memory_space<vmem>>, %arg5: memref<1x32xf32, #tpu.memory_space<vmem>>, %arg6: memref<1x1x8x32xbf16, #tpu.memory_space<vmem>>, %arg7: memref<8x32xf32, #tpu.memory_space<vmem>>) attributes {dimension_semantics = [#tpu.dimension_semantics<parallel>, #tpu.dimension_semantics<parallel>, #tpu.dimension_semantics<arbitrary>], iteration_bounds = array<i64: 2, 8, 2>, scalar_prefetch = 0 : i64, scratch_operands = 1 : i64, tpu.core_type = #tpu.core_type<tc>, window_params = [{transform_indices = @transform_0, window_bounds = array<i64: 1, 1, 9, 64>}, {transform_indices = @transform_1, window_bounds = array<i64: 1, 2, 64, 32>}, {pipeline_mode = #tpu.pipeline_mode<synchronous>, transform_indices = @transform_2, window_bounds = array<i64: 1, 32>}, {transform_indices = @transform_3, window_bounds = array<i64: 1, 1, 8, 32>}]} {
    %c0_i32 = arith.constant 0 : i32
    %0 = arith.cmpi eq, %arg2, %c0_i32 : i32
    %1 = arith.extui %0 : i1 to i32
    %c0_i32_0 = arith.constant 0 : i32
    %2 = arith.cmpi ne, %1, %c0_i32_0 : i32
    scf.if %2 {
      %cst_17 = arith.constant 0.000000e+00 : f32
      %20 = vector.broadcast %cst_17 : f32 to vector<8x32xf32>
      %c0_18 = arith.constant 0 : index
      %c0_19 = arith.constant 0 : index
      %21 = vector.load %arg7[%c0_18, %c0_19] : memref<8x32xf32, #tpu.memory_space<vmem>>, vector<8x32xf32>
      tpu.vector_store %arg7[%c0_18, %c0_19], %20 {strides = array<i32>} : memref<8x32xf32, #tpu.memory_space<vmem>>, vector<8x32xf32>,
    } else {
    }
    %c0 = arith.constant 0 : index
    %c0_1 = arith.constant 0 : index
    %c0_2 = arith.constant 0 : index
    %c0_3 = arith.constant 0 : index
    %3 = vector.load %arg3[%c0, %c0_1, %c0_2, %c0_3] : memref<1x1x9x64xbf16, #tpu.memory_space<vmem>>, vector<1x1x9x64xbf16>
    %4 = vector.shape_cast %3 : vector<1x1x9x64xbf16> to vector<9x64xbf16>
    %5 = vector.extract_strided_slice %4 {offsets = [0, 0], sizes = [8, 64], strides = [1, 1]} : vector<9x64xbf16> to vector<8x64xbf16>
    %c0_4 = arith.constant 0 : index
    %c0_5 = arith.constant 0 : index
    %c0_6 = arith.constant 0 : index
    %c0_7 = arith.constant 0 : index
    %6 = vector.load %arg4[%c0_4, %c0_5, %c0_6, %c0_7] : memref<1x2x64x32xbf16, #tpu.memory_space<vmem>>, vector<1x1x64x32xbf16>
    %7 = vector.shape_cast %6 : vector<1x1x64x32xbf16> to vector<64x32xbf16>
    %cst = arith.constant dense<0.000000e+00> : vector<8x32xf32>
    %8 = tpu.matmul %5, %7, %cst {dimension_numbers = #tpu.dot_dimension_numbers<[1], [0], [0], [1], [0, 0, 1, 1], [], []>} : vector<8x64xbf16>, vector<64x32xbf16>, vector<8x32xf32> -> vector<8x32xf32>
    %9 = vector.extract_strided_slice %4 {offsets = [1, 0], sizes = [8, 64], strides = [1, 1]} : vector<9x64xbf16> to vector<8x64xbf16>
    %c0_8 = arith.constant 0 : index
    %c1 = arith.constant 1 : index
    %c0_9 = arith.constant 0 : index
    %c0_10 = arith.constant 0 : index
    %10 = vector.load %arg4[%c0_8, %c1, %c0_9, %c0_10] : memref<1x2x64x32xbf16, #tpu.memory_space<vmem>>, vector<1x1x64x32xbf16>
    %11 = vector.shape_cast %10 : vector<1x1x64x32xbf16> to vector<64x32xbf16>
    %cst_11 = arith.constant dense<0.000000e+00> : vector<8x32xf32>
    %12 = tpu.matmul %9, %11, %cst_11 {dimension_numbers = #tpu.dot_dimension_numbers<[1], [0], [0], [1], [0, 0, 1, 1], [], []>} : vector<8x64xbf16>, vector<64x32xbf16>, vector<8x32xf32> -> vector<8x32xf32>
    %13 = arith.addf %8, %12 : vector<8x32xf32>
    %c0_12 = arith.constant 0 : index
    %c0_13 = arith.constant 0 : index
    %14 = vector.load %arg7[%c0_12, %c0_13] : memref<8x32xf32, #tpu.memory_space<vmem>>, vector<8x32xf32>
    %15 = arith.addf %14, %13 : vector<8x32xf32>
    %c0_14 = arith.constant 0 : index
    %c0_15 = arith.constant 0 : index
    %16 = vector.load %arg7[%c0_14, %c0_15] : memref<8x32xf32, #tpu.memory_space<vmem>>, vector<8x32xf32>
    tpu.vector_store %arg7[%c0_14, %c0_15], %15 {strides = array<i32>} : memref<8x32xf32, #tpu.memory_space<vmem>>, vector<8x32xf32>,
    %c1_i32 = arith.constant 1 : i32
    %17 = arith.cmpi eq, %arg2, %c1_i32 : i32
    %18 = arith.extui %17 : i1 to i32
    %c0_i32_16 = arith.constant 0 : i32
    %19 = arith.cmpi ne, %18, %c0_i32_16 : i32
    scf.if %19 {
      %c0_17 = arith.constant 0 : index
      %c0_18 = arith.constant 0 : index
      %20 = vector.load %arg7[%c0_17, %c0_18] : memref<8x32xf32, #tpu.memory_space<vmem>>, vector<8x32xf32>
      %c0_19 = arith.constant 0 : index
      %c0_20 = arith.constant 0 : index
      %21 = vector.load %arg5[%c0_19, %c0_20] : memref<1x32xf32, #tpu.memory_space<vmem>>, vector<1x32xf32>
      %22 = vector.broadcast %21 : vector<1x32xf32> to vector<8x32xf32>
      %23 = arith.addf %20, %22 : vector<8x32xf32>
      %cst_21 = arith.constant 0.000000e+00 : f32
      %24 = vector.broadcast %cst_21 : f32 to vector<8x32xf32>
      %25 = arith.maximumf %23, %24 : vector<8x32xf32>
      %26 = arith.truncf %25 : vector<8x32xf32> to vector<8x32xbf16>
      %c0_22 = arith.constant 0 : index
      %c0_23 = arith.constant 0 : index
      %c0_24 = arith.constant 0 : index
      %c0_25 = arith.constant 0 : index
      %27 = vector.load %arg6[%c0_22, %c0_23, %c0_24, %c0_25] : memref<1x1x8x32xbf16, #tpu.memory_space<vmem>>, vector<1x1x8x32xbf16>
      %28 = vector.shape_cast %27 : vector<1x1x8x32xbf16> to vector<8x32xbf16>
      %29 = vector.shape_cast %26 : vector<8x32xbf16> to vector<1x1x8x32xbf16>
      tpu.vector_store %arg6[%c0_22, %c0_23, %c0_24, %c0_25], %29 {strides = array<i32>} : memref<1x1x8x32xbf16, #tpu.memory_space<vmem>>, vector<1x1x8x32xbf16>,
    } else {
    }
    return
  }
  func.func @transform_0(%arg0: i32, %arg1: i32, %arg2: i32) -> (i32, i32, i32, i32) {
    %c1_i32 = arith.constant 1 : i32
    %0 = arith.muli %arg1, %c1_i32 : i32
    %1 = arith.addi %0, %arg2 : i32
    %c0_i32 = arith.constant 0 : i32
    %c0_i32_0 = arith.constant 0 : i32
    %c0_i32_1 = arith.constant 0 : i32
    return %arg0, %1, %c0_i32, %c0_i32_0 : i32, i32, i32, i32
  }
  func.func @transform_1(%arg0: i32, %arg1: i32, %arg2: i32) -> (i32, i32, i32, i32) {
    %c0_i32 = arith.constant 0 : i32
    %c0_i32_0 = arith.constant 0 : i32
    %c0_i32_1 = arith.constant 0 : i32
    %c0_i32_2 = arith.constant 0 : i32
    return %arg2, %c0_i32, %c0_i32_0, %c0_i32_1 : i32, i32, i32, i32
  }
  func.func @transform_2(%arg0: i32, %arg1: i32, %arg2: i32) -> (i32, i32) {
    %c0_i32 = arith.constant 0 : i32
    %c0_i32_0 = arith.constant 0 : i32
    %c0_i32_1 = arith.constant 0 : i32
    return %c0_i32, %c0_i32_0 : i32, i32
  }
  func.func @transform_3(%arg0: i32, %arg1: i32, %arg2: i32) -> (i32, i32, i32, i32) {
    %c0_i32 = arith.constant 0 : i32
    %c0_i32_0 = arith.constant 0 : i32
    %c0_i32_1 = arith.constant 0 : i32
    return %arg0, %arg1, %c0_i32, %c0_i32_0 : i32, i32, i32, i32
  }
}

module attributes {stable_mosaic.version = 11 : i64} {
  func.func @kern(%arg0: i32, %arg1: i32, %arg2: i32, %arg3: memref<1x1x8x64xbf16, #tpu.memory_space<vmem>>, %arg4: memref<1x1x64x32xbf16, #tpu.memory_space<vmem>>, %arg5: memref<1x32xf32, #tpu.memory_space<vmem>>, %arg6: memref<1x1x8x32xbf16, #tpu.memory_space<vmem>>, %arg7: memref<8x32xf32, #tpu.memory_space<vmem>>) attributes {dimension_semantics = [#tpu.dimension_semantics<parallel>, #tpu.dimension_semantics<parallel>, #tpu.dimension_semantics<arbitrary>], iteration_bounds = array<i64: 2, 8, 2>, scalar_prefetch = 0 : i64, scratch_operands = 1 : i64, tpu.core_type = #tpu.core_type<tc>, window_params = [{transform_indices = @transform_0, window_bounds = array<i64: 1, 1, 8, 64>}, {transform_indices = @transform_1, window_bounds = array<i64: 1, 1, 64, 32>}, {pipeline_mode = #tpu.pipeline_mode<synchronous>, transform_indices = @transform_2, window_bounds = array<i64: 1, 32>}, {transform_indices = @transform_3, window_bounds = array<i64: 1, 1, 8, 32>}]} {
    %c0_i32 = arith.constant 0 : i32
    %0 = arith.cmpi eq, %arg2, %c0_i32 : i32
    %1 = arith.extui %0 : i1 to i32
    %c0_i32_0 = arith.constant 0 : i32
    %2 = arith.cmpi ne, %1, %c0_i32_0 : i32
    scf.if %2 {
      %cst_13 = arith.constant 0.000000e+00 : f32
      %14 = vector.broadcast %cst_13 : f32 to vector<8x32xf32>
      %c0_14 = arith.constant 0 : index
      %c0_15 = arith.constant 0 : index
      %15 = vector.load %arg7[%c0_14, %c0_15] : memref<8x32xf32, #tpu.memory_space<vmem>>, vector<8x32xf32>
      tpu.vector_store %arg7[%c0_14, %c0_15], %14 {strides = array<i32>} : memref<8x32xf32, #tpu.memory_space<vmem>>, vector<8x32xf32>,
    } else {
    }
    %c0 = arith.constant 0 : index
    %c0_1 = arith.constant 0 : index
    %c0_2 = arith.constant 0 : index
    %c0_3 = arith.constant 0 : index
    %3 = vector.load %arg3[%c0, %c0_1, %c0_2, %c0_3] : memref<1x1x8x64xbf16, #tpu.memory_space<vmem>>, vector<1x1x8x64xbf16>
    %4 = vector.shape_cast %3 : vector<1x1x8x64xbf16> to vector<8x64xbf16>
    %c0_4 = arith.constant 0 : index
    %c0_5 = arith.constant 0 : index
    %c0_6 = arith.constant 0 : index
    %c0_7 = arith.constant 0 : index
    %5 = vector.load %arg4[%c0_4, %c0_5, %c0_6, %c0_7] : memref<1x1x64x32xbf16, #tpu.memory_space<vmem>>, vector<1x1x64x32xbf16>
    %6 = vector.shape_cast %5 : vector<1x1x64x32xbf16> to vector<64x32xbf16>
    %cst = arith.constant dense<0.000000e+00> : vector<8x32xf32>
    %7 = tpu.matmul %4, %6, %cst {dimension_numbers = #tpu.dot_dimension_numbers<[1], [0], [0], [1], [0, 0, 1, 1], [], []>} : vector<8x64xbf16>, vector<64x32xbf16>, vector<8x32xf32> -> vector<8x32xf32>
    %c0_8 = arith.constant 0 : index
    %c0_9 = arith.constant 0 : index
    %8 = vector.load %arg7[%c0_8, %c0_9] : memref<8x32xf32, #tpu.memory_space<vmem>>, vector<8x32xf32>
    %9 = arith.addf %8, %7 : vector<8x32xf32>
    %c0_10 = arith.constant 0 : index
    %c0_11 = arith.constant 0 : index
    %10 = vector.load %arg7[%c0_10, %c0_11] : memref<8x32xf32, #tpu.memory_space<vmem>>, vector<8x32xf32>
    tpu.vector_store %arg7[%c0_10, %c0_11], %9 {strides = array<i32>} : memref<8x32xf32, #tpu.memory_space<vmem>>, vector<8x32xf32>,
    %c1_i32 = arith.constant 1 : i32
    %11 = arith.cmpi eq, %arg2, %c1_i32 : i32
    %12 = arith.extui %11 : i1 to i32
    %c0_i32_12 = arith.constant 0 : i32
    %13 = arith.cmpi ne, %12, %c0_i32_12 : i32
    scf.if %13 {
      %c0_13 = arith.constant 0 : index
      %c0_14 = arith.constant 0 : index
      %14 = vector.load %arg7[%c0_13, %c0_14] : memref<8x32xf32, #tpu.memory_space<vmem>>, vector<8x32xf32>
      %c0_15 = arith.constant 0 : index
      %c0_16 = arith.constant 0 : index
      %15 = vector.load %arg5[%c0_15, %c0_16] : memref<1x32xf32, #tpu.memory_space<vmem>>, vector<1x32xf32>
      %16 = vector.broadcast %15 : vector<1x32xf32> to vector<8x32xf32>
      %17 = arith.addf %14, %16 : vector<8x32xf32>
      %cst_17 = arith.constant 0.000000e+00 : f32
      %18 = vector.broadcast %cst_17 : f32 to vector<8x32xf32>
      %19 = arith.maximumf %17, %18 : vector<8x32xf32>
      %20 = arith.truncf %19 : vector<8x32xf32> to vector<8x32xbf16>
      %c0_18 = arith.constant 0 : index
      %c0_19 = arith.constant 0 : index
      %c0_20 = arith.constant 0 : index
      %c0_21 = arith.constant 0 : index
      %21 = vector.load %arg6[%c0_18, %c0_19, %c0_20, %c0_21] : memref<1x1x8x32xbf16, #tpu.memory_space<vmem>>, vector<1x1x8x32xbf16>
      %22 = vector.shape_cast %21 : vector<1x1x8x32xbf16> to vector<8x32xbf16>
      %23 = vector.shape_cast %20 : vector<8x32xbf16> to vector<1x1x8x32xbf16>
      tpu.vector_store %arg6[%c0_18, %c0_19, %c0_20, %c0_21], %23 {strides = array<i32>} : memref<1x1x8x32xbf16, #tpu.memory_space<vmem>>, vector<1x1x8x32xbf16>,
    } else {
    }
    return
  }
  func.func @transform_0(%arg0: i32, %arg1: i32, %arg2: i32) -> (i32, i32, i32, i32) {
    %c1_i32 = arith.constant 1 : i32
    %0 = arith.muli %arg1, %c1_i32 : i32
    %1 = arith.addi %0, %arg2 : i32
    %c0_i32 = arith.constant 0 : i32
    %c0_i32_0 = arith.constant 0 : i32
    %c0_i32_1 = arith.constant 0 : i32
    return %arg0, %1, %c0_i32, %c0_i32_0 : i32, i32, i32, i32
  }
  func.func @transform_1(%arg0: i32, %arg1: i32, %arg2: i32) -> (i32, i32, i32, i32) {
    %c0_i32 = arith.constant 0 : i32
    %c0_i32_0 = arith.constant 0 : i32
    %c0_i32_1 = arith.constant 0 : i32
    %c0_i32_2 = arith.constant 0 : i32
    return %arg2, %c0_i32, %c0_i32_0, %c0_i32_1 : i32, i32, i32, i32
  }
  func.func @transform_2(%arg0: i32, %arg1: i32, %arg2: i32) -> (i32, i32) {
    %c0_i32 = arith.constant 0 : i32
    %c0_i32_0 = arith.constant 0 : i32
    %c0_i32_1 = arith.constant 0 : i32
    return %c0_i32, %c0_i32_0 : i32, i32
  }
  func.func @transform_3(%arg0: i32, %arg1: i32, %arg2: i32) -> (i32, i32, i32, i32) {
    %c0_i32 = arith.constant 0 : i32
    %c0_i32_0 = arith.constant 0 : i32
    %c0_i32_1 = arith.constant 0 : i32
    return %arg0, %arg1, %c0_i32, %c0_i32_0 : i32, i32, i32, i32
  }
}

module attributes {stable_mosaic.version = 11 : i64} {
  func.func @kern(%arg0: i32, %arg1: i32, %arg2: i32, %arg3: memref<1x1x16x32xbf16, #tpu.memory_space<vmem>>, %arg4: memref<1x1x32x32xbf16, #tpu.memory_space<vmem>>, %arg5: memref<1x32xf32, #tpu.memory_space<vmem>>, %arg6: memref<1x1x16x32xbf16, #tpu.memory_space<vmem>>, %arg7: memref<16x32xf32, #tpu.memory_space<vmem>>) attributes {dimension_semantics = [#tpu.dimension_semantics<parallel>, #tpu.dimension_semantics<parallel>, #tpu.dimension_semantics<arbitrary>], iteration_bounds = array<i64: 2, 16, 1>, scalar_prefetch = 0 : i64, scratch_operands = 1 : i64, tpu.core_type = #tpu.core_type<tc>, window_params = [{transform_indices = @transform_0, window_bounds = array<i64: 1, 1, 16, 32>}, {transform_indices = @transform_1, window_bounds = array<i64: 1, 1, 32, 32>}, {pipeline_mode = #tpu.pipeline_mode<synchronous>, transform_indices = @transform_2, window_bounds = array<i64: 1, 32>}, {transform_indices = @transform_3, window_bounds = array<i64: 1, 1, 16, 32>}]} {
    %c0_i32 = arith.constant 0 : i32
    %0 = arith.cmpi eq, %arg2, %c0_i32 : i32
    %1 = arith.extui %0 : i1 to i32
    %c0_i32_0 = arith.constant 0 : i32
    %2 = arith.cmpi ne, %1, %c0_i32_0 : i32
    scf.if %2 {
      %cst_14 = arith.constant 0.000000e+00 : f32
      %14 = vector.broadcast %cst_14 : f32 to vector<16x32xf32>
      %c0_15 = arith.constant 0 : index
      %c0_16 = arith.constant 0 : index
      %15 = vector.load %arg7[%c0_15, %c0_16] : memref<16x32xf32, #tpu.memory_space<vmem>>, vector<16x32xf32>
      tpu.vector_store %arg7[%c0_15, %c0_16], %14 {strides = array<i32>} : memref<16x32xf32, #tpu.memory_space<vmem>>, vector<16x32xf32>,
    } else {
    }
    %c0 = arith.constant 0 : index
    %c0_1 = arith.constant 0 : index
    %c0_2 = arith.constant 0 : index
    %c0_3 = arith.constant 0 : index
    %3 = vector.load %arg3[%c0, %c0_1, %c0_2, %c0_3] : memref<1x1x16x32xbf16, #tpu.memory_space<vmem>>, vector<1x1x16x32xbf16>
    %4 = vector.shape_cast %3 : vector<1x1x16x32xbf16> to vector<16x32xbf16>
    %c0_4 = arith.constant 0 : index
    %c0_5 = arith.constant 0 : index
    %c0_6 = arith.constant 0 : index
    %c0_7 = arith.constant 0 : index
    %5 = vector.load %arg4[%c0_4, %c0_5, %c0_6, %c0_7] : memref<1x1x32x32xbf16, #tpu.memory_space<vmem>>, vector<1x1x32x32xbf16>
    %6 = vector.shape_cast %5 : vector<1x1x32x32xbf16> to vector<32x32xbf16>
    %cst = arith.constant dense<0.000000e+00> : vector<16x32xf32>
    %7 = tpu.matmul %4, %6, %cst {dimension_numbers = #tpu.dot_dimension_numbers<[1], [0], [0], [1], [0, 0, 1, 1], [], []>} : vector<16x32xbf16>, vector<32x32xbf16>, vector<16x32xf32> -> vector<16x32xf32>
    %c0_8 = arith.constant 0 : index
    %c0_9 = arith.constant 0 : index
    %8 = vector.load %arg7[%c0_8, %c0_9] : memref<16x32xf32, #tpu.memory_space<vmem>>, vector<16x32xf32>
    %9 = arith.addf %8, %7 : vector<16x32xf32>
    %c0_10 = arith.constant 0 : index
    %c0_11 = arith.constant 0 : index
    %10 = vector.load %arg7[%c0_10, %c0_11] : memref<16x32xf32, #tpu.memory_space<vmem>>, vector<16x32xf32>
    tpu.vector_store %arg7[%c0_10, %c0_11], %9 {strides = array<i32>} : memref<16x32xf32, #tpu.memory_space<vmem>>, vector<16x32xf32>,
    %c0_i32_12 = arith.constant 0 : i32
    %11 = arith.cmpi eq, %arg2, %c0_i32_12 : i32
    %12 = arith.extui %11 : i1 to i32
    %c0_i32_13 = arith.constant 0 : i32
    %13 = arith.cmpi ne, %12, %c0_i32_13 : i32
    scf.if %13 {
      %c0_14 = arith.constant 0 : index
      %c0_15 = arith.constant 0 : index
      %14 = vector.load %arg7[%c0_14, %c0_15] : memref<16x32xf32, #tpu.memory_space<vmem>>, vector<16x32xf32>
      %c0_16 = arith.constant 0 : index
      %c0_17 = arith.constant 0 : index
      %15 = vector.load %arg5[%c0_16, %c0_17] : memref<1x32xf32, #tpu.memory_space<vmem>>, vector<1x32xf32>
      %16 = vector.broadcast %15 : vector<1x32xf32> to vector<16x32xf32>
      %17 = arith.addf %14, %16 : vector<16x32xf32>
      %cst_18 = arith.constant 0.000000e+00 : f32
      %18 = vector.broadcast %cst_18 : f32 to vector<16x32xf32>
      %19 = arith.maximumf %17, %18 : vector<16x32xf32>
      %20 = arith.truncf %19 : vector<16x32xf32> to vector<16x32xbf16>
      %c0_19 = arith.constant 0 : index
      %c0_20 = arith.constant 0 : index
      %c0_21 = arith.constant 0 : index
      %c0_22 = arith.constant 0 : index
      %21 = vector.load %arg6[%c0_19, %c0_20, %c0_21, %c0_22] : memref<1x1x16x32xbf16, #tpu.memory_space<vmem>>, vector<1x1x16x32xbf16>
      %22 = vector.shape_cast %21 : vector<1x1x16x32xbf16> to vector<16x32xbf16>
      %23 = vector.shape_cast %20 : vector<16x32xbf16> to vector<1x1x16x32xbf16>
      tpu.vector_store %arg6[%c0_19, %c0_20, %c0_21, %c0_22], %23 {strides = array<i32>} : memref<1x1x16x32xbf16, #tpu.memory_space<vmem>>, vector<1x1x16x32xbf16>,
    } else {
    }
    return
  }
  func.func @transform_0(%arg0: i32, %arg1: i32, %arg2: i32) -> (i32, i32, i32, i32) {
    %c1_i32 = arith.constant 1 : i32
    %0 = arith.muli %arg1, %c1_i32 : i32
    %1 = arith.addi %0, %arg2 : i32
    %c0_i32 = arith.constant 0 : i32
    %c0_i32_0 = arith.constant 0 : i32
    %c0_i32_1 = arith.constant 0 : i32
    return %arg0, %1, %c0_i32, %c0_i32_0 : i32, i32, i32, i32
  }
  func.func @transform_1(%arg0: i32, %arg1: i32, %arg2: i32) -> (i32, i32, i32, i32) {
    %c0_i32 = arith.constant 0 : i32
    %c0_i32_0 = arith.constant 0 : i32
    %c0_i32_1 = arith.constant 0 : i32
    %c0_i32_2 = arith.constant 0 : i32
    return %arg2, %c0_i32, %c0_i32_0, %c0_i32_1 : i32, i32, i32, i32
  }
  func.func @transform_2(%arg0: i32, %arg1: i32, %arg2: i32) -> (i32, i32) {
    %c0_i32 = arith.constant 0 : i32
    %c0_i32_0 = arith.constant 0 : i32
    %c0_i32_1 = arith.constant 0 : i32
    return %c0_i32, %c0_i32_0 : i32, i32
  }
  func.func @transform_3(%arg0: i32, %arg1: i32, %arg2: i32) -> (i32, i32, i32, i32) {
    %c0_i32 = arith.constant 0 : i32
    %c0_i32_0 = arith.constant 0 : i32
    %c0_i32_1 = arith.constant 0 : i32
    return %arg0, %arg1, %c0_i32, %c0_i32_0 : i32, i32, i32, i32
  }
}

module attributes {stable_mosaic.version = 11 : i64} {
  func.func @kern(%arg0: i32, %arg1: i32, %arg2: i32, %arg3: memref<1x1x18x32xbf16, #tpu.memory_space<vmem>>, %arg4: memref<1x1x18x32xbf16, #tpu.memory_space<vmem>>, %arg5: memref<1x3x32x32xbf16, #tpu.memory_space<vmem>>, %arg6: memref<1x3x32x32xbf16, #tpu.memory_space<vmem>>, %arg7: memref<1x32xf32, #tpu.memory_space<vmem>>, %arg8: memref<1x32xf32, #tpu.memory_space<vmem>>, %arg9: memref<2x32xf32, #tpu.memory_space<vmem>>, %arg10: memref<1x2xf32, #tpu.memory_space<vmem>>, %arg11: memref<1x1x16x32xf32, #tpu.memory_space<vmem>>, %arg12: memref<16x32xf32, #tpu.memory_space<vmem>>, %arg13: memref<16x32xf32, #tpu.memory_space<vmem>>) attributes {dimension_semantics = [#tpu.dimension_semantics<parallel>, #tpu.dimension_semantics<parallel>, #tpu.dimension_semantics<arbitrary>], iteration_bounds = array<i64: 2, 16, 3>, scalar_prefetch = 0 : i64, scratch_operands = 2 : i64, tpu.core_type = #tpu.core_type<tc>, window_params = [{transform_indices = @transform_0, window_bounds = array<i64: 1, 1, 18, 32>}, {transform_indices = @transform_1, window_bounds = array<i64: 1, 1, 18, 32>}, {transform_indices = @transform_2, window_bounds = array<i64: 1, 3, 32, 32>}, {transform_indices = @transform_3, window_bounds = array<i64: 1, 3, 32, 32>}, {pipeline_mode = #tpu.pipeline_mode<synchronous>, transform_indices = @transform_4, window_bounds = array<i64: 1, 32>}, {pipeline_mode = #tpu.pipeline_mode<synchronous>, transform_indices = @transform_5, window_bounds = array<i64: 1, 32>}, {pipeline_mode = #tpu.pipeline_mode<synchronous>, transform_indices = @transform_6, window_bounds = array<i64: 2, 32>}, {pipeline_mode = #tpu.pipeline_mode<synchronous>, transform_indices = @transform_7, window_bounds = array<i64: 1, 2>}, {transform_indices = @transform_8, window_bounds = array<i64: 1, 1, 16, 32>}]} {
    %c0_i32 = arith.constant 0 : i32
    %0 = arith.cmpi eq, %arg2, %c0_i32 : i32
    %1 = arith.extui %0 : i1 to i32
    %c0_i32_0 = arith.constant 0 : i32
    %2 = arith.cmpi ne, %1, %c0_i32_0 : i32
    scf.if %2 {
      %cst_44 = arith.constant 0.000000e+00 : f32
      %44 = vector.broadcast %cst_44 : f32 to vector<16x32xf32>
      %c0_45 = arith.constant 0 : index
      %c0_46 = arith.constant 0 : index
      %45 = vector.load %arg12[%c0_45, %c0_46] : memref<16x32xf32, #tpu.memory_space<vmem>>, vector<16x32xf32>
      tpu.vector_store %arg12[%c0_45, %c0_46], %44 {strides = array<i32>} : memref<16x32xf32, #tpu.memory_space<vmem>>, vector<16x32xf32>,
      %cst_47 = arith.constant 0.000000e+00 : f32
      %46 = vector.broadcast %cst_47 : f32 to vector<16x32xf32>
      %c0_48 = arith.constant 0 : index
      %c0_49 = arith.constant 0 : index
      %47 = vector.load %arg13[%c0_48, %c0_49] : memref<16x32xf32, #tpu.memory_space<vmem>>, vector<16x32xf32>
      tpu.vector_store %arg13[%c0_48, %c0_49], %46 {strides = array<i32>} : memref<16x32xf32, #tpu.memory_space<vmem>>, vector<16x32xf32>,
    } else {
    }
    %c0 = arith.constant 0 : index
    %c0_1 = arith.constant 0 : index
    %c0_2 = arith.constant 0 : index
    %c0_3 = arith.constant 0 : index
    %3 = vector.load %arg3[%c0, %c0_1, %c0_2, %c0_3] : memref<1x1x18x32xbf16, #tpu.memory_space<vmem>>, vector<1x1x18x32xbf16>
    %4 = vector.shape_cast %3 : vector<1x1x18x32xbf16> to vector<18x32xbf16>
    %c0_4 = arith.constant 0 : index
    %c0_5 = arith.constant 0 : index
    %c0_6 = arith.constant 0 : index
    %c0_7 = arith.constant 0 : index
    %5 = vector.load %arg4[%c0_4, %c0_5, %c0_6, %c0_7] : memref<1x1x18x32xbf16, #tpu.memory_space<vmem>>, vector<1x1x18x32xbf16>
    %6 = vector.shape_cast %5 : vector<1x1x18x32xbf16> to vector<18x32xbf16>
    %7 = vector.extract_strided_slice %4 {offsets = [0, 0], sizes = [16, 32], strides = [1, 1]} : vector<18x32xbf16> to vector<16x32xbf16>
    %8 = vector.extract_strided_slice %6 {offsets = [0, 0], sizes = [16, 32], strides = [1, 1]} : vector<18x32xbf16> to vector<16x32xbf16>
    %c0_8 = arith.constant 0 : index
    %c0_9 = arith.constant 0 : index
    %c0_10 = arith.constant 0 : index
    %c0_11 = arith.constant 0 : index
    %9 = vector.load %arg5[%c0_8, %c0_9, %c0_10, %c0_11] : memref<1x3x32x32xbf16, #tpu.memory_space<vmem>>, vector<1x1x32x32xbf16>
    %10 = vector.shape_cast %9 : vector<1x1x32x32xbf16> to vector<32x32xbf16>
    %cst = arith.constant dense<0.000000e+00> : vector<16x32xf32>
    %11 = tpu.matmul %7, %10, %cst {dimension_numbers = #tpu.dot_dimension_numbers<[1], [0], [0], [1], [0, 0, 1, 1], [], []>} : vector<16x32xbf16>, vector<32x32xbf16>, vector<16x32xf32> -> vector<16x32xf32>
    %c0_12 = arith.constant 0 : index
    %c0_13 = arith.constant 0 : index
    %c0_14 = arith.constant 0 : index
    %c0_15 = arith.constant 0 : index
    %12 = vector.load %arg6[%c0_12, %c0_13, %c0_14, %c0_15] : memref<1x3x32x32xbf16, #tpu.memory_space<vmem>>, vector<1x1x32x32xbf16>
    %13 = vector.shape_cast %12 : vector<1x1x32x32xbf16> to vector<32x32xbf16>
    %cst_16 = arith.constant dense<0.000000e+00> : vector<16x32xf32>
    %14 = tpu.matmul %8, %13, %cst_16 {dimension_numbers = #tpu.dot_dimension_numbers<[1], [0], [0], [1], [0, 0, 1, 1], [], []>} : vector<16x32xbf16>, vector<32x32xbf16>, vector<16x32xf32> -> vector<16x32xf32>
    %15 = vector.extract_strided_slice %4 {offsets = [1, 0], sizes = [16, 32], strides = [1, 1]} : vector<18x32xbf16> to vector<16x32xbf16>
    %16 = vector.extract_strided_slice %6 {offsets = [1, 0], sizes = [16, 32], strides = [1, 1]} : vector<18x32xbf16> to vector<16x32xbf16>
    %c0_17 = arith.constant 0 : index
    %c1 = arith.constant 1 : index
    %c0_18 = arith.constant 0 : index
    %c0_19 = arith.constant 0 : index
    %17 = vector.load %arg5[%c0_17, %c1, %c0_18, %c0_19] : memref<1x3x32x32xbf16, #tpu.memory_space<vmem>>, vector<1x1x32x32xbf16>
    %18 = vector.shape_cast %17 : vector<1x1x32x32xbf16> to vector<32x32xbf16>
    %cst_20 = arith.constant dense<0.000000e+00> : vector<16x32xf32>
    %19 = tpu.matmul %15, %18, %cst_20 {dimension_numbers = #tpu.dot_dimension_numbers<[1], [0], [0], [1], [0, 0, 1, 1], [], []>} : vector<16x32xbf16>, vector<32x32xbf16>, vector<16x32xf32> -> vector<16x32xf32>
    %c0_21 = arith.constant 0 : index
    %c1_22 = arith.constant 1 : index
    %c0_23 = arith.constant 0 : index
    %c0_24 = arith.constant 0 : index
    %20 = vector.load %arg6[%c0_21, %c1_22, %c0_23, %c0_24] : memref<1x3x32x32xbf16, #tpu.memory_space<vmem>>, vector<1x1x32x32xbf16>
    %21 = vector.shape_cast %20 : vector<1x1x32x32xbf16> to vector<32x32xbf16>
    %cst_25 = arith.constant dense<0.000000e+00> : vector<16x32xf32>
    %22 = tpu.matmul %16, %21, %cst_25 {dimension_numbers = #tpu.dot_dimension_numbers<[1], [0], [0], [1], [0, 0, 1, 1], [], []>} : vector<16x32xbf16>, vector<32x32xbf16>, vector<16x32xf32> -> vector<16x32xf32>
    %23 = arith.addf %11, %19 : vector<16x32xf32>
    %24 = arith.addf %14, %22 : vector<16x32xf32>
    %25 = vector.extract_strided_slice %4 {offsets = [2, 0], sizes = [16, 32], strides = [1, 1]} : vector<18x32xbf16> to vector<16x32xbf16>
    %26 = vector.extract_strided_slice %6 {offsets = [2, 0], sizes = [16, 32], strides = [1, 1]} : vector<18x32xbf16> to vector<16x32xbf16>
    %c0_26 = arith.constant 0 : index
    %c2 = arith.constant 2 : index
    %c0_27 = arith.constant 0 : index
    %c0_28 = arith.constant 0 : index
    %27 = vector.load %arg5[%c0_26, %c2, %c0_27, %c0_28] : memref<1x3x32x32xbf16, #tpu.memory_space<vmem>>, vector<1x1x32x32xbf16>
    %28 = vector.shape_cast %27 : vector<1x1x32x32xbf16> to vector<32x32xbf16>
    %cst_29 = arith.constant dense<0.000000e+00> : vector<16x32xf32>
    %29 = tpu.matmul %25, %28, %cst_29 {dimension_numbers = #tpu.dot_dimension_numbers<[1], [0], [0], [1], [0, 0, 1, 1], [], []>} : vector<16x32xbf16>, vector<32x32xbf16>, vector<16x32xf32> -> vector<16x32xf32>
    %c0_30 = arith.constant 0 : index
    %c2_31 = arith.constant 2 : index
    %c0_32 = arith.constant 0 : index
    %c0_33 = arith.constant 0 : index
    %30 = vector.load %arg6[%c0_30, %c2_31, %c0_32, %c0_33] : memref<1x3x32x32xbf16, #tpu.memory_space<vmem>>, vector<1x1x32x32xbf16>
    %31 = vector.shape_cast %30 : vector<1x1x32x32xbf16> to vector<32x32xbf16>
    %cst_34 = arith.constant dense<0.000000e+00> : vector<16x32xf32>
    %32 = tpu.matmul %26, %31, %cst_34 {dimension_numbers = #tpu.dot_dimension_numbers<[1], [0], [0], [1], [0, 0, 1, 1], [], []>} : vector<16x32xbf16>, vector<32x32xbf16>, vector<16x32xf32> -> vector<16x32xf32>
    %33 = arith.addf %23, %29 : vector<16x32xf32>
    %34 = arith.addf %24, %32 : vector<16x32xf32>
    %c0_35 = arith.constant 0 : index
    %c0_36 = arith.constant 0 : index
    %35 = vector.load %arg12[%c0_35, %c0_36] : memref<16x32xf32, #tpu.memory_space<vmem>>, vector<16x32xf32>
    %36 = arith.addf %35, %33 : vector<16x32xf32>
    %c0_37 = arith.constant 0 : index
    %c0_38 = arith.constant 0 : index
    %37 = vector.load %arg12[%c0_37, %c0_38] : memref<16x32xf32, #tpu.memory_space<vmem>>, vector<16x32xf32>
    tpu.vector_store %arg12[%c0_37, %c0_38], %36 {strides = array<i32>} : memref<16x32xf32, #tpu.memory_space<vmem>>, vector<16x32xf32>,
    %c0_39 = arith.constant 0 : index
    %c0_40 = arith.constant 0 : index
    %38 = vector.load %arg13[%c0_39, %c0_40] : memref<16x32xf32, #tpu.memory_space<vmem>>, vector<16x32xf32>
    %39 = arith.addf %38, %34 : vector<16x32xf32>
    %c0_41 = arith.constant 0 : index
    %c0_42 = arith.constant 0 : index
    %40 = vector.load %arg13[%c0_41, %c0_42] : memref<16x32xf32, #tpu.memory_space<vmem>>, vector<16x32xf32>
    tpu.vector_store %arg13[%c0_41, %c0_42], %39 {strides = array<i32>} : memref<16x32xf32, #tpu.memory_space<vmem>>, vector<16x32xf32>,
    %c2_i32 = arith.constant 2 : i32
    %41 = arith.cmpi eq, %arg2, %c2_i32 : i32
    %42 = arith.extui %41 : i1 to i32
    %c0_i32_43 = arith.constant 0 : i32
    %43 = arith.cmpi ne, %42, %c0_i32_43 : i32
    scf.if %43 {
      %c0_44 = arith.constant 0 : index
      %c0_45 = arith.constant 0 : index
      %44 = vector.load %arg12[%c0_44, %c0_45] : memref<16x32xf32, #tpu.memory_space<vmem>>, vector<16x32xf32>
      %c0_46 = arith.constant 0 : index
      %c0_47 = arith.constant 0 : index
      %45 = vector.load %arg7[%c0_46, %c0_47] : memref<1x32xf32, #tpu.memory_space<vmem>>, vector<1x32xf32>
      %46 = vector.broadcast %45 : vector<1x32xf32> to vector<16x32xf32>
      %47 = arith.addf %44, %46 : vector<16x32xf32>
      %cst_48 = arith.constant 0.000000e+00 : f32
      %48 = vector.broadcast %cst_48 : f32 to vector<16x32xf32>
      %49 = arith.maximumf %47, %48 : vector<16x32xf32>
      %c0_49 = arith.constant 0 : index
      %c0_50 = arith.constant 0 : index
      %50 = vector.load %arg13[%c0_49, %c0_50] : memref<16x32xf32, #tpu.memory_space<vmem>>, vector<16x32xf32>
      %c0_51 = arith.constant 0 : index
      %c0_52 = arith.constant 0 : index
      %51 = vector.load %arg8[%c0_51, %c0_52] : memref<1x32xf32, #tpu.memory_space<vmem>>, vector<1x32xf32>
      %52 = vector.broadcast %51 : vector<1x32xf32> to vector<16x32xf32>
      %53 = arith.addf %50, %52 : vector<16x32xf32>
      %cst_53 = arith.constant 0.000000e+00 : f32
      %54 = vector.broadcast %cst_53 : f32 to vector<16x32xf32>
      %55 = arith.maximumf %53, %54 : vector<16x32xf32>
      %c0_54 = arith.constant 0 : index
      %c0_55 = arith.constant 0 : index
      %56 = vector.load %arg9[%c0_54, %c0_55] : memref<2x32xf32, #tpu.memory_space<vmem>>, vector<2x32xf32>
      %c0_56 = arith.constant 0 : index
      %c0_57 = arith.constant 0 : index
      %57 = vector.load %arg10[%c0_56, %c0_57] : memref<1x2xf32, #tpu.memory_space<vmem>>, vector<1x2xf32>
      %58 = vector.extract_strided_slice %56 {offsets = [0, 0], sizes = [1, 32], strides = [1, 1]} : vector<2x32xf32> to vector<1x32xf32>
      %59 = vector.broadcast %58 : vector<1x32xf32> to vector<16x32xf32>
      %60 = arith.mulf %49, %59 : vector<16x32xf32>
      %cst_58 = arith.constant dense<0.000000e+00> : vector<16xf32>
      %61 = vector.multi_reduction <add>, %60, %cst_58 [1] : vector<16x32xf32> to vector<16xf32>
      %62 = vector.shape_cast %61 : vector<16xf32> to vector<16x1xf32>
      %63 = vector.extract_strided_slice %57 {offsets = [0, 0], sizes = [1, 1], strides = [1, 1]} : vector<1x2xf32> to vector<1x1xf32>
      %64 = vector.broadcast %63 : vector<1x1xf32> to vector<16x1xf32>
      %65 = arith.addf %62, %64 : vector<16x1xf32>
      %66 = vector.extract_strided_slice %56 {offsets = [1, 0], sizes = [1, 32], strides = [1, 1]} : vector<2x32xf32> to vector<1x32xf32>
      %67 = vector.broadcast %66 : vector<1x32xf32> to vector<16x32xf32>
      %68 = arith.mulf %55, %67 : vector<16x32xf32>
      %cst_59 = arith.constant dense<0.000000e+00> : vector<16xf32>
      %69 = vector.multi_reduction <add>, %68, %cst_59 [1] : vector<16x32xf32> to vector<16xf32>
      %70 = vector.shape_cast %69 : vector<16xf32> to vector<16x1xf32>
      %71 = vector.extract_strided_slice %57 {offsets = [0, 1], sizes = [1, 1], strides = [1, 1]} : vector<1x2xf32> to vector<1x1xf32>
      %72 = vector.broadcast %71 : vector<1x1xf32> to vector<16x1xf32>
      %73 = arith.addf %70, %72 : vector<16x1xf32>
      %74 = arith.maximumf %65, %73 : vector<16x1xf32>
      %75 = arith.subf %65, %74 : vector<16x1xf32>
      %76 = math.exp %75 : vector<16x1xf32>
      %77 = arith.subf %73, %74 : vector<16x1xf32>
      %78 = math.exp %77 : vector<16x1xf32>
      %79 = arith.addf %76, %78 : vector<16x1xf32>
      %80 = tpu.reciprocal %79 {approx = true} : vector<16x1xf32> -> vector<16x1xf32>
      %81 = arith.mulf %76, %80 : vector<16x1xf32>
      %82 = vector.broadcast %81 : vector<16x1xf32> to vector<16x32xf32>
      %83 = arith.mulf %49, %82 : vector<16x32xf32>
      %84 = arith.mulf %78, %80 : vector<16x1xf32>
      %85 = vector.broadcast %84 : vector<16x1xf32> to vector<16x32xf32>
      %86 = arith.mulf %55, %85 : vector<16x32xf32>
      %87 = arith.addf %83, %86 : vector<16x32xf32>
      %c0_60 = arith.constant 0 : index
      %c0_61 = arith.constant 0 : index
      %c0_62 = arith.constant 0 : index
      %c0_63 = arith.constant 0 : index
      %88 = vector.load %arg11[%c0_60, %c0_61, %c0_62, %c0_63] : memref<1x1x16x32xf32, #tpu.memory_space<vmem>>, vector<1x1x16x32xf32>
      %89 = vector.shape_cast %88 : vector<1x1x16x32xf32> to vector<16x32xf32>
      %90 = vector.shape_cast %87 : vector<16x32xf32> to vector<1x1x16x32xf32>
      tpu.vector_store %arg11[%c0_60, %c0_61, %c0_62, %c0_63], %90 {strides = array<i32>} : memref<1x1x16x32xf32, #tpu.memory_space<vmem>>, vector<1x1x16x32xf32>,
    } else {
    }
    return
  }
  func.func @transform_0(%arg0: i32, %arg1: i32, %arg2: i32) -> (i32, i32, i32, i32) {
    %0 = arith.addi %arg1, %arg2 : i32
    %c0_i32 = arith.constant 0 : i32
    %c0_i32_0 = arith.constant 0 : i32
    %c0_i32_1 = arith.constant 0 : i32
    return %arg0, %0, %c0_i32, %c0_i32_0 : i32, i32, i32, i32
  }
  func.func @transform_1(%arg0: i32, %arg1: i32, %arg2: i32) -> (i32, i32, i32, i32) {
    %0 = arith.addi %arg1, %arg2 : i32
    %c0_i32 = arith.constant 0 : i32
    %c0_i32_0 = arith.constant 0 : i32
    %c0_i32_1 = arith.constant 0 : i32
    return %arg0, %0, %c0_i32, %c0_i32_0 : i32, i32, i32, i32
  }
  func.func @transform_2(%arg0: i32, %arg1: i32, %arg2: i32) -> (i32, i32, i32, i32) {
    %c0_i32 = arith.constant 0 : i32
    %c0_i32_0 = arith.constant 0 : i32
    %c0_i32_1 = arith.constant 0 : i32
    %c0_i32_2 = arith.constant 0 : i32
    return %arg2, %c0_i32, %c0_i32_0, %c0_i32_1 : i32, i32, i32, i32
  }
  func.func @transform_3(%arg0: i32, %arg1: i32, %arg2: i32) -> (i32, i32, i32, i32) {
    %c0_i32 = arith.constant 0 : i32
    %c0_i32_0 = arith.constant 0 : i32
    %c0_i32_1 = arith.constant 0 : i32
    %c0_i32_2 = arith.constant 0 : i32
    return %arg2, %c0_i32, %c0_i32_0, %c0_i32_1 : i32, i32, i32, i32
  }
  func.func @transform_4(%arg0: i32, %arg1: i32, %arg2: i32) -> (i32, i32) {
    %c0_i32 = arith.constant 0 : i32
    %c0_i32_0 = arith.constant 0 : i32
    %c0_i32_1 = arith.constant 0 : i32
    return %c0_i32, %c0_i32_0 : i32, i32
  }
  func.func @transform_5(%arg0: i32, %arg1: i32, %arg2: i32) -> (i32, i32) {
    %c0_i32 = arith.constant 0 : i32
    %c0_i32_0 = arith.constant 0 : i32
    %c0_i32_1 = arith.constant 0 : i32
    return %c0_i32, %c0_i32_0 : i32, i32
  }
  func.func @transform_6(%arg0: i32, %arg1: i32, %arg2: i32) -> (i32, i32) {
    %c0_i32 = arith.constant 0 : i32
    %c0_i32_0 = arith.constant 0 : i32
    %c0_i32_1 = arith.constant 0 : i32
    return %c0_i32, %c0_i32_0 : i32, i32
  }
  func.func @transform_7(%arg0: i32, %arg1: i32, %arg2: i32) -> (i32, i32) {
    %c0_i32 = arith.constant 0 : i32
    %c0_i32_0 = arith.constant 0 : i32
    %c0_i32_1 = arith.constant 0 : i32
    return %c0_i32, %c0_i32_0 : i32, i32
  }
  func.func @transform_8(%arg0: i32, %arg1: i32, %arg2: i32) -> (i32, i32, i32, i32) {
    %c0_i32 = arith.constant 0 : i32
    %c0_i32_0 = arith.constant 0 : i32
    %c0_i32_1 = arith.constant 0 : i32
    return %arg0, %arg1, %c0_i32, %c0_i32_0 : i32, i32, i32, i32
  }
}

</mosaic_0001>

<bundles_post_ra>
// kernel: ssfa_forward.17
= control target key start
LH: loop header
LB: loop body
LE: loop exit
PB: predicated region body
PF: predicated region fallthrough
CT: control target
= control target key end

     0   :  { %s767_s12 = smov 0   ;;  %s769_s13 = smov 0   ;;  %s872_s0 = inlined_call_operand.vmem [shape: bf16[2,18,18,4], index: 0, kind: input, shape index: {}]   ;;  %s873_s1 = inlined_call_operand.vmem [shape: bf16[3,3,4,32], index: 1, kind: input, shape index: {}]   ;;  %s874_s2 = inlined_call_operand.vmem [shape: f32[1,32], index: 2, kind: input, shape index: {}]   ;;  %s875_s3 = inlined_call_operand.vmem [shape: bf16[2,16,16,32], index: 3, kind: output, shape index: {}]  }
   0x1   :  { %s771_s14 = smov 0   ;;  %s773_s15 = smov 0  }
   0x2   :  { %s775_s16 = smov 0   ;;  %s777_s17 = smov 0  }
   0x3   :  { %s779_s18 = smov 0  }
   0x4 LB: > { %s25_s19 = sadd.s32 1, %s730_s15  ;;  %s28_s20 = sadd.s32 1, %s734_s16  ;;  %s742_s18 = sphi %s779_s18, %s13_s18   ;;  %s738_s17 = sphi %s777_s17, %s883_s17   ;;  %s734_s16 = sphi %s775_s16, %s882_s16   ;;  %s730_s15 = sphi %s773_s15, %s881_s15   ;;  %s726_s14 = sphi %s771_s14, %s880_s14   ;;  %s722_s13 = sphi %s769_s13, %s879_s13   ;;  %s718_s12 = sphi %s767_s12, %s878_s12  }
   0x5   : > { %p26_p0 = scmp.ge.s32.totalorder %s25_s19, 3  ;;  %p578_p1 = scmp.ge.s32.totalorder %s742_s18, 1 }
   0x6   : > { %p178_p2 = scmp.lt.s32.totalorder %s742_s18, 97  ;;  %s32_s21 = sadd.s32 1, %s738_s17 }
   0x7   : > { %s885_s19 = smov (%p26_p0, %s25_s19), 0  ;;  %s887_s20 = smov (!%p26_p0, %s28_s20), %s734_s16 }
   0x8   : > { %p179_p3 = pnand %p578_p1, %p178_p2  ;;  %p30_p4 = scmp.ge.s32.totalorder %s887_s20, 16 }
   0x9   : > { %s216_s22 = sadd.s32 (!%p179_p3), %s718_s12, %s722_s13  ;;  %p217_p6 = scmp.lt.s32.totalorder (!%p179_p3), %s726_s14, 1 }
   0xa   : > { %s889_s20 = smov (%p30_p4, %s887_s20), 0  ;;  %s891_s21 = smov (!%p30_p4, %s32_s21), %s738_s17 }
   0xb   : > { %p34_p5 = scmp.ge.s32.totalorder %s891_s21, 2  ;;  %182 = sbr.rel (%p179_p3) target bundleno = 264 (0x108), region = 32 }
   0xc   : > { %p219_p7 = scmp.lt.s32.totalorder (!%p179_p3), %s216_s22, 17  ;;  %p227_p8 = scmp.lt.s32.totalorder (!%p179_p3), %s718_s12, 2 }
   0xd   : > { %s893_s21 = smov (%p34_p5, %s891_s21), 0  ;;  %p234_p9 = scmp.lt.s32.totalorder (!%p179_p3), %s722_s13, 15 }
   0xe   : > { %876 = sst [smem:[#allocation3_spill]] %s893_s21  ;;  %p584_p10 = scmp.ne.s32.totalorder (!%p179_p3), %s718_s12, 0 }
  0x10   : > { %s895_s14 = smov (!%p217_p6, %s726_s14), 1  ;;  %s897_s22 = smov (!%p219_p7, %s216_s22), 17 }
  0x11   : > { %s625_s23 = smul.u32 54, %s895_s14  ;;  %s582_s8 = sshll.u32 %s895_s14, 5 }
  0x12   : > { %s624_s24 = smul.u32 3, %s897_s22  ;;  %s899_s13 = smov (!%p234_p9, %s722_s13), 15 }
  0x13   : > { %s228_s25 = scalar_select %p227_p8, %s718_s12, 2 }
  0x14   : > { %s223_s26 = sadd.s32 %s625_s23, %s624_s24  ;;  %s581_s9 = sshll.u32 %s899_s13, 1 }
  0x15   : > { %s579_s27 = sshll.u32 %s223_s26, 2  ;;  %s626_s28 = smul.u32 6, %s228_s25 }
  0x16   : > { %s225_s4 = scalar_lea.vmem %s872_s0, %s579_s27  ;;  %s238_s10 = sadd.s32 %s582_s8, %s581_s9 }
  0x17   : > { %s824_s7 = scalar_lea.vmem %s873_s1, %s626_s28  ;;  %s583_s11 = sshll.u32 %s238_s10, 2 }
  0x18   : > { %s830_s23 = scalar_lea.vmem %s875_s3, %s583_s11  ;;  %245 = sbr.rel (%p584_p10) target bundleno = 31 (0x1f), region = 36 }
  0x1d   : > { %vm246_vm0 = vcmask 261120   ;;  %v744_v0 = vmov 0.0  }
  0x1e   : > { %247 = vst.msk [vmem:[#allocation2] sm:$0xff] %vm246_vm0, %v744_v0  ;;  %248 = vst.msk [vmem:[#allocation2 + $0x8] sm:$0xff] %vm246_vm0, %v744_v0 }
  0x1f PF: > { %v585_v1 = vld [vmem:[%s824_s7 + $0x2] sm:$0x3]  ;;  %vm280_vm1 = vcmask 1041408   ;;  %v252_v2 = vld [vmem:[%s824_s7] sm:$0x3]  ;;  %v745_v3 = vmov 0.0  }
  0x20   : > { %606 = vmatprep.subr.bf16.mxu0 %v745_v3  ;;  %v282_v4 = vsel %vm280_vm1, %v585_v1, 0  ;;  %612 = vmatprep.subr.bf16.mxu1 %v745_v3  ;;  %v328_v5 = vsel %vm280_vm1, %v252_v2, 0  ;;  %v686_v6 = vld [vmem:[%s225_s4] sm:$0xff]   ;;  %vm746_vm2 = vmmov 0   ;;  %vm276_vm3 = vcmask 31744   ;;  %p592_p11 = scmp.ne.s32.totalorder %s718_s12, 2 }
  0x21   : > { %607 = vmatpush3.bf16.msra.mxu0 %v282_v4  ;;  %613 = vmatpush3.bf16.msra.mxu1 %v328_v5  ;;  %v687_v7 = vld [vmem:[%s225_s4 + $0x8] ss:$0 sps:$4 sm:$0x11]   ;;  %v265_v8 = vshrl.u32 %v686_v6, 16  ;;  %v267_v9 = vshll.u32 %v686_v6, 16  ;;  %v374_v17 = vrot.slane %v686_v6, 1 }
  0x22   : > { %608 = vmatprep.mubr.msk.bf16.mxu0 %vm746_vm2, %v745_v3  ;;  %614 = vmatprep.mubr.msk.bf16.mxu1 %vm746_vm2, %v745_v3  ;;  %v272_v11 = vshll.u32 %v687_v7, 16  ;;  %v590_v12 = vld [vmem:[%s824_s7 + $0x4] sm:$0x3]  ;;  %vm263_vm4 = vsmask.f32 7424  ;;  %v375_v18 = vrot.slane %v687_v7, 1 }
  0x23   : > { %618 = vmatprep.subr.bf16.mxu0 %v745_v3  ;;  %v269_v10 = vrot.slane %v267_v9, 1  ;;  %v381_v15 = vsel %vm280_vm1, %v590_v12, 0  ;;  %vm373_vm5 = vcmask 1046528   ;;  %vm430_vm6 = vcmask 261120  }
  0x24   : > { %615 = vmatmul.mubr.msk.bf16.vlgmr.msra.gmra.mxu1 %vm276_vm3, %v686_v6  ;;  %v274_v14 = vrot.slane %v272_v11, 1  ;;  %v376_v19 = vsel %vm373_vm5, %v374_v17, %v375_v18 }
  0x25   : > { %v270_v13 = vor.u32 %v269_v10, %v265_v8  ;;  %v426_v30 = vld [vmem:[#allocation2] sm:$0xff]  ;;  %v427_v36 = vld [vmem:[#allocation2 + $0x8] sm:$0xff] }
  0x27   : > { %v275_v16 = vsel %vm263_vm4, %v270_v13, %v274_v14 }
  0x28   : > { %609 = vmatmul.mubr.msk.bf16.vlgmr.msra.gmra.mxu0 %vm276_vm3, %v275_v16 }
  0x29   : > { %619 = vmatpush3.bf16.msra.mxu0 %v381_v15  ;;  %620 = vmatprep.mubr.msk.bf16.mxu0 %vm746_vm2, %v745_v3 }
  0x30   : > { %621 = vmatmul.mubr.msk.bf16.vlgmr.msra.gmra.mxu0 %vm276_vm3, %v376_v19 }
  0xe4   : > { %v364_v20 = vpop.f32.mrf.mxu1 }
  0xe6   : > { %v616_v21 = vpop.f32.mrf.mxu1 }
  0xe8   : > { %v367_v22 = vpop.f32.mrf.mxu1  ;;  %v318_v23 = vpop.f32.mrf.mxu0 }
  0xe9   : > { %v365_v28 = vadd.f32 %v364_v20, %v318_v23 }
  0xea   : > { %v617_v24 = vpop.f32.mrf.mxu1  ;;  %v610_v25 = vpop.f32.mrf.mxu0 }
  0xec   : > { %v321_v26 = vpop.f32.mrf.mxu0 }
  0xed   : > { %v368_v33 = vadd.f32 %v367_v22, %v321_v26 }
  0xee   : > { %v611_v27 = vpop.f32.mrf.mxu0 }
  0xf0   : > { %v417_v29 = vpop.f32.mrf.mxu0 }
  0xf1   : > { %v424_v31 = vadd.f32 %v417_v29, %v365_v28 }
  0xf2   : > { %v622_v32 = vpop.f32.mrf.mxu0 }
  0xf3   : > { %v428_v34 = vadd.f32 %v426_v30, %v424_v31 }
  0xf4   : > { %v420_v35 = vpop.f32.mrf.mxu0 }
  0xf5   : > { %431 = vst.msk [vmem:[#allocation2] sm:$0xff] %vm430_vm6, %v428_v34  ;;  %v425_v37 = vadd.f32 %v420_v35, %v368_v33  ;;  %436 = sbr.rel (%p592_p11) target bundleno = 264 (0x108), region = 40 }
  0xf6   : > { %v623_v38 = vpop.f32.mrf.mxu0 }
  0xf7   : > { %v429_v39 = vadd.f32 %v427_v36, %v425_v37 }
  0xf9   : > { %432 = vst.msk [vmem:[#allocation2 + $0x8] sm:$0xff] %vm430_vm6, %v429_v39 }
  0xfa   : > { %v593_v41 = vld [vmem:[%s874_s2] ss:$0 sm:$0xff]  ;;  %vm458_vm7 = vcmask 257024  }
  0xfc   : > { %v437_v40 = vld [vmem:[#allocation2] sm:$0xff] }
  0xfd   : > { %v446_v43 = vadd.f32 %v593_v41, %v437_v40 }
  0xff   : > { %v448_v45 = vmax.f32 %v446_v43, 0.0 }
 0x100   : > { %v438_v42 = vld [vmem:[#allocation2 + $0x8] sm:$0xff] }
 0x101   : > { %v447_v44 = vadd.f32 %v593_v41, %v438_v42  ;;  %v598_v47 = vpack.c.bf16 %v448_v45, %v448_v45 }
 0x103   : > { %v449_v46 = vmax.f32 %v447_v44, 0.0  ;;  %459 = vst.msk [vmem:[%s830_s23] sm:$0xf] %vm458_vm7, %v598_v47 }
 0x105   : > { %v599_v48 = vpack.c.bf16 %v449_v46, %v449_v46 }
 0x107   : > { %460 = vst.msk [vmem:[%s830_s23 + $0x4] sm:$0xf] %vm458_vm7, %v599_v48 }
 0x108 PF: > { %s13_s18 = sadd.s32 1, %s742_s18   ;;  %s877_s21 = sld [smem:[#allocation3_spill]] }
 0x109   : > { %p10_p12 = scmp.ge.s32.totalorder %s13_s18, 98   ;;  %s878_s12 = smov %s730_s15 }
 0x10a   : > { %s879_s13 = smov %s734_s16  ;;  %s880_s14 = smov %s738_s17 }
 0x10b   : > { %s881_s15 = smov %s885_s19  ;;  %s882_s16 = smov %s889_s20 }
 0x10c   :  { %12 = sbr.rel (!%p10_p12) target bundleno = 4 (0x4), region = 75 }
 0x10e   : > { %s883_s17 = smov %s877_s21 }

// kernel: ssfa_forward.18
= control target key start
LH: loop header
LB: loop body
LE: loop exit
PB: predicated region body
PF: predicated region fallthrough
CT: control target
= control target key end

     0   :  { %s828_s12 = smov 0   ;;  %s830_s13 = smov 0   ;;  %s935_s0 = inlined_call_operand.vmem [shape: bf16[2,18,18,32], index: 0, kind: input, shape index: {}]   ;;  %s936_s1 = inlined_call_operand.vmem [shape: bf16[3,3,32,32], index: 1, kind: input, shape index: {}]   ;;  %s937_s2 = inlined_call_operand.vmem [shape: f32[1,32], index: 2, kind: input, shape index: {}]   ;;  %s938_s3 = inlined_call_operand.vmem [shape: bf16[2,16,16,32], index: 3, kind: output, shape index: {}]  }
   0x1   :  { %s832_s14 = smov 0   ;;  %s834_s15 = smov 0  }
   0x2   :  { %s836_s16 = smov 0   ;;  %s838_s17 = smov 0  }
   0x3   :  { %s840_s18 = smov 0  }
   0x4 LB: > { %s25_s19 = sadd.s32 1, %s791_s15  ;;  %s28_s20 = sadd.s32 1, %s795_s16  ;;  %s803_s18 = sphi %s840_s18, %s13_s18   ;;  %s799_s17 = sphi %s838_s17, %s946_s17   ;;  %s795_s16 = sphi %s836_s16, %s945_s16   ;;  %s791_s15 = sphi %s834_s15, %s944_s15   ;;  %s787_s14 = sphi %s832_s14, %s943_s14   ;;  %s783_s13 = sphi %s830_s13, %s942_s13   ;;  %s779_s12 = sphi %s828_s12, %s941_s12  }
   0x5   : > { %p26_p0 = scmp.ge.s32.totalorder %s25_s19, 3  ;;  %p612_p1 = scmp.ge.s32.totalorder %s803_s18, 1 }
   0x6   : > { %p178_p2 = scmp.lt.s32.totalorder %s803_s18, 97  ;;  %s32_s21 = sadd.s32 1, %s799_s17 }
   0x7   : > { %s948_s19 = smov (%p26_p0, %s25_s19), 0  ;;  %s950_s20 = smov (!%p26_p0, %s28_s20), %s795_s16 }
   0x8   : > { %p179_p3 = pnand %p612_p1, %p178_p2  ;;  %p30_p4 = scmp.ge.s32.totalorder %s950_s20, 16 }
   0x9   : > { %s216_s22 = sadd.s32 (!%p179_p3), %s779_s12, %s783_s13  ;;  %p217_p6 = scmp.lt.s32.totalorder (!%p179_p3), %s787_s14, 1 }
   0xa   : > { %s952_s20 = smov (%p30_p4, %s950_s20), 0  ;;  %s954_s21 = smov (!%p30_p4, %s32_s21), %s799_s17 }
   0xb   : > { %p34_p5 = scmp.ge.s32.totalorder %s954_s21, 2  ;;  %182 = sbr.rel (%p179_p3) target bundleno = 265 (0x109), region = 32 }
   0xc   : > { %p219_p7 = scmp.lt.s32.totalorder (!%p179_p3), %s216_s22, 17  ;;  %p227_p8 = scmp.lt.s32.totalorder (!%p179_p3), %s779_s12, 2 }
   0xd   : > { %s956_s21 = smov (%p34_p5, %s954_s21), 0  ;;  %p234_p9 = scmp.lt.s32.totalorder (!%p179_p3), %s783_s13, 15 }
   0xe   : > { %939 = sst [smem:[#allocation3_spill]] %s956_s21  ;;  %p618_p10 = scmp.ne.s32.totalorder (!%p179_p3), %s779_s12, 0 }
  0x10   : > { %s958_s14 = smov (!%p217_p6, %s787_s14), 1  ;;  %s960_s22 = smov (!%p219_p7, %s216_s22), 17 }
  0x11   : > { %s680_s23 = smul.u32 54, %s958_s14  ;;  %s616_s8 = sshll.u32 %s958_s14, 5 }
  0x12   : > { %s679_s24 = smul.u32 3, %s960_s22  ;;  %s962_s13 = smov (!%p234_p9, %s783_s13), 15 }
  0x13   : > { %s228_s25 = scalar_select %p227_p8, %s779_s12, 2 }
  0x14   : > { %s223_s26 = sadd.s32 %s680_s23, %s679_s24  ;;  %s615_s9 = sshll.u32 %s962_s13, 1 }
  0x15   : > { %s613_s27 = sshll.u32 %s223_s26, 2  ;;  %s681_s28 = smul.u32 48, %s228_s25 }
  0x16   : > { %s225_s4 = scalar_lea.vmem %s935_s0, %s613_s27  ;;  %s238_s10 = sadd.s32 %s616_s8, %s615_s9 }
  0x17   : > { %s885_s7 = scalar_lea.vmem %s936_s1, %s681_s28  ;;  %s617_s11 = sshll.u32 %s238_s10, 2 }
  0x18   : > { %s891_s23 = scalar_lea.vmem %s938_s3, %s617_s11  ;;  %245 = sbr.rel (%p618_p10) target bundleno = 31 (0x1f), region = 36 }
  0x1d   : > { %vm246_vm0 = vcmask 261120   ;;  %v805_v0 = vmov 0.0  }
  0x1e   : > { %247 = vst.msk [vmem:[#allocation2] sm:$0xff] %vm246_vm0, %v805_v0  ;;  %248 = vst.msk [vmem:[#allocation2 + $0x8] sm:$0xff] %vm246_vm0, %v805_v0 }
  0x1f PF: > { %v741_v1 = vld [vmem:[%s885_s7 + $0x18] sm:$0xff]   ;;  %v806_v2 = vmov 0.0   ;;  %v742_v3 = vld [vmem:[%s885_s7 + $0x8] sm:$0xff]   ;;  %v743_v4 = vld [vmem:[%s885_s7 + $0x10] sm:$0xff]   ;;  %vm807_vm1 = vmmov 0   ;;  %vm294_vm2 = vcmask 261120  }
  0x20   : > { %655 = vmatprep.subr.bf16.mxu0 %v806_v2  ;;  %663 = vmatprep.subr.bf16.mxu1 %v806_v2  ;;  %v744_v5 = vld [vmem:[%s885_s7] sm:$0xff]   ;;  %v746_v7 = vld [vmem:[%s225_s4 + $0x8] ss:$0 sps:$4 sm:$0x11]   ;;  %vm269_vm3 = vsmask.f32 7424 }
  0x21   : > { %656 = vmatpush3.bf16.msra.mxu0 %v741_v1  ;;  %659 = vmatprep.mubr.msk.bf16.mxu0 %vm807_vm1, %v806_v2  ;;  %v745_v6 = vld [vmem:[%s225_s4] sm:$0xff]   ;;  %v278_v10 = vshll.u32 %v746_v7, 16  ;;  %v747_v14 = vld [vmem:[%s885_s7 + $0x28] sm:$0xff]   ;;  %v401_v18 = vrot.slane %v746_v7, 1  ;;  %vm399_vm4 = vcmask 1046528   ;;  %p638_p11 = scmp.ne.s32.totalorder %s779_s12, 2 }
  0x22   : > { %664 = vmatpush3.bf16.msra.mxu1 %v742_v3  ;;  %657 = vmatprep.subr.bf16.mxu0 %v806_v2  ;;  %v271_v8 = vshrl.u32 %v745_v6, 16  ;;  %v273_v9 = vshll.u32 %v745_v6, 16  ;;  %v748_v16 = vld [vmem:[%s885_s7 + $0x20] sm:$0xff]   ;;  %v400_v17 = vrot.slane %v745_v6, 1 }
  0x23   : > { %665 = vmatprep.subr.bf16.mxu1 %v806_v2  ;;  %667 = vmatprep.mubr.msk.bf16.mxu1 %vm807_vm1, %v806_v2  ;;  %v280_v12 = vrot.slane %v278_v10, 1 }
  0x24   : > { %v275_v11 = vrot.slane %v273_v9, 1  ;;  %v402_v19 = vsel %vm399_vm4, %v400_v17, %v401_v18 }
  0x25   : > { %658 = vmatpush3.bf16.msra.mxu0 %v743_v4  ;;  %v461_v30 = vld [vmem:[#allocation2] sm:$0xff]  ;;  %v462_v36 = vld [vmem:[#allocation2 + $0x8] sm:$0xff] }
  0x26   : > { %666 = vmatpush3.bf16.msra.mxu1 %v744_v5  ;;  %671 = vmatprep.subr.bf16.mxu0 %v806_v2  ;;  %v276_v13 = vor.u32 %v275_v11, %v271_v8 }
  0x28   : > { %v281_v15 = vsel %vm269_vm3, %v276_v13, %v280_v12 }
  0x29   : > { %668 = vmatmul.mubr.msk.bf16.vlgmr.msra.gmra.mxu1 %vm294_vm2, %v745_v6  ;;  %660 = vmatmul.mubr.msk.bf16.vlgmr.msra.gmra.mxu0 %vm294_vm2, %v281_v15 }
  0x2a   : > { %672 = vmatpush3.bf16.msra.mxu0 %v747_v14  ;;  %675 = vmatprep.mubr.msk.bf16.mxu0 %vm807_vm1, %v806_v2 }
  0x2b   : > { %673 = vmatprep.subr.bf16.mxu0 %v806_v2 }
  0x2e   : > { %674 = vmatpush3.bf16.msra.mxu0 %v748_v16 }
  0x31   : > { %676 = vmatmul.mubr.msk.bf16.vlgmr.msra.gmra.mxu0 %vm294_vm2, %v402_v19 }
  0xe9   : > { %v387_v20 = vpop.f32.mrf.mxu1  ;;  %v332_v22 = vpop.f32.mrf.mxu0 }
  0xea   : > { %v388_v28 = vadd.f32 %v387_v20, %v332_v22 }
  0xeb   : > { %v669_v21 = vpop.f32.mrf.mxu1  ;;  %v661_v24 = vpop.f32.mrf.mxu0 }
  0xed   : > { %v390_v23 = vpop.f32.mrf.mxu1  ;;  %v335_v26 = vpop.f32.mrf.mxu0 }
  0xee   : > { %v391_v33 = vadd.f32 %v390_v23, %v335_v26 }
  0xef   : > { %v670_v25 = vpop.f32.mrf.mxu1  ;;  %v662_v27 = vpop.f32.mrf.mxu0 }
  0xf1   : > { %v452_v29 = vpop.f32.mrf.mxu0 }
  0xf2   : > { %v459_v31 = vadd.f32 %v452_v29, %v388_v28 }
  0xf3   : > { %v677_v32 = vpop.f32.mrf.mxu0 }
  0xf4   : > { %v463_v34 = vadd.f32 %v461_v30, %v459_v31 }
  0xf5   : > { %v455_v35 = vpop.f32.mrf.mxu0 }
  0xf6   : > { %465 = vst.msk [vmem:[#allocation2] sm:$0xff] %vm294_vm2, %v463_v34  ;;  %v460_v37 = vadd.f32 %v455_v35, %v391_v33  ;;  %470 = sbr.rel (%p638_p11) target bundleno = 265 (0x109), region = 40 }
  0xf7   : > { %v678_v38 = vpop.f32.mrf.mxu0 }
  0xf8   : > { %v464_v39 = vadd.f32 %v462_v36, %v460_v37 }
  0xfa   : > { %466 = vst.msk [vmem:[#allocation2 + $0x8] sm:$0xff] %vm294_vm2, %v464_v39 }
  0xfb   : > { %v639_v41 = vld [vmem:[%s937_s2] ss:$0 sm:$0xff]  ;;  %vm492_vm5 = vcmask 257024  }
  0xfd   : > { %v471_v40 = vld [vmem:[#allocation2] sm:$0xff] }
  0xfe   : > { %v480_v43 = vadd.f32 %v639_v41, %v471_v40 }
 0x100   : > { %v482_v45 = vmax.f32 %v480_v43, 0.0 }
 0x101   : > { %v472_v42 = vld [vmem:[#allocation2 + $0x8] sm:$0xff] }
 0x102   : > { %v481_v44 = vadd.f32 %v639_v41, %v472_v42  ;;  %v644_v47 = vpack.c.bf16 %v482_v45, %v482_v45 }
 0x104   : > { %v483_v46 = vmax.f32 %v481_v44, 0.0  ;;  %493 = vst.msk [vmem:[%s891_s23] sm:$0xf] %vm492_vm5, %v644_v47 }
 0x106   : > { %v645_v48 = vpack.c.bf16 %v483_v46, %v483_v46 }
 0x108   : > { %494 = vst.msk [vmem:[%s891_s23 + $0x4] sm:$0xf] %vm492_vm5, %v645_v48 }
 0x109 PF: > { %s13_s18 = sadd.s32 1, %s803_s18   ;;  %s940_s21 = sld [smem:[#allocation3_spill]] }
 0x10a   : > { %p10_p12 = scmp.ge.s32.totalorder %s13_s18, 98   ;;  %s941_s12 = smov %s791_s15 }
 0x10b   : > { %s942_s13 = smov %s795_s16  ;;  %s943_s14 = smov %s799_s17 }
 0x10c   : > { %s944_s15 = smov %s948_s19  ;;  %s945_s16 = smov %s952_s20 }
 0x10d   :  { %12 = sbr.rel (!%p10_p12) target bundleno = 4 (0x4), region = 75 }
 0x10f   : > { %s946_s17 = smov %s940_s21 }

// kernel: ssfa_forward.24
= control target key start
LH: loop header
LB: loop body
LE: loop exit
PB: predicated region body
PF: predicated region fallthrough
CT: control target
= control target key end

     0   :  { %s587_s12 = smov 0   ;;  %s589_s13 = smov 0   ;;  %s656_s0 = inlined_call_operand.vmem [shape: bf16[2,8,8,64], index: 0, kind: input, shape index: {}]   ;;  %s657_s1 = inlined_call_operand.vmem [shape: bf16[1,1,64,64], index: 1, kind: input, shape index: {}]   ;;  %s658_s2 = inlined_call_operand.vmem [shape: f32[1,64], index: 2, kind: input, shape index: {}]   ;;  %s659_s3 = inlined_call_operand.vmem [shape: bf16[2,8,8,64], index: 3, kind: output, shape index: {}]  }
   0x1   :  { %s591_s14 = smov 0   ;;  %s593_s15 = smov 0  }
   0x2   :  { %s595_s16 = smov 0  }
   0x3 LB: > { %s28_s17 = sadd.s32 1, %s555_s14  ;;  %s32_s18 = sadd.s32 1, %s559_s15  ;;  %s563_s16 = sphi %s595_s16, %s13_s16   ;;  %s559_s15 = sphi %s593_s15, %s663_s15   ;;  %s555_s14 = sphi %s591_s14, %s662_s14   ;;  %s551_s13 = sphi %s589_s13, %s661_s13   ;;  %s547_s12 = sphi %s587_s12, %s660_s12  }
   0x4   : > { %p30_p0 = scmp.ge.s32.totalorder %s28_s17, 8  ;;  %p449_p1 = scmp.ge.s32.totalorder %s563_s16, 1 }
   0x5   : > { %p177_p2 = scmp.lt.s32.totalorder %s563_s16, 17 }
   0x6   : > { %s665_s17 = smov (%p30_p0, %s28_s17), 0  ;;  %s667_s18 = smov (!%p30_p0, %s32_s18), %s559_s15 }
   0x7   : > { %p178_p3 = pnand %p449_p1, %p177_p2  ;;  %p34_p4 = scmp.ge.s32.totalorder %s667_s18, 2 }
   0x8   : > { %p214_p5 = scmp.lt.s32.totalorder (!%p178_p3), %s551_s13, 1  ;;  %p216_p6 = scmp.lt.s32.totalorder (!%p178_p3), %s547_s12, 7 }
   0x9   : > { %s669_s18 = smov (%p34_p4, %s667_s18), 0  ;;  %181 = sbr.rel (%p178_p3) target bundleno = 241 (0xf1), region = 32 }
   0xe   : > { %v521_v0 = vld [vmem:[%s657_s1 + $0x18] sm:$0xff]   ;;  %v565_v1 = vmov 0.0   ;;  %v522_v2 = vld [vmem:[%s657_s1 + $0x10] sm:$0xff]   ;;  %vm566_vm0 = vmmov 0   ;;  %s671_s13 = smov (!%p214_p5, %s551_s13), 1  ;;  %vm241_vm1 = vcmask 523264  }
   0xf   : > { %467 = vmatprep.subr.bf16.mxu0 %v565_v1  ;;  %475 = vmatprep.mubr.msk.bf16.mxu0 %vm566_vm0, %v565_v1  ;;  %s673_s12 = smov (!%p216_p6, %s547_s12), 7  ;;  %242 = vst.msk [vmem:[#allocation2] sm:$0xff] %vm241_vm1, %v565_v1  ;;  %v523_v3 = vld [vmem:[%s657_s1 + $0x8] sm:$0xff]   ;;  %s450_s25 = sshll.u32 %s671_s13, 3  ;;  %v524_v4 = vld [vmem:[%s657_s1] sm:$0xff]   ;;  %vm337_vm2 = vcmask 519168  }
  0x10   : > { %468 = vmatpush3.bf16.msra.mxu0 %v521_v0  ;;  %s219_s26 = sadd.s32 %s450_s25, %s673_s12  ;;  %v459_v12 = vld [vmem:[%s658_s2] ss:$0 sm:$0xff] }
  0x11   : > { %469 = vmatprep.subr.bf16.mxu0 %v565_v1  ;;  %s451_s27 = sshll.u32 %s219_s26, 2 }
  0x12   : > { %s221_s5 = scalar_lea.vmem %s656_s0, %s451_s27  ;;  %s235_s10 = scalar_lea.vmem %s659_s3, %s451_s27 }
  0x13   : > { %v243_v5 = vld [vmem:[%s221_s5] sm:$0xf] }
  0x14   : > { %470 = vmatpush3.bf16.msra.mxu0 %v522_v2 }
  0x15   : > { %471 = vmatprep.subr.bf16.mxu0 %v565_v1 }
  0x16   : > { %v320_v6 = vld [vmem:[#allocation2] sm:$0xff] }
  0x18   : > { %472 = vmatpush3.bf16.msra.mxu0 %v523_v3 }
  0x19   : > { %473 = vmatprep.subr.bf16.mxu0 %v565_v1 }
  0x1c   : > { %474 = vmatpush3.bf16.msra.mxu0 %v524_v4 }
  0x1f   : > { %476 = vmatmul.mubr.msk.bf16.vlgmr.msra.gmra.mxu0 %vm241_vm1, %v243_v5 }
  0xdf   : > { %v314_v7 = vpop.f32.mrf.mxu0 }
  0xe0   : > { %v321_v8 = vadd.f32 %v320_v6, %v314_v7 }
  0xe1   : > { %v477_v9 = vpop.f32.mrf.mxu0 }
  0xe2   : > { %322 = vst.msk [vmem:[#allocation2] sm:$0xff] %vm241_vm1, %v321_v8 }
  0xe3   : > { %v317_v10 = vpop.f32.mrf.mxu0 }
  0xe5   : > { %v478_v11 = vpop.f32.mrf.mxu0 }
  0xe9   : > { %v326_v13 = vld [vmem:[#allocation2] sm:$0xff] }
  0xea   : > { %v334_v14 = vadd.f32 %v459_v12, %v326_v13 }
  0xec   : > { %v335_v15 = vmax.f32 %v334_v14, 0.0 }
  0xee   : > { %v336_v16 = vpack.c.bf16 %v335_v15, %v335_v15 }
  0xf0   : > { %338 = vst.msk [vmem:[%s235_s10] sm:$0xf] %vm337_vm2, %v336_v16 }
  0xf1 PF: > { %s13_s16 = sadd.s32 1, %s563_s16   ;;  %s660_s12 = smov %s555_s14 }
  0xf2   : > { %p10_p7 = scmp.ge.s32.totalorder %s13_s16, 18   ;;  %s661_s13 = smov %s559_s15 }
  0xf3   : > { %s662_s14 = smov %s665_s17  ;;  %s663_s15 = smov %s669_s18 }
  0xf4   :  { %12 = sbr.rel (!%p10_p7) target bundleno = 3 (0x3), region = 73 }

// kernel: ssfa_forward.20
= control target key start
LH: loop header
LB: loop body
LE: loop exit
PB: predicated region body
PF: predicated region fallthrough
CT: control target
= control target key end

     0   :  { %s805_s12 = smov 0   ;;  %s807_s13 = smov 0   ;;  %s909_s0 = inlined_call_operand.vmem [shape: bf16[2,18,18,32], index: 0, kind: input, shape index: {}]   ;;  %s910_s1 = inlined_call_operand.vmem [shape: bf16[3,3,32,64], index: 1, kind: input, shape index: {}]   ;;  %s911_s2 = inlined_call_operand.vmem [shape: f32[1,64], index: 2, kind: input, shape index: {}]   ;;  %s912_s3 = inlined_call_operand.vmem [shape: bf16[2,8,8,64], index: 3, kind: output, shape index: {}]  }
   0x1   :  { %s809_s14 = smov 0   ;;  %s811_s15 = smov 0  }
   0x2   :  { %s813_s16 = smov 0   ;;  %s815_s17 = smov 0  }
   0x3   :  { %s817_s18 = smov 0  }
   0x4 LB: > { %s25_s19 = sadd.s32 1, %s768_s15  ;;  %s28_s20 = sadd.s32 1, %s772_s16  ;;  %s780_s18 = sphi %s817_s18, %s13_s18   ;;  %s776_s17 = sphi %s815_s17, %s920_s17   ;;  %s772_s16 = sphi %s813_s16, %s919_s16   ;;  %s768_s15 = sphi %s811_s15, %s918_s15   ;;  %s764_s14 = sphi %s809_s14, %s917_s14   ;;  %s760_s13 = sphi %s807_s13, %s916_s13   ;;  %s756_s12 = sphi %s805_s12, %s915_s12  }
   0x5   : > { %p26_p0 = scmp.ge.s32.totalorder %s25_s19, 3  ;;  %p593_p1 = scmp.ge.s32.totalorder %s780_s18, 1 }
   0x6   : > { %p182_p2 = scmp.lt.s32.totalorder %s780_s18, 49  ;;  %s32_s21 = sadd.s32 1, %s776_s17 }
   0x7   : > { %s922_s19 = smov (%p26_p0, %s25_s19), 0  ;;  %s924_s20 = smov (!%p26_p0, %s28_s20), %s772_s16 }
   0x8   : > { %p183_p3 = pnand %p593_p1, %p182_p2  ;;  %p30_p4 = scmp.ge.s32.totalorder %s924_s20, 8 }
   0x9   : > { %s594_s22 = sshll.u32 (!%p183_p3), %s760_s13, 1  ;;  %p222_p6 = scmp.lt.s32.totalorder (!%p183_p3), %s764_s14, 1 }
   0xa   : > { %s926_s20 = smov (%p30_p4, %s924_s20), 0  ;;  %s928_s21 = smov (!%p30_p4, %s32_s21), %s776_s17 }
   0xb   : > { %p34_p5 = scmp.ge.s32.totalorder %s928_s21, 2  ;;  %186 = sbr.rel (%p183_p3) target bundleno = 262 (0x106), region = 32 }
   0xc   : > { %s221_s23 = sadd.s32 (!%p183_p3), %s756_s12, %s594_s22  ;;  %p233_p7 = scmp.lt.s32.totalorder (!%p183_p3), %s756_s12, 2 }
   0xd   : > { %s930_s21 = smov (%p34_p5, %s928_s21), 0  ;;  %p224_p8 = scmp.lt.s32.totalorder (!%p183_p3), %s221_s23, 17 }
   0xe   : > { %913 = sst [smem:[#allocation3_spill]] %s930_s21  ;;  %p240_p9 = scmp.lt.s32.totalorder (!%p183_p3), %s760_s13, 7 }
   0xf   : > { %p599_p10 = scmp.ne.s32.totalorder (!%p183_p3), %s756_s12, 0 }
  0x10   : > { %s932_s14 = smov (!%p222_p6, %s764_s14), 1  ;;  %s934_s23 = smov (!%p224_p8, %s221_s23), 17 }
  0x11   : > { %s657_s24 = smul.u32 54, %s932_s14  ;;  %s597_s9 = sshll.u32 %s932_s14, 3 }
  0x12   : > { %s234_s25 = scalar_select %p233_p7, %s756_s12, 2 }
  0x13   : > { %s656_s26 = smul.u32 3, %s934_s23  ;;  %s936_s13 = smov (!%p240_p9, %s760_s13), 7 }
  0x14   : > { %s658_s27 = smul.u32 48, %s234_s25  ;;  %s243_s10 = sadd.s32 %s597_s9, %s936_s13 }
  0x15   : > { %s228_s28 = sadd.s32 %s657_s24, %s656_s26  ;;  %s598_s11 = sshll.u32 %s243_s10, 2 }
  0x16   : > { %s595_s29 = sshll.u32 %s228_s28, 2  ;;  %s859_s5 = scalar_lea.vmem %s910_s1, %s658_s27 }
  0x17   : > { %s230_s8 = scalar_lea.vmem %s909_s0, %s595_s29  ;;  %s868_s23 = scalar_lea.vmem %s912_s3, %s598_s11 }
  0x18   : > { %250 = sbr.rel (%p599_p10) target bundleno = 31 (0x1f), region = 36 }
  0x1d   : > { %vm251_vm0 = vcmask 523264   ;;  %v782_v0 = vmov 0.0  }
  0x1e   : > { %252 = vst.msk [vmem:[#allocation2] sm:$0xff] %vm251_vm0, %v782_v0 }
  0x1f PF: > { %v718_v1 = vld [vmem:[%s859_s5 + $0x18] sm:$0xff]   ;;  %v783_v2 = vmov 0.0   ;;  %v719_v3 = vld [vmem:[%s859_s5 + $0x8] sm:$0xff]   ;;  %v720_v4 = vld [vmem:[%s859_s5 + $0x10] sm:$0xff]   ;;  %vm784_vm1 = vmmov 0   ;;  %vm289_vm2 = vcmask 261120  }
  0x20   : > { %632 = vmatprep.subr.bf16.mxu0 %v783_v2  ;;  %640 = vmatprep.subr.bf16.mxu1 %v783_v2  ;;  %v721_v5 = vld [vmem:[%s859_s5] sm:$0xff]   ;;  %v255_v7 = vld [vmem:[%s230_s8 + $0x8] sm:$0x1]  ;;  %vm461_vm3 = vcmask 523264   ;;  %p619_p11 = scmp.ne.s32.totalorder %s756_s12, 2 }
  0x21   : > { %633 = vmatpush3.bf16.msra.mxu0 %v718_v1  ;;  %636 = vmatprep.mubr.msk.bf16.mxu0 %vm784_vm1, %v783_v2  ;;  %v254_v6 = vld [vmem:[%s230_s8 + $0x4] sm:$0xf]  ;;  %v253_v8 = vld [vmem:[%s230_s8] sm:$0xf]  ;;  %v724_v15 = vld [vmem:[%s859_s5 + $0x28] sm:$0xff]  }
  0x22   : > { %641 = vmatpush3.bf16.msra.mxu1 %v719_v3  ;;  %634 = vmatprep.subr.bf16.mxu0 %v783_v2  ;;  %v604_v9 = vcombine.low %v254_v6, %v255_v7  ;;  %v615_v10 = vcombine.low %v253_v8, %v254_v6  ;;  %v725_v19 = vld [vmem:[%s859_s5 + $0x20] sm:$0xff]  }
  0x23   : > { %642 = vmatprep.subr.bf16.mxu1 %v783_v2  ;;  %644 = vmatprep.mubr.msk.bf16.mxu1 %vm784_vm1, %v783_v2 }
  0x24   : > { %v271_v11 = vshrl.u32 %v604_v9, 16  ;;  %v273_v12 = vshll.u32 %v604_v9, 16  ;;  %v399_v14 = vshll.u32 %v615_v10, 16  ;;  %v397_v17 = vshrl.u32 %v615_v10, 16 }
  0x25   : > { %635 = vmatpush3.bf16.msra.mxu0 %v720_v4  ;;  %v459_v31 = vld [vmem:[#allocation2] sm:$0xff] }
  0x26   : > { %643 = vmatpush3.bf16.msra.mxu1 %v721_v5  ;;  %648 = vmatprep.subr.bf16.mxu0 %v783_v2  ;;  %v275_v13 = vrot.slane %v273_v12, 1  ;;  %v401_v18 = vrot.slane %v399_v14, 1 }
  0x28   : > { %v276_v16 = vor.u32 %v275_v13, %v271_v11  ;;  %v402_v20 = vor.u32 %v401_v18, %v397_v17 }
  0x29   : > { %645 = vmatmul.mubr.msk.bf16.vlgmr.msra.gmra.mxu1 %vm289_vm2, %v253_v8 }
  0x2a   : > { %637 = vmatmul.mubr.msk.bf16.vlgmr.msra.gmra.mxu0 %vm289_vm2, %v276_v16 }
  0x2b   : > { %649 = vmatpush3.bf16.msra.mxu0 %v724_v15  ;;  %652 = vmatprep.mubr.msk.bf16.mxu0 %vm784_vm1, %v783_v2 }
  0x2c   : > { %650 = vmatprep.subr.bf16.mxu0 %v783_v2 }
  0x2f   : > { %651 = vmatpush3.bf16.msra.mxu0 %v725_v19 }
  0x32   : > { %653 = vmatmul.mubr.msk.bf16.vlgmr.msra.gmra.mxu0 %vm289_vm2, %v402_v20 }
  0xe9   : > { %v382_v21 = vpop.f32.mrf.mxu1 }
  0xea   : > { %v327_v23 = vpop.f32.mrf.mxu0 }
  0xeb   : > { %v646_v22 = vpop.f32.mrf.mxu1  ;;  %v383_v29 = vadd.f32 %v382_v21, %v327_v23 }
  0xec   : > { %v638_v25 = vpop.f32.mrf.mxu0 }
  0xed   : > { %v385_v24 = vpop.f32.mrf.mxu1 }
  0xee   : > { %v330_v27 = vpop.f32.mrf.mxu0 }
  0xef   : > { %v647_v26 = vpop.f32.mrf.mxu1 }
  0xf0   : > { %v639_v28 = vpop.f32.mrf.mxu0 }
  0xf2   : > { %v452_v30 = vpop.f32.mrf.mxu0 }
  0xf3   : > { %v458_v32 = vadd.f32 %v452_v30, %v383_v29 }
  0xf4   : > { %v654_v33 = vpop.f32.mrf.mxu0  ;;  %466 = sbr.rel (%p619_p11) target bundleno = 262 (0x106), region = 40 }
  0xf5   : > { %v460_v34 = vadd.f32 %v459_v31, %v458_v32 }
  0xf6   : > { %v455_v35 = vpop.f32.mrf.mxu0 }
  0xf7   : > { %462 = vst.msk [vmem:[#allocation2] sm:$0xff] %vm461_vm3, %v460_v34 }
  0xf8   : > { %v655_v36 = vpop.f32.mrf.mxu0 }
  0xf9   : > { %v620_v38 = vld [vmem:[%s911_s2] ss:$0 sm:$0xff]  ;;  %vm478_vm4 = vcmask 519168  }
  0xfe   : > { %v467_v37 = vld [vmem:[#allocation2] sm:$0xff] }
  0xff   : > { %v475_v39 = vadd.f32 %v620_v38, %v467_v37 }
 0x101   : > { %v476_v40 = vmax.f32 %v475_v39, 0.0 }
 0x103   : > { %v477_v41 = vpack.c.bf16 %v476_v40, %v476_v40 }
 0x105   : > { %479 = vst.msk [vmem:[%s868_s23] sm:$0xf] %vm478_vm4, %v477_v41 }
 0x106 PF: > { %s13_s18 = sadd.s32 1, %s780_s18   ;;  %s914_s21 = sld [smem:[#allocation3_spill]] }
 0x107   : > { %p10_p12 = scmp.ge.s32.totalorder %s13_s18, 50   ;;  %s915_s12 = smov %s768_s15 }
 0x108   : > { %s916_s13 = smov %s772_s16  ;;  %s917_s14 = smov %s776_s17 }
 0x109   : > { %s918_s15 = smov %s922_s19  ;;  %s919_s16 = smov %s926_s20 }
 0x10a   :  { %12 = sbr.rel (!%p10_p12) target bundleno = 4 (0x4), region = 75 }
 0x10c   : > { %s920_s17 = smov %s914_s21 }

// kernel: ssfa_forward.21
= control target key start
LH: loop header
LB: loop body
LE: loop exit
PB: predicated region body
PF: predicated region fallthrough
CT: control target
= control target key end

     0   :  { %s868_s12 = smov 0   ;;  %s870_s13 = smov 0   ;;  %s983_s0 = inlined_call_operand.vmem [shape: bf16[2,10,10,64], index: 0, kind: input, shape index: {}]   ;;  %s984_s1 = inlined_call_operand.vmem [shape: bf16[3,3,64,64], index: 1, kind: input, shape index: {}]   ;;  %s985_s2 = inlined_call_operand.vmem [shape: f32[1,64], index: 2, kind: input, shape index: {}]   ;;  %s986_s3 = inlined_call_operand.vmem [shape: bf16[2,8,8,64], index: 3, kind: output, shape index: {}]  }
   0x1   :  { %s872_s14 = smov 0   ;;  %s874_s15 = smov 0  }
   0x2   :  { %s876_s16 = smov 0   ;;  %s878_s17 = smov 0  }
   0x3   :  { %s880_s18 = smov 0  }
   0x4 LB: > { %s25_s19 = sadd.s32 1, %s831_s15  ;;  %s28_s20 = sadd.s32 1, %s835_s16  ;;  %s843_s18 = sphi %s880_s18, %s13_s18   ;;  %s839_s17 = sphi %s878_s17, %s992_s17   ;;  %s835_s16 = sphi %s876_s16, %s991_s16   ;;  %s831_s15 = sphi %s874_s15, %s990_s15   ;;  %s827_s14 = sphi %s872_s14, %s989_s14   ;;  %s823_s13 = sphi %s870_s13, %s988_s13   ;;  %s819_s12 = sphi %s868_s12, %s987_s12  }
   0x5   : > { %p26_p0 = scmp.ge.s32.totalorder %s25_s19, 3  ;;  %p621_p1 = scmp.ge.s32.totalorder %s843_s18, 1 }
   0x6   : > { %p178_p2 = scmp.lt.s32.totalorder %s843_s18, 49  ;;  %s32_s21 = sadd.s32 1, %s839_s17 }
   0x7   : > { %s994_s19 = smov (%p26_p0, %s25_s19), 0  ;;  %s996_s20 = smov (!%p26_p0, %s28_s20), %s835_s16 }
   0x8   : > { %p179_p3 = pnand %p621_p1, %p178_p2  ;;  %p30_p4 = scmp.ge.s32.totalorder %s996_s20, 8 }
   0x9   : > { %s215_s22 = sadd.s32 (!%p179_p3), %s819_s12, %s823_s13  ;;  %p216_p6 = scmp.lt.s32.totalorder (!%p179_p3), %s827_s14, 1 }
   0xa   : > { %s998_s20 = smov (%p30_p4, %s996_s20), 0  ;;  %s1000_s21 = smov (!%p30_p4, %s32_s21), %s839_s17 }
   0xb   : > { %p34_p5 = scmp.ge.s32.totalorder %s1000_s21, 2  ;;  %182 = sbr.rel (%p179_p3) target bundleno = 275 (0x113), region = 32 }
   0xc   : > { %p218_p7 = scmp.lt.s32.totalorder (!%p179_p3), %s215_s22, 9  ;;  %p226_p8 = scmp.lt.s32.totalorder (!%p179_p3), %s819_s12, 2 }
   0xd   : > { %s1002_s21 = smov (%p34_p5, %s1000_s21), 0  ;;  %p233_p9 = scmp.lt.s32.totalorder (!%p179_p3), %s823_s13, 7 }
   0xe   : > { %p627_p10 = scmp.ne.s32.totalorder (!%p179_p3), %s819_s12, 0 }
  0x10   : > { %s1004_s14 = smov (!%p216_p6, %s827_s14), 1  ;;  %s1006_s22 = smov (!%p218_p7, %s215_s22), 9 }
  0x11   : > { %s715_s23 = smul.u32 20, %s1004_s14  ;;  %s622_s24 = sshll.u32 %s1006_s22, 1 }
  0x12   : > { %s625_s30 = sshll.u32 %s1004_s14, 3  ;;  %s1008_s13 = smov (!%p233_p9, %s823_s13), 7 }
  0x13   : > { %s222_s25 = sadd.s32 %s715_s23, %s622_s24  ;;  %s236_s6 = sadd.s32 %s625_s30, %s1008_s13 }
  0x14   : > { %s623_s26 = sshll.u32 %s222_s25, 2  ;;  %s626_s10 = sshll.u32 %s236_s6, 2 }
  0x15   : > { %s921_s29 = scalar_lea.vmem %s983_s0, %s623_s26  ;;  %s933_s23 = scalar_lea.vmem %s986_s3, %s626_s10 }
  0x16   : > { %s227_s4 = scalar_select %p226_p8, %s819_s12, 2 }
  0x17   : > { %243 = sbr.rel (%p627_p10) target bundleno = 30 (0x1e), region = 36 }
  0x18   : > { %s716_s5 = smul.u32 96, %s227_s4 }
  0x1a   : > { %s928_s9 = scalar_lea.vmem %s984_s1, %s716_s5 }
  0x1c   : > { %vm244_vm0 = vcmask 523264   ;;  %v845_v0 = vmov 0.0  }
  0x1d   : > { %245 = vst.msk [vmem:[#allocation2] sm:$0xff] %vm244_vm0, %v845_v0 }
  0x1e PF: > { %v776_v1 = vld [vmem:[%s928_s9 + $0x38] sm:$0xff]   ;;  %v846_v2 = vmov 0.0   ;;  %v778_v4 = vld [vmem:[%s928_s9 + $0x30] sm:$0xff]   ;;  %vm847_vm1 = vmmov 0   ;;  %v780_v6 = vld [vmem:[%s928_s9 + $0x28] sm:$0xff]   ;;  %vm301_vm2 = vcmask 523264  }
  0x1f   : > { %679 = vmatprep.subr.bf16.mxu0 %v846_v2  ;;  %691 = vmatprep.subr.bf16.mxu1 %v846_v2  ;;  %v777_v3 = vld [vmem:[%s928_s9 + $0x18] sm:$0xff]   ;;  %v779_v5 = vld [vmem:[%s928_s9 + $0x10] sm:$0xff]   ;;  %v781_v7 = vld [vmem:[%s928_s9 + $0x8] sm:$0xff]   ;;  %p660_p11 = scmp.ne.s32.totalorder %s819_s12, 2 }
  0x20   : > { %680 = vmatpush3.bf16.msra.mxu0 %v776_v1  ;;  %687 = vmatprep.mubr.msk.bf16.mxu0 %vm847_vm1, %v846_v2  ;;  %v246_v8 = vld [vmem:[%s921_s29] sm:$0xf]  ;;  %v247_v9 = vld [vmem:[%s921_s29 + $0x4] sm:$0x1]  ;;  %v785_v16 = vld [vmem:[%s928_s9 + $0x58] sm:$0xff]  }
  0x21   : > { %692 = vmatpush3.bf16.msra.mxu1 %v777_v3  ;;  %681 = vmatprep.subr.bf16.mxu0 %v846_v2  ;;  %v636_v10 = vcombine.low %v246_v8, %v247_v9  ;;  %v782_v11 = vld [vmem:[%s928_s9 + $0x20] sm:$0xff]   ;;  %v786_v18 = vld [vmem:[%s928_s9 + $0x50] sm:$0xff]   ;;  %v787_v19 = vld [vmem:[%s928_s9 + $0x48] sm:$0xff]  }
  0x22   : > { %693 = vmatprep.subr.bf16.mxu1 %v846_v2  ;;  %699 = vmatprep.mubr.msk.bf16.mxu1 %vm847_vm1, %v846_v2  ;;  %v783_v12 = vld [vmem:[%s928_s9] sm:$0xff]  }
  0x23   : > { %v271_v13 = vshrl.u32 %v636_v10, 16  ;;  %v273_v14 = vshll.u32 %v636_v10, 16  ;;  %v788_v20 = vld [vmem:[%s928_s9 + $0x40] sm:$0xff]   ;;  %v421_v21 = vrot.slane %v636_v10, 1 }
  0x24   : > { %682 = vmatpush3.bf16.msra.mxu0 %v778_v4  ;;  %v490_v32 = vld [vmem:[#allocation2] sm:$0xff] }
  0x25   : > { %694 = vmatpush3.bf16.msra.mxu1 %v779_v5  ;;  %683 = vmatprep.subr.bf16.mxu0 %v846_v2  ;;  %v275_v15 = vrot.slane %v273_v14, 1 }
  0x26   : > { %695 = vmatprep.subr.bf16.mxu1 %v846_v2 }
  0x27   : > { %v276_v17 = vor.u32 %v275_v15, %v271_v13 }
  0x28   : > { %684 = vmatpush3.bf16.msra.mxu0 %v780_v6 }
  0x29   : > { %696 = vmatpush3.bf16.msra.mxu1 %v781_v7  ;;  %685 = vmatprep.subr.bf16.mxu0 %v846_v2 }
  0x2a   : > { %697 = vmatprep.subr.bf16.mxu1 %v846_v2 }
  0x2c   : > { %686 = vmatpush3.bf16.msra.mxu0 %v782_v11 }
  0x2d   : > { %698 = vmatpush3.bf16.msra.mxu1 %v783_v12  ;;  %703 = vmatprep.subr.bf16.mxu0 %v846_v2 }
  0x2f   : > { %688 = vmatmul.mubr.msk.bf16.vlgmr.msra.gmra.mxu0 %vm301_vm2, %v276_v17 }
  0x30   : > { %700 = vmatmul.mubr.msk.bf16.vlgmr.msra.gmra.mxu1 %vm301_vm2, %v246_v8  ;;  %704 = vmatpush3.bf16.msra.mxu0 %v785_v16 }
  0x31   : > { %705 = vmatprep.subr.bf16.mxu0 %v846_v2  ;;  %711 = vmatprep.mubr.msk.bf16.mxu0 %vm847_vm1, %v846_v2 }
  0x34   : > { %706 = vmatpush3.bf16.msra.mxu0 %v786_v18 }
  0x35   : > { %707 = vmatprep.subr.bf16.mxu0 %v846_v2 }
  0x38   : > { %708 = vmatpush3.bf16.msra.mxu0 %v787_v19 }
  0x39   : > { %709 = vmatprep.subr.bf16.mxu0 %v846_v2 }
  0x3c   : > { %710 = vmatpush3.bf16.msra.mxu0 %v788_v20 }
  0x3f   : > { %712 = vmatmul.mubr.msk.bf16.vlgmr.msra.gmra.mxu0 %vm301_vm2, %v421_v21 }
  0xef   : > { %v339_v22 = vpop.f32.mrf.mxu0 }
  0xf0   : > { %v406_v23 = vpop.f32.mrf.mxu1 }
  0xf1   : > { %v689_v24 = vpop.f32.mrf.mxu0  ;;  %v407_v30 = vadd.f32 %v406_v23, %v339_v22 }
  0xf2   : > { %v701_v25 = vpop.f32.mrf.mxu1 }
  0xf3   : > { %v342_v26 = vpop.f32.mrf.mxu0 }
  0xf4   : > { %v409_v27 = vpop.f32.mrf.mxu1 }
  0xf5   : > { %v690_v28 = vpop.f32.mrf.mxu0 }
  0xf6   : > { %v702_v29 = vpop.f32.mrf.mxu1 }
  0xff   : > { %v483_v31 = vpop.f32.mrf.mxu0 }
 0x100   : > { %v489_v33 = vadd.f32 %v483_v31, %v407_v30 }
 0x101   : > { %v713_v34 = vpop.f32.mrf.mxu0  ;;  %496 = sbr.rel (%p660_p11) target bundleno = 275 (0x113), region = 40 }
 0x102   : > { %v491_v35 = vadd.f32 %v490_v32, %v489_v33 }
 0x103   : > { %v486_v36 = vpop.f32.mrf.mxu0 }
 0x104   : > { %492 = vst.msk [vmem:[#allocation2] sm:$0xff] %vm301_vm2, %v491_v35 }
 0x105   : > { %v714_v37 = vpop.f32.mrf.mxu0 }
 0x106   : > { %v661_v39 = vld [vmem:[%s985_s2] ss:$0 sm:$0xff]  ;;  %vm508_vm3 = vcmask 519168  }
 0x10b   : > { %v497_v38 = vld [vmem:[#allocation2] sm:$0xff] }
 0x10c   : > { %v505_v40 = vadd.f32 %v661_v39, %v497_v38 }
 0x10e   : > { %v506_v41 = vmax.f32 %v505_v40, 0.0 }
 0x110   : > { %v507_v42 = vpack.c.bf16 %v506_v41, %v506_v41 }
 0x112   : > { %509 = vst.msk [vmem:[%s933_s23] sm:$0xf] %vm508_vm3, %v507_v42 }
 0x113 PF: > { %s13_s18 = sadd.s32 1, %s843_s18   ;;  %s987_s12 = smov %s831_s15 }
 0x114   : > { %p10_p12 = scmp.ge.s32.totalorder %s13_s18, 50   ;;  %s988_s13 = smov %s835_s16 }
 0x115   : > { %s989_s14 = smov %s839_s17  ;;  %s990_s15 = smov %s994_s19 }
 0x116   : > { %s991_s16 = smov %s998_s20  ;;  %s992_s17 = smov %s1002_s21 }
 0x117   :  { %12 = sbr.rel (!%p10_p12) target bundleno = 4 (0x4), region = 75 }

// kernel: ssfa_forward.25
= control target key start
LH: loop header
LB: loop body
LE: loop exit
PB: predicated region body
PF: predicated region fallthrough
CT: control target
= control target key end

     0   :  { %s588_s12 = smov 0   ;;  %s590_s13 = smov 0   ;;  %s656_s0 = inlined_call_operand.vmem [shape: bf16[2,8,8,64], index: 0, kind: input, shape index: {}]   ;;  %s657_s1 = inlined_call_operand.vmem [shape: bf16[1,1,64,32], index: 1, kind: input, shape index: {}]   ;;  %s658_s2 = inlined_call_operand.vmem [shape: f32[1,32], index: 2, kind: input, shape index: {}]   ;;  %s659_s3 = inlined_call_operand.vmem [shape: bf16[2,8,8,32], index: 3, kind: output, shape index: {}]  }
   0x1   :  { %s592_s14 = smov 0   ;;  %s594_s15 = smov 0  }
   0x2   :  { %s596_s16 = smov 0  }
   0x3 LB: > { %s28_s17 = sadd.s32 1, %s556_s14  ;;  %s32_s18 = sadd.s32 1, %s560_s15  ;;  %s564_s16 = sphi %s596_s16, %s13_s16   ;;  %s560_s15 = sphi %s594_s15, %s663_s15   ;;  %s556_s14 = sphi %s592_s14, %s662_s14   ;;  %s552_s13 = sphi %s590_s13, %s661_s13   ;;  %s548_s12 = sphi %s588_s12, %s660_s12  }
   0x4   : > { %p30_p0 = scmp.ge.s32.totalorder %s28_s17, 8  ;;  %p450_p1 = scmp.ge.s32.totalorder %s564_s16, 1 }
   0x5   : > { %p177_p2 = scmp.lt.s32.totalorder %s564_s16, 17 }
   0x6   : > { %s665_s17 = smov (%p30_p0, %s28_s17), 0  ;;  %s667_s18 = smov (!%p30_p0, %s32_s18), %s560_s15 }
   0x7   : > { %p178_p3 = pnand %p450_p1, %p177_p2  ;;  %p34_p4 = scmp.ge.s32.totalorder %s667_s18, 2 }
   0x8   : > { %p214_p5 = scmp.lt.s32.totalorder (!%p178_p3), %s552_s13, 1  ;;  %p216_p6 = scmp.lt.s32.totalorder (!%p178_p3), %s548_s12, 7 }
   0x9   : > { %s669_s18 = smov (%p34_p4, %s667_s18), 0  ;;  %181 = sbr.rel (%p178_p3) target bundleno = 241 (0xf1), region = 32 }
   0xe   : > { %v522_v0 = vld [vmem:[%s657_s1 + $0x18] sm:$0xff]   ;;  %v566_v1 = vmov 0.0   ;;  %v523_v2 = vld [vmem:[%s657_s1 + $0x10] sm:$0xff]   ;;  %vm567_vm0 = vmmov 0   ;;  %s671_s13 = smov (!%p214_p5, %s552_s13), 1  ;;  %vm241_vm1 = vcmask 261120  }
   0xf   : > { %468 = vmatprep.subr.bf16.mxu0 %v566_v1  ;;  %476 = vmatprep.mubr.msk.bf16.mxu0 %vm567_vm0, %v566_v1  ;;  %s673_s12 = smov (!%p216_p6, %s548_s12), 7  ;;  %242 = vst.msk [vmem:[#allocation2] sm:$0xff] %vm241_vm1, %v566_v1  ;;  %v524_v3 = vld [vmem:[%s657_s1 + $0x8] sm:$0xff]   ;;  %s451_s25 = sshll.u32 %s671_s13, 3  ;;  %v525_v4 = vld [vmem:[%s657_s1] sm:$0xff]   ;;  %vm276_vm2 = vcmask 523264  }
  0x10   : > { %469 = vmatpush3.bf16.msra.mxu0 %v522_v0  ;;  %s219_s26 = sadd.s32 %s451_s25, %s673_s12  ;;  %v460_v12 = vld [vmem:[%s658_s2] ss:$0 sm:$0xff]  ;;  %vm338_vm3 = vcmask 257024  }
  0x11   : > { %470 = vmatprep.subr.bf16.mxu0 %v566_v1  ;;  %s452_s27 = sshll.u32 %s219_s26, 2 }
  0x12   : > { %s221_s5 = scalar_lea.vmem %s656_s0, %s452_s27  ;;  %s235_s10 = scalar_lea.vmem %s659_s3, %s452_s27 }
  0x13   : > { %v243_v5 = vld [vmem:[%s221_s5] sm:$0xf] }
  0x14   : > { %471 = vmatpush3.bf16.msra.mxu0 %v523_v2 }
  0x15   : > { %472 = vmatprep.subr.bf16.mxu0 %v566_v1 }
  0x16   : > { %v320_v6 = vld [vmem:[#allocation2] sm:$0xff] }
  0x18   : > { %473 = vmatpush3.bf16.msra.mxu0 %v524_v3 }
  0x19   : > { %474 = vmatprep.subr.bf16.mxu0 %v566_v1 }
  0x1c   : > { %475 = vmatpush3.bf16.msra.mxu0 %v525_v4 }
  0x1f   : > { %477 = vmatmul.mubr.msk.bf16.vlgmr.msra.gmra.mxu0 %vm276_vm2, %v243_v5 }
  0xdf   : > { %v314_v7 = vpop.f32.mrf.mxu0 }
  0xe0   : > { %v321_v8 = vadd.f32 %v320_v6, %v314_v7 }
  0xe1   : > { %v478_v9 = vpop.f32.mrf.mxu0 }
  0xe2   : > { %323 = vst.msk [vmem:[#allocation2] sm:$0xff] %vm241_vm1, %v321_v8 }
  0xe3   : > { %v317_v10 = vpop.f32.mrf.mxu0 }
  0xe5   : > { %v479_v11 = vpop.f32.mrf.mxu0 }
  0xe9   : > { %v327_v13 = vld [vmem:[#allocation2] sm:$0xff] }
  0xea   : > { %v335_v14 = vadd.f32 %v460_v12, %v327_v13 }
  0xec   : > { %v336_v15 = vmax.f32 %v335_v14, 0.0 }
  0xee   : > { %v337_v16 = vpack.c.bf16 %v336_v15, %v336_v15 }
  0xf0   : > { %339 = vst.msk [vmem:[%s235_s10] sm:$0xf] %vm338_vm3, %v337_v16 }
  0xf1 PF: > { %s13_s16 = sadd.s32 1, %s564_s16   ;;  %s660_s12 = smov %s556_s14 }
  0xf2   : > { %p10_p7 = scmp.ge.s32.totalorder %s13_s16, 18   ;;  %s661_s13 = smov %s560_s15 }
  0xf3   : > { %s662_s14 = smov %s665_s17  ;;  %s663_s15 = smov %s669_s18 }
  0xf4   :  { %12 = sbr.rel (!%p10_p7) target bundleno = 3 (0x3), region = 73 }

// kernel: ssfa_forward.26
= control target key start
LH: loop header
LB: loop body
LE: loop exit
PB: predicated region body
PF: predicated region fallthrough
CT: control target
= control target key end

     0   :  { %s720_s12 = smov 0   ;;  %s722_s13 = smov 0   ;;  %s809_s0 = inlined_call_operand.vmem [shape: bf16[2,8,9,64], index: 0, kind: input, shape index: {}]   ;;  %s810_s1 = inlined_call_operand.vmem [shape: bf16[1,2,64,32], index: 1, kind: input, shape index: {}]   ;;  %s811_s2 = inlined_call_operand.vmem [shape: f32[1,32], index: 2, kind: input, shape index: {}]   ;;  %s812_s3 = inlined_call_operand.vmem [shape: bf16[2,8,8,32], index: 3, kind: output, shape index: {}]  }
   0x1   :  { %s724_s14 = smov 0   ;;  %s726_s15 = smov 0  }
   0x2   :  { %s728_s16 = smov 0  }
   0x3 LB: > { %s28_s17 = sadd.s32 1, %s688_s14  ;;  %s32_s18 = sadd.s32 1, %s692_s15  ;;  %s696_s16 = sphi %s728_s16, %s13_s16   ;;  %s692_s15 = sphi %s726_s15, %s816_s15   ;;  %s688_s14 = sphi %s724_s14, %s815_s14   ;;  %s684_s13 = sphi %s722_s13, %s814_s13   ;;  %s680_s12 = sphi %s720_s12, %s813_s12  }
   0x4   : > { %p30_p0 = scmp.ge.s32.totalorder %s28_s17, 8  ;;  %p545_p1 = scmp.ge.s32.totalorder %s696_s16, 1 }
   0x5   : > { %p178_p2 = scmp.lt.s32.totalorder %s696_s16, 17 }
   0x6   : > { %s818_s17 = smov (%p30_p0, %s28_s17), 0  ;;  %s820_s18 = smov (!%p30_p0, %s32_s18), %s692_s15 }
   0x7   : > { %p179_p3 = pnand %p545_p1, %p178_p2  ;;  %p34_p4 = scmp.ge.s32.totalorder %s820_s18, 2 }
   0x8   : > { %p216_p5 = scmp.lt.s32.totalorder (!%p179_p3), %s684_s13, 1  ;;  %p218_p6 = scmp.lt.s32.totalorder (!%p179_p3), %s680_s12, 7 }
   0x9   : > { %s822_s18 = smov (%p34_p4, %s820_s18), 0  ;;  %182 = sbr.rel (%p179_p3) target bundleno = 244 (0xf4), region = 32 }
   0xe   : > { %v649_v0 = vld [vmem:[%s810_s1 + $0x38] sm:$0xff]   ;;  %v698_v1 = vmov 0.0   ;;  %v651_v3 = vld [vmem:[%s810_s1 + $0x30] sm:$0xff]   ;;  %vm699_vm0 = vmmov 0   ;;  %s824_s13 = smov (!%p216_p5, %s684_s13), 1  ;;  %s826_s12 = smov (!%p218_p6, %s680_s12), 7 }
   0xf   : > { %583 = vmatprep.subr.bf16.mxu0 %v698_v1  ;;  %595 = vmatprep.subr.bf16.mxu1 %v698_v1  ;;  %v650_v2 = vld [vmem:[%s810_s1 + $0x18] sm:$0xff]   ;;  %v652_v4 = vld [vmem:[%s810_s1 + $0x10] sm:$0xff]   ;;  %v653_v5 = vld [vmem:[%s810_s1 + $0x28] sm:$0xff]   ;;  %s547_s29 = sshll.u32 %s824_s13, 4  ;;  %s546_s5 = sshll.u32 %s826_s12, 1  ;;  %vm301_vm1 = vcmask 523264  }
  0x10   : > { %584 = vmatpush3.bf16.msra.mxu0 %v649_v0  ;;  %591 = vmatprep.mubr.msk.bf16.mxu0 %vm699_vm0, %v698_v1  ;;  %v654_v6 = vld [vmem:[%s810_s1 + $0x8] sm:$0xff]   ;;  %s222_s6 = sadd.s32 %s547_s29, %s546_s5  ;;  %s549_s7 = sshll.u32 %s824_s13, 3  ;;  %v655_v7 = vld [vmem:[%s810_s1 + $0x20] sm:$0xff]   ;;  %vm244_vm2 = vcmask 261120   ;;  %vm430_vm3 = vcmask 257024  }
  0x11   : > { %596 = vmatpush3.bf16.msra.mxu1 %v650_v2  ;;  %585 = vmatprep.subr.bf16.mxu0 %v698_v1  ;;  %s548_s8 = sshll.u32 %s222_s6, 2  ;;  %s776_s9 = sadd.s32 %s549_s7, %s826_s12  ;;  %v656_v8 = vld [vmem:[%s810_s1] sm:$0xff]   ;;  %245 = vst.msk [vmem:[#allocation2] sm:$0xff] %vm244_vm2, %v698_v1 }
  0x12   : > { %597 = vmatprep.subr.bf16.mxu1 %v698_v1  ;;  %603 = vmatprep.mubr.msk.bf16.mxu1 %vm699_vm0, %v698_v1  ;;  %s224_s21 = scalar_lea.vmem %s809_s0, %s548_s8  ;;  %v570_v27 = vld [vmem:[%s811_s2] ss:$0 sm:$0xff]  ;;  %s550_s24 = sshll.u32 %s776_s9, 2 }
  0x13   : > { %v246_v9 = vld [vmem:[%s224_s21] sm:$0xf]  ;;  %v247_v10 = vld [vmem:[%s224_s21 + $0x4] sm:$0x1]  ;;  %s238_s27 = scalar_lea.vmem %s812_s3, %s550_s24 }
  0x14   : > { %586 = vmatpush3.bf16.msra.mxu0 %v651_v3  ;;  %v559_v11 = vcombine.low %v246_v9, %v247_v10 }
  0x15   : > { %598 = vmatpush3.bf16.msra.mxu1 %v652_v4  ;;  %587 = vmatprep.subr.bf16.mxu0 %v698_v1 }
  0x16   : > { %599 = vmatprep.subr.bf16.mxu1 %v698_v1  ;;  %v271_v12 = vshrl.u32 %v559_v11, 16  ;;  %v273_v13 = vshll.u32 %v559_v11, 16 }
  0x18   : > { %588 = vmatpush3.bf16.msra.mxu0 %v653_v5  ;;  %v275_v14 = vrot.slane %v273_v13, 1  ;;  %v412_v18 = vld [vmem:[#allocation2] sm:$0xff] }
  0x19   : > { %600 = vmatpush3.bf16.msra.mxu1 %v654_v6  ;;  %589 = vmatprep.subr.bf16.mxu0 %v698_v1 }
  0x1a   : > { %601 = vmatprep.subr.bf16.mxu1 %v698_v1  ;;  %v276_v15 = vor.u32 %v275_v14, %v271_v12 }
  0x1c   : > { %590 = vmatpush3.bf16.msra.mxu0 %v655_v7 }
  0x1d   : > { %602 = vmatpush3.bf16.msra.mxu1 %v656_v8 }
  0x1f   : > { %592 = vmatmul.mubr.msk.bf16.vlgmr.msra.gmra.mxu0 %vm301_vm1, %v276_v15 }
  0x20   : > { %604 = vmatmul.mubr.msk.bf16.vlgmr.msra.gmra.mxu1 %vm301_vm1, %v246_v9 }
  0xdf   : > { %v339_v17 = vpop.f32.mrf.mxu0 }
  0xe0   : > { %v406_v16 = vpop.f32.mrf.mxu1 }
  0xe1   : > { %v407_v20 = vadd.f32 %v406_v16, %v339_v17  ;;  %v593_v21 = vpop.f32.mrf.mxu0 }
  0xe2   : > { %v605_v19 = vpop.f32.mrf.mxu1 }
  0xe3   : > { %v413_v23 = vadd.f32 %v412_v18, %v407_v20  ;;  %v342_v24 = vpop.f32.mrf.mxu0 }
  0xe4   : > { %v409_v22 = vpop.f32.mrf.mxu1 }
  0xe5   : > { %415 = vst.msk [vmem:[#allocation2] sm:$0xff] %vm244_vm2, %v413_v23  ;;  %v594_v26 = vpop.f32.mrf.mxu0 }
  0xe6   : > { %v606_v25 = vpop.f32.mrf.mxu1 }
  0xec   : > { %v419_v28 = vld [vmem:[#allocation2] sm:$0xff] }
  0xed   : > { %v427_v29 = vadd.f32 %v570_v27, %v419_v28 }
  0xef   : > { %v428_v30 = vmax.f32 %v427_v29, 0.0 }
  0xf1   : > { %v429_v31 = vpack.c.bf16 %v428_v30, %v428_v30 }
  0xf3   : > { %431 = vst.msk [vmem:[%s238_s27] sm:$0xf] %vm430_vm3, %v429_v31 }
  0xf4 PF: > { %s13_s16 = sadd.s32 1, %s696_s16   ;;  %s813_s12 = smov %s688_s14 }
  0xf5   : > { %p10_p7 = scmp.ge.s32.totalorder %s13_s16, 18   ;;  %s814_s13 = smov %s692_s15 }
  0xf6   : > { %s815_s14 = smov %s818_s17  ;;  %s816_s15 = smov %s822_s18 }
  0xf7   :  { %12 = sbr.rel (!%p10_p7) target bundleno = 3 (0x3), region = 74 }

// kernel: ssfa_forward.28
= control target key start
LH: loop header
LB: loop body
LE: loop exit
PB: predicated region body
PF: predicated region fallthrough
CT: control target
= control target key end

     0   :  { %s758_s12 = smov 0   ;;  %s760_s13 = smov 0   ;;  %s862_s0 = inlined_call_operand.vmem [shape: bf16[2,9,9,64], index: 0, kind: input, shape index: {}]   ;;  %s863_s1 = inlined_call_operand.vmem [shape: bf16[2,2,64,32], index: 1, kind: input, shape index: {}]   ;;  %s864_s2 = inlined_call_operand.vmem [shape: f32[1,32], index: 2, kind: input, shape index: {}]   ;;  %s865_s3 = inlined_call_operand.vmem [shape: bf16[2,8,8,32], index: 3, kind: output, shape index: {}]  }
   0x1   :  { %s762_s14 = smov 0   ;;  %s764_s15 = smov 0  }
   0x2   :  { %s766_s16 = smov 0   ;;  %s768_s17 = smov 0  }
   0x3   :  { %s770_s18 = smov 0  }
   0x4 LB: > { %s25_s19 = sadd.s32 1, %s721_s15  ;;  %s28_s20 = sadd.s32 1, %s725_s16  ;;  %s733_s18 = sphi %s770_s18, %s13_s18   ;;  %s729_s17 = sphi %s768_s17, %s871_s17   ;;  %s725_s16 = sphi %s766_s16, %s870_s16   ;;  %s721_s15 = sphi %s764_s15, %s869_s15   ;;  %s717_s14 = sphi %s762_s14, %s868_s14   ;;  %s713_s13 = sphi %s760_s13, %s867_s13   ;;  %s709_s12 = sphi %s758_s12, %s866_s12  }
   0x5   : > { %p26_p0 = scmp.ge.s32.totalorder %s25_s19, 2  ;;  %p544_p1 = scmp.ge.s32.totalorder %s733_s18, 1 }
   0x6   : > { %p178_p2 = scmp.lt.s32.totalorder %s733_s18, 33  ;;  %s32_s21 = sadd.s32 1, %s729_s17 }
   0x7   : > { %s873_s19 = smov (%p26_p0, %s25_s19), 0  ;;  %s875_s20 = smov (!%p26_p0, %s28_s20), %s725_s16 }
   0x8   : > { %p179_p3 = pnand %p544_p1, %p178_p2  ;;  %p30_p4 = scmp.ge.s32.totalorder %s875_s20, 8 }
   0x9   : > { %s215_s22 = sadd.s32 (!%p179_p3), %s709_s12, %s713_s13  ;;  %p216_p6 = scmp.lt.s32.totalorder (!%p179_p3), %s717_s14, 1 }
   0xa   : > { %s877_s20 = smov (%p30_p4, %s875_s20), 0  ;;  %s879_s21 = smov (!%p30_p4, %s32_s21), %s729_s17 }
   0xb   : > { %p34_p5 = scmp.ge.s32.totalorder %s879_s21, 2  ;;  %182 = sbr.rel (%p179_p3) target bundleno = 260 (0x104), region = 32 }
   0xc   : > { %p218_p7 = scmp.lt.s32.totalorder (!%p179_p3), %s215_s22, 8  ;;  %p226_p8 = scmp.lt.s32.totalorder (!%p179_p3), %s709_s12, 1 }
   0xd   : > { %s881_s21 = smov (%p34_p5, %s879_s21), 0  ;;  %p233_p9 = scmp.lt.s32.totalorder (!%p179_p3), %s713_s13, 7 }
   0xe   : > { %p551_p10 = scmp.ne.s32.totalorder (!%p179_p3), %s709_s12, 0 }
  0x10   : > { %s883_s14 = smov (!%p216_p6, %s717_s14), 1  ;;  %s885_s22 = smov (!%p218_p7, %s215_s22), 8 }
  0x11   : > { %s610_s23 = smul.u32 18, %s883_s14  ;;  %s545_s24 = sshll.u32 %s885_s22, 1 }
  0x12   : > { %s549_s30 = sshll.u32 %s883_s14, 3  ;;  %s887_s13 = smov (!%p233_p9, %s713_s13), 7 }
  0x13   : > { %s222_s25 = sadd.s32 %s610_s23, %s545_s24  ;;  %s236_s9 = sadd.s32 %s549_s30, %s887_s13 }
  0x14   : > { %s546_s26 = sshll.u32 %s222_s25, 2  ;;  %s550_s10 = sshll.u32 %s236_s9, 2 }
  0x15   : > { %s811_s29 = scalar_lea.vmem %s862_s0, %s546_s26  ;;  %s823_s23 = scalar_lea.vmem %s865_s3, %s550_s10 }
  0x16   : > { %s227_s4 = scalar_select %p226_p8, %s709_s12, 1 }
  0x17   : > { %243 = sbr.rel (%p551_p10) target bundleno = 30 (0x1e), region = 36 }
  0x18   : > { %s575_s5 = sshll.u32 %s227_s4, 6 }
  0x19   : > { %s818_s8 = scalar_lea.vmem %s863_s1, %s575_s5 }
  0x1c   : > { %vm244_vm0 = vcmask 261120   ;;  %v735_v0 = vmov 0.0  }
  0x1d   : > { %245 = vst.msk [vmem:[#allocation2] sm:$0xff] %vm244_vm0, %v735_v0 }
  0x1e PF: > { %v670_v1 = vld [vmem:[%s818_s8 + $0x38] sm:$0xff]   ;;  %v736_v2 = vmov 0.0   ;;  %v672_v4 = vld [vmem:[%s818_s8 + $0x30] sm:$0xff]   ;;  %vm737_vm1 = vmmov 0   ;;  %v674_v6 = vld [vmem:[%s818_s8 + $0x28] sm:$0xff]   ;;  %vm301_vm2 = vcmask 523264  }
  0x1f   : > { %586 = vmatprep.subr.bf16.mxu0 %v736_v2  ;;  %598 = vmatprep.subr.bf16.mxu1 %v736_v2  ;;  %v671_v3 = vld [vmem:[%s818_s8 + $0x18] sm:$0xff]   ;;  %v673_v5 = vld [vmem:[%s818_s8 + $0x10] sm:$0xff]   ;;  %v675_v7 = vld [vmem:[%s818_s8 + $0x8] sm:$0xff]   ;;  %vm414_vm3 = vcmask 261120   ;;  %p571_p11 = scmp.ne.s32.totalorder %s709_s12, 1 }
  0x20   : > { %587 = vmatpush3.bf16.msra.mxu0 %v670_v1  ;;  %594 = vmatprep.mubr.msk.bf16.mxu0 %vm737_vm1, %v736_v2  ;;  %v246_v8 = vld [vmem:[%s811_s29] sm:$0xf]  ;;  %v247_v9 = vld [vmem:[%s811_s29 + $0x4] sm:$0x1] }
  0x21   : > { %599 = vmatpush3.bf16.msra.mxu1 %v671_v3  ;;  %588 = vmatprep.subr.bf16.mxu0 %v736_v2  ;;  %v560_v10 = vcombine.low %v246_v8, %v247_v9  ;;  %v676_v11 = vld [vmem:[%s818_s8 + $0x20] sm:$0xff]  }
  0x22   : > { %600 = vmatprep.subr.bf16.mxu1 %v736_v2  ;;  %606 = vmatprep.mubr.msk.bf16.mxu1 %vm737_vm1, %v736_v2  ;;  %v677_v12 = vld [vmem:[%s818_s8] sm:$0xff]  }
  0x23   : > { %v271_v13 = vshrl.u32 %v560_v10, 16  ;;  %v273_v14 = vshll.u32 %v560_v10, 16 }
  0x24   : > { %589 = vmatpush3.bf16.msra.mxu0 %v672_v4  ;;  %v412_v19 = vld [vmem:[#allocation2] sm:$0xff] }
  0x25   : > { %601 = vmatpush3.bf16.msra.mxu1 %v673_v5  ;;  %590 = vmatprep.subr.bf16.mxu0 %v736_v2  ;;  %v275_v15 = vrot.slane %v273_v14, 1 }
  0x26   : > { %602 = vmatprep.subr.bf16.mxu1 %v736_v2 }
  0x27   : > { %v276_v16 = vor.u32 %v275_v15, %v271_v13 }
  0x28   : > { %591 = vmatpush3.bf16.msra.mxu0 %v674_v6 }
  0x29   : > { %603 = vmatpush3.bf16.msra.mxu1 %v675_v7  ;;  %592 = vmatprep.subr.bf16.mxu0 %v736_v2 }
  0x2a   : > { %604 = vmatprep.subr.bf16.mxu1 %v736_v2 }
  0x2c   : > { %593 = vmatpush3.bf16.msra.mxu0 %v676_v11 }
  0x2d   : > { %605 = vmatpush3.bf16.msra.mxu1 %v677_v12 }
  0x2f   : > { %595 = vmatmul.mubr.msk.bf16.vlgmr.msra.gmra.mxu0 %vm301_vm2, %v276_v16 }
  0x30   : > { %607 = vmatmul.mubr.msk.bf16.vlgmr.msra.gmra.mxu1 %vm301_vm2, %v246_v8 }
  0xef   : > { %v339_v17 = vpop.f32.mrf.mxu0 }
  0xf0   : > { %v406_v18 = vpop.f32.mrf.mxu1 }
  0xf1   : > { %v407_v20 = vadd.f32 %v406_v18, %v339_v17  ;;  %v596_v21 = vpop.f32.mrf.mxu0 }
  0xf2   : > { %v608_v22 = vpop.f32.mrf.mxu1  ;;  %419 = sbr.rel (%p571_p11) target bundleno = 260 (0x104), region = 40 }
  0xf3   : > { %v413_v23 = vadd.f32 %v412_v19, %v407_v20  ;;  %v342_v24 = vpop.f32.mrf.mxu0 }
  0xf4   : > { %v409_v25 = vpop.f32.mrf.mxu1 }
  0xf5   : > { %415 = vst.msk [vmem:[#allocation2] sm:$0xff] %vm414_vm3, %v413_v23  ;;  %v597_v26 = vpop.f32.mrf.mxu0 }
  0xf6   : > { %v609_v27 = vpop.f32.mrf.mxu1 }
  0xf7   : > { %v572_v29 = vld [vmem:[%s864_s2] ss:$0 sm:$0xff]  ;;  %vm431_vm4 = vcmask 257024  }
  0xfc   : > { %v420_v28 = vld [vmem:[#allocation2] sm:$0xff] }
  0xfd   : > { %v428_v30 = vadd.f32 %v572_v29, %v420_v28 }
  0xff   : > { %v429_v31 = vmax.f32 %v428_v30, 0.0 }
 0x101   : > { %v430_v32 = vpack.c.bf16 %v429_v31, %v429_v31 }
 0x103   : > { %432 = vst.msk [vmem:[%s823_s23] sm:$0xf] %vm431_vm4, %v430_v32 }
 0x104 PF: > { %s13_s18 = sadd.s32 1, %s733_s18   ;;  %s866_s12 = smov %s721_s15 }
 0x105   : > { %p10_p12 = scmp.ge.s32.totalorder %s13_s18, 34   ;;  %s867_s13 = smov %s725_s16 }
 0x106   : > { %s868_s14 = smov %s729_s17  ;;  %s869_s15 = smov %s873_s19 }
 0x107   : > { %s870_s16 = smov %s877_s20  ;;  %s871_s17 = smov %s881_s21 }
 0x108   :  { %12 = sbr.rel (!%p10_p12) target bundleno = 4 (0x4), region = 74 }

// kernel: ssfa_forward.27
= control target key start
LH: loop header
LB: loop body
LE: loop exit
PB: predicated region body
PF: predicated region fallthrough
CT: control target
= control target key end

     0   :  { %s626_s12 = smov 0   ;;  %s628_s13 = smov 0   ;;  %s716_s0 = inlined_call_operand.vmem [shape: bf16[2,9,8,64], index: 0, kind: input, shape index: {}]   ;;  %s717_s1 = inlined_call_operand.vmem [shape: bf16[2,1,64,32], index: 1, kind: input, shape index: {}]   ;;  %s718_s2 = inlined_call_operand.vmem [shape: f32[1,32], index: 2, kind: input, shape index: {}]   ;;  %s719_s3 = inlined_call_operand.vmem [shape: bf16[2,8,8,32], index: 3, kind: output, shape index: {}]  }
   0x1   :  { %s630_s14 = smov 0   ;;  %s632_s15 = smov 0  }
   0x2   :  { %s634_s16 = smov 0   ;;  %s636_s17 = smov 0  }
   0x3   :  { %s638_s18 = smov 0  }
   0x4 LB: > { %s25_s19 = sadd.s32 1, %s589_s15  ;;  %s28_s20 = sadd.s32 1, %s593_s16  ;;  %s601_s18 = sphi %s638_s18, %s13_s18   ;;  %s597_s17 = sphi %s636_s17, %s727_s17   ;;  %s593_s16 = sphi %s634_s16, %s726_s16   ;;  %s589_s15 = sphi %s632_s15, %s725_s15   ;;  %s585_s14 = sphi %s630_s14, %s724_s14   ;;  %s581_s13 = sphi %s628_s13, %s723_s13   ;;  %s577_s12 = sphi %s626_s12, %s722_s12  }
   0x5   : > { %p26_p0 = scmp.ge.s32.totalorder %s25_s19, 2  ;;  %p449_p1 = scmp.ge.s32.totalorder %s601_s18, 1 }
   0x6   : > { %p177_p2 = scmp.lt.s32.totalorder %s601_s18, 33  ;;  %s32_s21 = sadd.s32 1, %s597_s17 }
   0x7   : > { %s729_s19 = smov (%p26_p0, %s25_s19), 0  ;;  %s731_s20 = smov (!%p26_p0, %s28_s20), %s593_s16 }
   0x8   : > { %p178_p3 = pnand %p449_p1, %p177_p2  ;;  %p30_p4 = scmp.ge.s32.totalorder %s731_s20, 8 }
   0x9   : > { %s213_s22 = sadd.s32 (!%p178_p3), %s577_s12, %s581_s13  ;;  %p214_p6 = scmp.lt.s32.totalorder (!%p178_p3), %s585_s14, 1 }
   0xa   : > { %s733_s20 = smov (%p30_p4, %s731_s20), 0  ;;  %s735_s21 = smov (!%p30_p4, %s32_s21), %s597_s17 }
   0xb   : > { %p34_p5 = scmp.ge.s32.totalorder %s735_s21, 2  ;;  %181 = sbr.rel (%p178_p3) target bundleno = 256 (0x100), region = 32 }
   0xc   : > { %p216_p7 = scmp.lt.s32.totalorder (!%p178_p3), %s213_s22, 8  ;;  %p223_p8 = scmp.lt.s32.totalorder (!%p178_p3), %s577_s12, 1 }
   0xd   : > { %s737_s21 = smov (%p34_p5, %s735_s21), 0  ;;  %p230_p9 = scmp.lt.s32.totalorder (!%p178_p3), %s581_s13, 7 }
   0xe   : > { %720 = sst [smem:[#allocation3_spill]] %s737_s21  ;;  %p455_p10 = scmp.ne.s32.totalorder (!%p178_p3), %s577_s12, 0 }
  0x10   : > { %s739_s14 = smov (!%p214_p6, %s585_s14), 1  ;;  %s741_s22 = smov (!%p216_p7, %s213_s22), 8 }
  0x11   : > { %s483_s23 = smul.u32 9, %s739_s14  ;;  %s453_s26 = sshll.u32 %s739_s14, 3 }
  0x12   : > { %s224_s24 = scalar_select %p223_p8, %s577_s12, 1 }
  0x13   : > { %s219_s25 = sadd.s32 %s483_s23, %s741_s22  ;;  %s743_s13 = smov (!%p230_p9, %s581_s13), 7 }
  0x14   : > { %s450_s27 = sshll.u32 %s219_s25, 2  ;;  %s465_s28 = sshll.u32 %s224_s24, 5 }
  0x15   : > { %s221_s4 = scalar_lea.vmem %s716_s0, %s450_s27  ;;  %s227_s7 = scalar_lea.vmem %s717_s1, %s465_s28 }
  0x16   : > { %s233_s8 = sadd.s32 %s453_s26, %s743_s13  ;;  %240 = sbr.rel (%p455_p10) target bundleno = 29 (0x1d), region = 36 }
  0x17   : > { %s454_s9 = sshll.u32 %s233_s8, 2 }
  0x18   : > { %s687_s21 = scalar_lea.vmem %s719_s3, %s454_s9 }
  0x1b   : > { %vm241_vm0 = vcmask 261120   ;;  %v603_v0 = vmov 0.0  }
  0x1c   : > { %242 = vst.msk [vmem:[#allocation2] sm:$0xff] %vm241_vm0, %v603_v0 }
  0x1d PF: > { %v543_v1 = vld [vmem:[%s227_s7 + $0x18] sm:$0xff]   ;;  %v604_v2 = vmov 0.0   ;;  %v544_v3 = vld [vmem:[%s227_s7 + $0x10] sm:$0xff]   ;;  %vm605_vm1 = vmmov 0   ;;  %v545_v4 = vld [vmem:[%s227_s7 + $0x8] sm:$0xff]   ;;  %vm276_vm2 = vcmask 523264  }
  0x1e   : > { %471 = vmatprep.subr.bf16.mxu0 %v604_v2  ;;  %479 = vmatprep.mubr.msk.bf16.mxu0 %vm605_vm1, %v604_v2  ;;  %v546_v5 = vld [vmem:[%s227_s7] sm:$0xff]   ;;  %vm322_vm3 = vcmask 261120   ;;  %p461_p11 = scmp.ne.s32.totalorder %s577_s12, 1 }
  0x1f   : > { %472 = vmatpush3.bf16.msra.mxu0 %v543_v1  ;;  %v243_v6 = vld [vmem:[%s221_s4] sm:$0xf] }
  0x20   : > { %473 = vmatprep.subr.bf16.mxu0 %v604_v2 }
  0x23   : > { %474 = vmatpush3.bf16.msra.mxu0 %v544_v3  ;;  %v320_v7 = vld [vmem:[#allocation2] sm:$0xff] }
  0x24   : > { %475 = vmatprep.subr.bf16.mxu0 %v604_v2 }
  0x27   : > { %476 = vmatpush3.bf16.msra.mxu0 %v545_v4 }
  0x28   : > { %477 = vmatprep.subr.bf16.mxu0 %v604_v2 }
  0x2b   : > { %478 = vmatpush3.bf16.msra.mxu0 %v546_v5 }
  0x2e   : > { %480 = vmatmul.mubr.msk.bf16.vlgmr.msra.gmra.mxu0 %vm276_vm2, %v243_v6 }
  0xee   : > { %v314_v8 = vpop.f32.mrf.mxu0 }
  0xef   : > { %v321_v9 = vadd.f32 %v320_v7, %v314_v8 }
  0xf0   : > { %v481_v10 = vpop.f32.mrf.mxu0  ;;  %327 = sbr.rel (%p461_p11) target bundleno = 256 (0x100), region = 40 }
  0xf1   : > { %323 = vst.msk [vmem:[#allocation2] sm:$0xff] %vm322_vm3, %v321_v9 }
  0xf2   : > { %v317_v11 = vpop.f32.mrf.mxu0 }
  0xf4   : > { %v482_v12 = vpop.f32.mrf.mxu0 }
  0xf5   : > { %v462_v14 = vld [vmem:[%s718_s2] ss:$0 sm:$0xff]  ;;  %vm339_vm4 = vcmask 257024  }
  0xf8   : > { %v328_v13 = vld [vmem:[#allocation2] sm:$0xff] }
  0xf9   : > { %v336_v15 = vadd.f32 %v462_v14, %v328_v13 }
  0xfb   : > { %v337_v16 = vmax.f32 %v336_v15, 0.0 }
  0xfd   : > { %v338_v17 = vpack.c.bf16 %v337_v16, %v337_v16 }
  0xff   : > { %340 = vst.msk [vmem:[%s687_s21] sm:$0xf] %vm339_vm4, %v338_v17 }
 0x100 PF: > { %s13_s18 = sadd.s32 1, %s601_s18   ;;  %s721_s22 = sld [smem:[#allocation3_spill]] }
 0x101   : > { %p10_p12 = scmp.ge.s32.totalorder %s13_s18, 34   ;;  %s722_s12 = smov %s589_s15 }
 0x102   : > { %s723_s13 = smov %s593_s16  ;;  %s724_s14 = smov %s597_s17 }
 0x103   : > { %s725_s15 = smov %s729_s19  ;;  %s726_s16 = smov %s733_s20 }
 0x104   :  { %12 = sbr.rel (!%p10_p12) target bundleno = 4 (0x4), region = 73 }
 0x106   : > { %s727_s17 = smov %s721_s22 }

// kernel: ssfa_forward.23
= control target key start
LH: loop header
LB: loop body
LE: loop exit
PB: predicated region body
PF: predicated region fallthrough
CT: control target
= control target key end

     0   :  { %s605_s12 = smov 0   ;;  %s607_s13 = smov 0   ;;  %s674_s0 = inlined_call_operand.vmem [shape: bf16[2,16,16,32], index: 0, kind: input, shape index: {}]   ;;  %s675_s1 = inlined_call_operand.vmem [shape: bf16[1,1,32,32], index: 1, kind: input, shape index: {}]   ;;  %s676_s2 = inlined_call_operand.vmem [shape: f32[1,32], index: 2, kind: input, shape index: {}]   ;;  %s677_s3 = inlined_call_operand.vmem [shape: bf16[2,16,16,32], index: 3, kind: output, shape index: {}]  }
   0x1   :  { %s609_s14 = smov 0   ;;  %s611_s15 = smov 0  }
   0x2   :  { %s613_s16 = smov 0  }
   0x3 LB: > { %s28_s17 = sadd.s32 1, %s573_s14  ;;  %s32_s18 = sadd.s32 1, %s577_s15  ;;  %s581_s16 = sphi %s613_s16, %s13_s16   ;;  %s577_s15 = sphi %s611_s15, %s681_s15   ;;  %s573_s14 = sphi %s609_s14, %s680_s14   ;;  %s569_s13 = sphi %s607_s13, %s679_s13   ;;  %s565_s12 = sphi %s605_s12, %s678_s12  }
   0x4   : > { %p30_p0 = scmp.ge.s32.totalorder %s28_s17, 16  ;;  %p469_p1 = scmp.ge.s32.totalorder %s581_s16, 1 }
   0x5   : > { %p178_p2 = scmp.lt.s32.totalorder %s581_s16, 33 }
   0x6   : > { %s683_s17 = smov (%p30_p0, %s28_s17), 0  ;;  %s685_s18 = smov (!%p30_p0, %s32_s18), %s577_s15 }
   0x7   : > { %p179_p3 = pnand %p469_p1, %p178_p2  ;;  %p34_p4 = scmp.ge.s32.totalorder %s685_s18, 2 }
   0x8   : > { %p217_p5 = scmp.lt.s32.totalorder (!%p179_p3), %s569_s13, 1  ;;  %p219_p6 = scmp.lt.s32.totalorder (!%p179_p3), %s565_s12, 15 }
   0x9   : > { %s687_s18 = smov (%p34_p4, %s685_s18), 0  ;;  %182 = sbr.rel (%p179_p3) target bundleno = 237 (0xed), region = 32 }
   0xe   : > { %v540_v0 = vld [vmem:[%s675_s1 + $0x8] sm:$0xff]   ;;  %v583_v1 = vmov 0.0   ;;  %v541_v2 = vld [vmem:[%s675_s1] sm:$0xff]   ;;  %vm584_vm0 = vmmov 0   ;;  %vm246_vm1 = vcmask 261120   ;;  %s689_s13 = smov (!%p217_p5, %s569_s13), 1 }
   0xf   : > { %490 = vmatprep.subr.bf16.mxu0 %v583_v1  ;;  %494 = vmatprep.mubr.msk.bf16.mxu0 %vm584_vm0, %v583_v1  ;;  %247 = vst.msk [vmem:[#allocation2] sm:$0xff] %vm246_vm1, %v583_v1  ;;  %248 = vst.msk [vmem:[#allocation2 + $0x8] sm:$0xff] %vm246_vm1, %v583_v1  ;;  %s691_s12 = smov (!%p219_p6, %s565_s12), 15  ;;  %s471_s23 = sshll.u32 %s689_s13, 5  ;;  %v480_v12 = vld [vmem:[%s676_s2] ss:$0 sm:$0xff] }
  0x10   : > { %491 = vmatpush3.bf16.msra.mxu0 %v540_v0  ;;  %s470_s24 = sshll.u32 %s691_s12, 1  ;;  %vm347_vm2 = vcmask 257024  }
  0x11   : > { %492 = vmatprep.subr.bf16.mxu0 %v583_v1  ;;  %s223_s25 = sadd.s32 %s471_s23, %s470_s24 }
  0x12   : > { %s472_s26 = sshll.u32 %s223_s25, 2 }
  0x13   : > { %s225_s29 = scalar_lea.vmem %s674_s0, %s472_s26  ;;  %s240_s7 = scalar_lea.vmem %s677_s3, %s472_s26 }
  0x14   : > { %493 = vmatpush3.bf16.msra.mxu0 %v541_v2  ;;  %v542_v3 = vld [vmem:[%s225_s29] sm:$0xff]  }
  0x16   : > { %v317_v4 = vld [vmem:[#allocation2] sm:$0xff]  ;;  %v318_v8 = vld [vmem:[#allocation2 + $0x8] sm:$0xff] }
  0x17   : > { %495 = vmatmul.mubr.msk.bf16.vlgmr.msra.gmra.mxu0 %vm246_vm1, %v542_v3 }
  0xd7   : > { %v310_v5 = vpop.f32.mrf.mxu0 }
  0xd8   : > { %v319_v6 = vadd.f32 %v317_v4, %v310_v5 }
  0xd9   : > { %v496_v7 = vpop.f32.mrf.mxu0 }
  0xda   : > { %321 = vst.msk [vmem:[#allocation2] sm:$0xff] %vm246_vm1, %v319_v6 }
  0xdb   : > { %v313_v9 = vpop.f32.mrf.mxu0 }
  0xdc   : > { %v320_v10 = vadd.f32 %v318_v8, %v313_v9 }
  0xdd   : > { %v497_v11 = vpop.f32.mrf.mxu0 }
  0xde   : > { %322 = vst.msk [vmem:[#allocation2 + $0x8] sm:$0xff] %vm246_vm1, %v320_v10 }
  0xe1   : > { %v326_v13 = vld [vmem:[#allocation2] sm:$0xff] }
  0xe2   : > { %v335_v14 = vadd.f32 %v480_v12, %v326_v13 }
  0xe4   : > { %v337_v15 = vmax.f32 %v335_v14, 0.0 }
  0xe5   : > { %v327_v16 = vld [vmem:[#allocation2 + $0x8] sm:$0xff] }
  0xe6   : > { %v485_v17 = vpack.c.bf16 %v337_v15, %v337_v15  ;;  %v336_v18 = vadd.f32 %v480_v12, %v327_v16 }
  0xe8   : > { %348 = vst.msk [vmem:[%s240_s7] sm:$0xf] %vm347_vm2, %v485_v17  ;;  %v338_v19 = vmax.f32 %v336_v18, 0.0 }
  0xea   : > { %v486_v20 = vpack.c.bf16 %v338_v19, %v338_v19 }
  0xec   : > { %349 = vst.msk [vmem:[%s240_s7 + $0x4] sm:$0xf] %vm347_vm2, %v486_v20 }
  0xed PF: > { %s13_s16 = sadd.s32 1, %s581_s16   ;;  %s678_s12 = smov %s573_s14 }
  0xee   : > { %p10_p7 = scmp.ge.s32.totalorder %s13_s16, 34   ;;  %s679_s13 = smov %s577_s15 }
  0xef   : > { %s680_s14 = smov %s683_s17  ;;  %s681_s15 = smov %s687_s18 }
  0xf0   :  { %12 = sbr.rel (!%p10_p7) target bundleno = 3 (0x3), region = 73 }

// kernel: ssfa_forward.33
= control target key start
LH: loop header
LB: loop body
LE: loop exit
PB: predicated region body
PF: predicated region fallthrough
CT: control target
= control target key end

     0   :  { %s1878_s0 = inlined_call_operand.vmem [shape: bf16[2,18,18,32], index: 0, kind: input, shape index: {}]   ;;  %s1879_s1 = inlined_call_operand.vmem [shape: bf16[2,18,18,32], index: 1, kind: input, shape index: {}]   ;;  %s1880_s2 = inlined_call_operand.vmem [shape: bf16[3,3,32,32], index: 2, kind: input, shape index: {}]   ;;  %s1881_s3 = inlined_call_operand.vmem [shape: bf16[3,3,32,32], index: 3, kind: input, shape index: {}]   ;;  %s1882_s4 = inlined_call_operand.vmem [shape: f32[1,32], index: 4, kind: input, shape index: {}]   ;;  %s1883_s5 = inlined_call_operand.vmem [shape: f32[1,32], index: 5, kind: input, shape index: {}]   ;;  %s1884_s6 = inlined_call_operand.vmem [shape: f32[2,32], index: 6, kind: input, shape index: {}]   ;;  %s1885_s7 = inlined_call_operand.vmem [shape: f32[1,2], index: 7, kind: input, shape index: {}]   ;;  %s1886_s8 = inlined_call_operand.hbm [shape: f32[2,16,16,32], index: 8, kind: output, shape index: {}]  }
   0x1   :  { %1899 = sst [smem:[#allocation18_spill]] %s1886_s8 }
   0x2   :  { %13 = vsyncpa [#allocation5], 0 }
   0x3   :  { %15 = vsyncpa [#allocation5 + $0x1], 0  ;;  %s1591_s27 = smov 0   ;;  %s1593_s28 = smov 0  }
   0x4   :  { %s1595_s29 = smov 0   ;;  %s1597_s30 = smov 0  }
   0x5   :  { %s1599_s9 = smov 0   ;;  %s1601_s10 = smov 0  }
   0x6   :  { %s1603_s11 = smov 0   ;;  %s1605_s12 = smov 0  }
   0x7   :  { %s1607_s13 = smov 0   ;;  %s1609_s14 = smov 0  }
   0x8 LB: > { %1900 = sst [smem:[#allocation7_spill]] %s1498_s27  ;;  %s1170_s15 = sadd.s32 4294967295, %s1534_s14   ;;  %s1534_s14 = sphi %s1609_s14, %s21_s14   ;;  %s1530_s13 = sphi %s1607_s13, %s1925_s13   ;;  %s1526_s12 = sphi %s1605_s12, %s1924_s12   ;;  %s1522_s11 = sphi %s1603_s11, %s1928_s11   ;;  %s1518_s10 = sphi %s1601_s10, %s1922_s10   ;;  %s1514_s9 = sphi %s1599_s9, %s1921_s9   ;;  %s1510_s30 = sphi %s1597_s30, %s1920_s30   ;;  %s1506_s29 = sphi %s1595_s29, %s1919_s29   ;;  %s1502_s28 = sphi %s1593_s28, %s1927_s28   ;;  %s1498_s27 = sphi %s1591_s27, %s1926_s27  }
   0x9   : > { %1901 = sst [smem:[#allocation8_spill]] %s1506_s29  ;;  %s1171_s16 = sadd.s32 4294967294, %s1534_s14  }
   0xa   : > { %1902 = sst [smem:[#allocation9_spill]] %s1522_s11  ;;  %s33_s17 = sadd.s32 1, %s1522_s11 }
   0xb   : > { %1903 = sst [smem:[#allocation10_spill]] %s1526_s12  ;;  %p34_p0 = scmp.ge.s32.totalorder %s33_s17, 3 }
   0xc   : > { %1904 = sst [smem:[#allocation11_spill]] %s1530_s13  ;;  %s36_s18 = sadd.s32 1, %s1526_s12 }
   0xd   : > { %1905 = sst [smem:[#allocation12_spill]] %s1534_s14  ;;  %s40_s19 = sadd.s32 1, %s1530_s13 }
   0xe   : > { %p255_p1 = scmp.ne.s32.totalorder %s1506_s29, %s1502_s28  ;;  %s1930_s17 = smov (%p34_p0, %s33_s17), 0 }
   0xf   : > { %1906 = sst [smem:[#allocation13_spill]] %s1930_s17  ;;  %s1932_s18 = smov (!%p34_p0, %s36_s18), %s1526_s12 }
  0x10   : > { %p256_p2 = scmp.eq.s32.totalorder %s1170_s15, 95  ;;  %p261_p3 = scmp.ne.s32.totalorder %s1502_s28, %s1498_s27 }
  0x11   : > { %p38_p4 = scmp.ge.s32.totalorder %s1932_s18, 16  ;;  %p262_p5 = scmp.eq.s32.totalorder %s1171_s16, 95 }
  0x12   : > { %p1653_p6 = por %p256_p2, %p255_p1  ;;  %p1174_p8 = scmp.ge.s32.totalorder %s1534_s14, 1 }
  0x13   : > { %s1934_s18 = smov (%p38_p4, %s1932_s18), 0  ;;  %s1936_s19 = smov (!%p38_p4, %s40_s19), %s1530_s13 }
  0x14   : > { %1908 = sst [smem:[#allocation14_spill]] %s1934_s18  ;;  %p1660_p7 = por %p262_p5, %p261_p3 }
  0x15   : > { %p42_p9 = scmp.ge.s32.totalorder %s1936_s19, 2  ;;  %p336_p10 = scmp.lt.s32.totalorder %s1534_s14, 97 }
  0x16   : > { %s1909_s21 = scalar_select %p1660_p7, 1, 0 }
  0x17   : > { %s241_s22 = ssub.s32 %s1526_s12, %s1934_s18  ;;  %s1938_s19 = smov (%p42_p9, %s1936_s19), 0 }
  0x18   : > { %1910 = sst [smem:[#allocation15_spill]] %s1909_s21  ;;  %p337_p11 = pnand %p1174_p8, %p336_p10 }
  0x19   : > { %1911 = sst [smem:[#allocation16_spill]] %s1938_s19  ;;  %s240_s23 = ssub.s32 %s1530_s13, %s1938_s19 }
  0x1a   : > { %s242_s24 = sor.u32 %s241_s22, %s240_s23  ;;  %s245_s25 = sadd.s32 1, %s1506_s29 }
  0x1b   : > { %p243_p12 = scmp.eq.s32.totalorder %s242_s24, 0  ;;  %340 = sbr.rel (%p337_p11) target bundleno = 1084 (0x43c), region = 52 }
  0x1c   : > { %s1895_s15 = sand.u32 (!%p337_p11), 1, %s1502_s28   ;;  %s395_s16 = sadd.s32 (!%p337_p11), %s1510_s30, %s1514_s9 }
  0x1d   : > { %s1674_s26 = scalar_select %p243_p12, %s1506_s29, %s245_s25  }
  0x1e   : > { %s1175_s18 = sshll.u32 (!%p337_p11), %s1895_s15, 4  ;;  %p396_p13 = scmp.lt.s32.totalorder (!%p337_p11), %s1518_s10, 1 }
  0x1f   : > { %1912 = sst [smem:[#allocation17_spill]] %s1674_s26  ;;  %p398_p0 = scmp.lt.s32.totalorder (!%p337_p11), %s395_s16, 17 }
  0x20   : > { %s397_s22 = scalar_select %p396_p13, %s1518_s10, 1 }
  0x21   : > { %s1940_s16 = smov (!%p398_p0, %s395_s16), 17  ;;  %p417_p1 = scmp.lt.s32.totalorder %s1510_s30, 2 }
  0x22   : > { %s1296_s23 = smul.u32 54, %s397_s22  ;;  %p1180_p2 = scmp.ne.s32.totalorder %s1510_s30, 0 }
  0x23   : > { %s1295_s24 = smul.u32 3, %s1940_s16 }
  0x24   : > { %s418_s25 = scalar_select %p417_p1, %s1510_s30, 2 }
  0x25   : > { %s402_s19 = sadd.s32 %s1296_s23, %s1295_s24  ;;  %431 = sbr.rel (%p1180_p2) target bundleno = 45 (0x2d), region = 56 }
  0x26   : > { %s1176_s17 = sshll.u32 %s402_s19, 2  ;;  %s1297_s13 = smul.u32 48, %s418_s25 }
  0x27   : > { %s404_s26 = scalar_lea.vmem %s1878_s0, %s1176_s17  ;;  %s1691_s27 = scalar_lea.vmem %s1879_s1, %s1176_s17 }
  0x28   : > { %s1696_s8 = scalar_lea.vmem %s1880_s2, %s1297_s13  ;;  %s1701_s23 = scalar_lea.vmem %s1881_s3, %s1297_s13 }
  0x29   : > { %s1703_s19 = scalar_lea.vmem [#allocation4], %s1175_s18 }
  0x2a   : > { %vm432_vm0 = vcmask 261120   ;;  %v1536_v0 = vmov 0.0  }
  0x2b   : > { %433 = vst.msk [vmem:[#allocation2] sm:$0xff] %vm432_vm0, %v1536_v0  ;;  %434 = vst.msk [vmem:[#allocation2 + $0x8] sm:$0xff] %vm432_vm0, %v1536_v0 }
  0x2c   : > { %435 = vst.msk [vmem:[#allocation3] sm:$0xff] %vm432_vm0, %v1536_v0  ;;  %436 = vst.msk [vmem:[#allocation3 + $0x8] sm:$0xff] %vm432_vm0, %v1536_v0 }
  0x2d PF: > { %v1394_v1 = vld [vmem:[%s1696_s8 + $0x18] sm:$0xff]   ;;  %v1537_v2 = vmov 0.0   ;;  %v1396_v4 = vld [vmem:[%s1696_s8 + $0x10] sm:$0xff]   ;;  %vm1538_vm1 = vmmov 0   ;;  %v1398_v6 = vld [vmem:[%s404_s26] sm:$0xff]   ;;  %vm489_vm3 = vcmask 261120  }
  0x2e   : > { %1247 = vmatprep.subr.bf16.mxu0 %v1537_v2  ;;  %1255 = vmatprep.subr.bf16.mxu1 %v1537_v2  ;;  %v1395_v3 = vld [vmem:[%s1701_s23 + $0x18] sm:$0xff]   ;;  %v1397_v5 = vld [vmem:[%s1701_s23 + $0x10] sm:$0xff]   ;;  %v1399_v7 = vld [vmem:[%s404_s26 + $0x8] ss:$0 sps:$4 sm:$0x11]   ;;  %v466_v8 = vshrl.u32 %v1398_v6, 16 }
  0x2f   : > { %1248 = vmatpush3.bf16.msra.mxu0 %v1394_v1  ;;  %1251 = vmatprep.mubr.msk.bf16.mxu0 %vm1538_vm1, %v1537_v2  ;;  %vm464_vm2 = vsmask.f32 7424  ;;  %v468_v9 = vshll.u32 %v1398_v6, 16  ;;  %v473_v10 = vshll.u32 %v1399_v7, 16  ;;  %v1400_v11 = vld [vmem:[%s1691_s27] sm:$0xff]   ;;  %v1402_v20 = vld [vmem:[%s1696_s8 + $0x8] sm:$0xff]  }
  0x30   : > { %1256 = vmatpush3.bf16.msra.mxu1 %v1395_v3  ;;  %1249 = vmatprep.subr.bf16.mxu0 %v1537_v2  ;;  %v1401_v12 = vld [vmem:[%s1691_s27 + $0x8] ss:$0 sps:$4 sm:$0x11]   ;;  %v548_v15 = vshrl.u32 %v1400_v11, 16  ;;  %v550_v16 = vshll.u32 %v1400_v11, 16  ;;  %v1404_v26 = vld [vmem:[%s1696_s8] sm:$0xff]  }
  0x31   : > { %1257 = vmatprep.subr.bf16.mxu1 %v1537_v2  ;;  %1259 = vmatprep.mubr.msk.bf16.mxu1 %vm1538_vm1, %v1537_v2  ;;  %v470_v13 = vrot.slane %v468_v9, 1  ;;  %v475_v14 = vrot.slane %v473_v10, 1  ;;  %v555_v17 = vshll.u32 %v1401_v12, 16  ;;  %v1403_v24 = vld [vmem:[%s1701_s23 + $0x8] sm:$0xff]   ;;  %v1405_v27 = vld [vmem:[%s1701_s23] sm:$0xff]   ;;  %v731_v31 = vrot.slane %v1398_v6, 1 }
  0x32   : > { %v552_v19 = vrot.slane %v550_v16, 1  ;;  %v1406_v28 = vld [vmem:[%s1696_s8 + $0x28] sm:$0xff]   ;;  %v1408_v30 = vld [vmem:[%s1696_s8 + $0x20] sm:$0xff]   ;;  %v732_v32 = vrot.slane %v1399_v7, 1  ;;  %vm730_vm4 = vcmask 1046528   ;;  %v795_v34 = vrot.slane %v1400_v11, 1 }
  0x33   : > { %1250 = vmatpush3.bf16.msra.mxu0 %v1396_v4  ;;  %v471_v18 = vor.u32 %v470_v13, %v466_v8  ;;  %v557_v21 = vrot.slane %v555_v17, 1  ;;  %v1407_v29 = vld [vmem:[%s1701_s23 + $0x28] sm:$0xff]   ;;  %v1409_v33 = vld [vmem:[%s1701_s23 + $0x20] sm:$0xff]   ;;  %v796_v35 = vrot.slane %v1401_v12, 1  ;;  %v864_v60 = vld [vmem:[#allocation3] sm:$0xff]  ;;  %p1219_p3 = scmp.ne.s32.totalorder %s1510_s30, 2 }
  0x34   : > { %1258 = vmatpush3.bf16.msra.mxu1 %v1397_v5  ;;  %1263 = vmatprep.subr.bf16.mxu0 %v1537_v2  ;;  %v553_v23 = vor.u32 %v552_v19, %v548_v15  ;;  %v733_v36 = vsel %vm730_vm4, %v731_v31, %v732_v32  ;;  %v858_v56 = vld [vmem:[#allocation2] sm:$0xff]  ;;  %v859_v3 = vld [vmem:[#allocation2 + $0x8] sm:$0xff]  ;;  %v865_v8 = vld [vmem:[#allocation3 + $0x8] sm:$0xff]  ;;  %s1539_s17 = smov (!%p1219_p3), 127   ;;  %s1540_s18 = smov (!%p1219_p3), 1  }
  0x35   : > { %1271 = vmatprep.subr.bf16.mxu1 %v1537_v2  ;;  %v476_v22 = vsel %vm464_vm2, %v471_v18, %v475_v14  ;;  %v797_v37 = vsel %vm730_vm4, %v795_v34, %v796_v35 }
  0x36   : > { %1252 = vmatmul.mubr.msk.bf16.vlgmr.msra.gmra.mxu0 %vm489_vm3, %v476_v22  ;;  %v558_v25 = vsel %vm464_vm2, %v553_v23, %v557_v21 }
  0x37   : > { %1264 = vmatpush3.bf16.msra.mxu0 %v1402_v20  ;;  %1267 = vmatprep.mubr.msk.bf16.mxu0 %vm1538_vm1, %v1537_v2 }
  0x38   : > { %1260 = vmatmul.mubr.msk.bf16.vlgmr.msra.gmra.mxu1 %vm489_vm3, %v558_v25  ;;  %1265 = vmatprep.subr.bf16.mxu0 %v1537_v2 }
  0x39   : > { %1272 = vmatpush3.bf16.msra.mxu1 %v1403_v24  ;;  %1275 = vmatprep.mubr.msk.bf16.mxu1 %vm1538_vm1, %v1537_v2 }
  0x3a   : > { %1273 = vmatprep.subr.bf16.mxu1 %v1537_v2 }
  0x3b   : > { %1266 = vmatpush3.bf16.msra.mxu0 %v1404_v26 }
  0x3c   : > { %1279 = vmatprep.subr.bf16.mxu0 %v1537_v2 }
  0x3d   : > { %1274 = vmatpush3.bf16.msra.mxu1 %v1405_v27 }
  0x3e   : > { %1268 = vmatmul.mubr.msk.bf16.vlgmr.msra.gmra.mxu0 %vm489_vm3, %v1398_v6  ;;  %1287 = vmatprep.subr.bf16.mxu1 %v1537_v2 }
  0x3f   : > { %1280 = vmatpush3.bf16.msra.mxu0 %v1406_v28  ;;  %1283 = vmatprep.mubr.msk.bf16.mxu0 %vm1538_vm1, %v1537_v2 }
  0x40   : > { %1276 = vmatmul.mubr.msk.bf16.vlgmr.msra.gmra.mxu1 %vm489_vm3, %v1400_v11  ;;  %1281 = vmatprep.subr.bf16.mxu0 %v1537_v2 }
  0x41   : > { %1288 = vmatpush3.bf16.msra.mxu1 %v1407_v29  ;;  %1291 = vmatprep.mubr.msk.bf16.mxu1 %vm1538_vm1, %v1537_v2 }
  0x42   : > { %1289 = vmatprep.subr.bf16.mxu1 %v1537_v2 }
  0x43   : > { %1282 = vmatpush3.bf16.msra.mxu0 %v1408_v30 }
  0x45   : > { %1290 = vmatpush3.bf16.msra.mxu1 %v1409_v33 }
  0x46   : > { %1284 = vmatmul.mubr.msk.bf16.vlgmr.msra.gmra.mxu0 %vm489_vm3, %v733_v36 }
  0x48   : > { %1292 = vmatmul.mubr.msk.bf16.vlgmr.msra.gmra.mxu1 %vm489_vm3, %v797_v37 }
  0xf6   : > { %v527_v38 = vpop.f32.mrf.mxu0 }
  0xf8   : > { %v608_v39 = vpop.f32.mrf.mxu1  ;;  %v1253_v40 = vpop.f32.mrf.mxu0 }
  0xfa   : > { %v1261_v41 = vpop.f32.mrf.mxu1  ;;  %v530_v42 = vpop.f32.mrf.mxu0 }
  0xfc   : > { %v611_v43 = vpop.f32.mrf.mxu1  ;;  %v1254_v44 = vpop.f32.mrf.mxu0 }
  0xfe   : > { %v1262_v45 = vpop.f32.mrf.mxu1  ;;  %v663_v46 = vpop.f32.mrf.mxu0 }
  0xff   : > { %v664_v53 = vadd.f32 %v663_v46, %v527_v38 }
 0x100   : > { %v718_v47 = vpop.f32.mrf.mxu1  ;;  %v1269_v48 = vpop.f32.mrf.mxu0 }
 0x101   : > { %v719_v57 = vadd.f32 %v718_v47, %v608_v39 }
 0x102   : > { %v1277_v49 = vpop.f32.mrf.mxu1  ;;  %v666_v50 = vpop.f32.mrf.mxu0 }
 0x103   : > { %v667_v62 = vadd.f32 %v666_v50, %v530_v42 }
 0x104   : > { %v721_v51 = vpop.f32.mrf.mxu1  ;;  %v1270_v52 = vpop.f32.mrf.mxu0 }
 0x105   : > { %v722_v4 = vadd.f32 %v721_v51, %v611_v43 }
 0x106   : > { %v1278_v54 = vpop.f32.mrf.mxu1  ;;  %v783_v55 = vpop.f32.mrf.mxu0 }
 0x107   : > { %v854_v58 = vadd.f32 %v783_v55, %v664_v53 }
 0x108   : > { %v847_v59 = vpop.f32.mrf.mxu1  ;;  %v1285_v61 = vpop.f32.mrf.mxu0 }
 0x109   : > { %v860_v63 = vadd.f32 %v858_v56, %v854_v58  ;;  %v856_v0 = vadd.f32 %v847_v59, %v719_v57 }
 0x10a   : > { %v1293_v1 = vpop.f32.mrf.mxu1  ;;  %v786_v2 = vpop.f32.mrf.mxu0 }
 0x10b   : > { %862 = vst.msk [vmem:[#allocation2] sm:$0xff] %vm489_vm3, %v860_v63  ;;  %v866_v5 = vadd.f32 %v864_v60, %v856_v0  ;;  %v855_v6 = vadd.f32 %v786_v2, %v667_v62 }
 0x10c   : > { %v850_v7 = vpop.f32.mrf.mxu1  ;;  %v1286_v9 = vpop.f32.mrf.mxu0 }
 0x10d   : > { %868 = vst.msk [vmem:[#allocation3] sm:$0xff] %vm489_vm3, %v866_v5  ;;  %v861_v10 = vadd.f32 %v859_v3, %v855_v6  ;;  %v857_v11 = vadd.f32 %v850_v7, %v722_v4  ;;  %873 = sbr.rel (%p1219_p3) target bundleno = 1056 (0x420), region = 60 }
 0x10e   : > { %v1294_v12 = vpop.f32.mrf.mxu1 }
 0x10f   : > { %863 = vst.msk [vmem:[#allocation2 + $0x8] sm:$0xff] %vm489_vm3, %v861_v10  ;;  %v867_v13 = vadd.f32 %v865_v8, %v857_v11 }
 0x111   : > { %869 = vst.msk [vmem:[#allocation3 + $0x8] sm:$0xff] %vm489_vm3, %v867_v13 }
 0x112   : > { %v1221_v15 = vld [vmem:[%s1883_s5] ss:$0 sm:$0xff]  ;;  %v902_v16 = vlaneseq  ;;  %v1541_v2 = vmov 0  }
 0x113   : > { %v874_v19 = vld [vmem:[#allocation2] sm:$0xff]  ;;  %1410 = vset.pattern.permute.xlu0 %v1541_v2  ;;  %1411 = vset.pattern.permute.xlu1 %v1541_v2 }
 0x114   : > { %v887_v14 = vld [vmem:[#allocation3] sm:$0xff]  ;;  %v1220_v20 = vld [vmem:[%s1882_s4] ss:$0 sm:$0xff]  ;;  %v903_v21 = vshrl.u32 %v902_v16, 7 }
 0x115   : > { %v1760_v17 = vadd.f32 %v1221_v15, %v887_v14  ;;  %v1767_v23 = vadd.f32 %v1220_v20, %v874_v19  ;;  %v900_v26 = vld [vmem:[%s1884_s6] sm:$0x3] }
 0x116   : > { %v875_v24 = vld [vmem:[#allocation2 + $0x8] sm:$0xff]  ;;  %v924_v28 = vsub.s32 1, %v903_v21  ;;  %v904_v31 = vsub.s32 0, %v903_v21  ;;  %v1222_v43 = vld [vmem:[%s1885_s7] ss:$0 sm:$0xff] }
 0x117   : > { %v898_v25 = vmax.f32 %v1760_v17, 0.0  ;;  %v1773_v27 = vadd.f32 %v1220_v20, %v875_v24  ;;  %v885_v30 = vmax.f32 %v1767_v23, 0.0 }
 0x118   : > { %v888_v18 = vld [vmem:[#allocation3 + $0x8] sm:$0xff]  ;;  %v925_v33 = vrot.slane %v900_v26, %v924_v28  ;;  %v905_v34 = vrot.slane %v900_v26, %v904_v31 }
 0x119   : > { %v1765_v22 = vadd.f32 %v1221_v15, %v888_v18  ;;  %v886_v32 = vmax.f32 %v1773_v27, 0.0  ;;  %v1542_v15 = vmov 1  }
 0x11a   : > { %v926_v35 = vmul.f32 %v925_v33, %v898_v25  ;;  %v906_v37 = vmul.f32 %v905_v34, %v885_v30 }
 0x11b   : > { %v899_v29 = vmax.f32 %v1765_v22, 0.0  ;;  %v907_v38 = vmul.f32 %v905_v34, %v886_v32 }
 0x11c   : > { %v928_v39 = vsel %vm489_vm3, %v926_v35, 0.0  ;;  %v908_v40 = vsel %vm489_vm3, %v906_v37, 0.0 }
 0x11d   : > { %v927_v36 = vmul.f32 %v925_v33, %v899_v29  ;;  %929 = vadd.xlane.f32.xlu0 %v928_v39  ;;  %909 = vadd.xlane.f32.xlu1 %v908_v40  ;;  %v911_v42 = vsel %vm489_vm3, %v907_v38, 0.0 }
 0x11f   : > { %v931_v41 = vsel %vm489_vm3, %v927_v36, 0.0 }
 0x121   : > { %932 = vadd.xlane.f32.xlu0 %v931_v41  ;;  %912 = vadd.xlane.f32.xlu1 %v911_v42 }
 0x1a6   : > { %v930_v44 = vpop.xlane.xlu0 %929  ;;  %v910_v48 = vpop.xlane.xlu1 %909 }
 0x1a7   : > { %v934_v45 = vadd.f32 %v1222_v43, %v930_v44  ;;  %v920_v50 = vadd.f32 %v1222_v43, %v910_v48 }
 0x1a9   : > { %938 = vrot.lane.b32.xlu0 %v934_v45, %s1539_s17 }
 0x1aa   : > { %v933_v46 = vpop.xlane.xlu0 %932  ;;  %v913_v49 = vpop.xlane.xlu1 %912 }
 0x1ab   : > { %v935_v47 = vadd.f32 %v1222_v43, %v933_v46  ;;  %v921_v54 = vadd.f32 %v1222_v43, %v913_v49 }
 0x1ad   : > { %940 = vrot.lane.b32.xlu1 %v935_v47, %s1539_s17 }
 0x21b   : > { %v939_v51 = vpop.permute.xlu0 %938 }
 0x21c   : > { %v944_v52 = vmax.f32 %v920_v50, %v939_v51 }
 0x21e   : > { %v946_v53 = vsub.f32 %v920_v50, %v944_v52  ;;  %954 = vrot.lane.b32.xlu1 %v944_v52, %s1540_s18 }
 0x21f   : > { %v941_v55 = vpop.permute.xlu1 %940 }
 0x220   : > { %v945_v56 = vmax.f32 %v921_v54, %v941_v55  ;;  %v948_v3 = vmul.f32 1.442695, %v946_v53 }
 0x222   : > { %v947_v57 = vsub.f32 %v921_v54, %v945_v56  ;;  %956 = vrot.lane.b32.xlu1 %v945_v56, %s1540_s18 }
 0x224   : > { %v950_v4 = vmul.f32 1.442695, %v947_v57 }
 0x290   : > { %v955_v58 = vpop.permute.xlu1 %954 }
 0x291   : > { %v960_v59 = vsub.f32 %v934_v45, %v955_v58 }
 0x293   : > { %v962_v60 = vmul.f32 1.442695, %v960_v59 }
 0x294   : > { %v957_v61 = vpop.permute.xlu1 %956 }
 0x295   : > { %1414 = vpow2.f32 %v962_v60  ;;  %v961_v62 = vsub.f32 %v935_v47, %v957_v61 }
 0x297   : > { %v964_v63 = vmul.f32 1.442695, %v961_v62 }
 0x299   : > { %1416 = vpow2.f32 %v964_v63 }
 0x29a   : > { %1418 = vpow2.f32 %v948_v3 }
 0x29b   : > { %1420 = vpow2.f32 %v950_v4 }
 0x2a2   : > { %v1415_v0 = vpop.eup %1414 }
 0x2a3   : > { %968 = vrot.lane.b32.xlu0 %v1415_v0, %s1539_s17 }
 0x2a6   : > { %v1417_v1 = vpop.eup %1416 }
 0x2a7   : > { %970 = vrot.lane.b32.xlu1 %v1417_v1, %s1539_s17  ;;  %v1419_v5 = vpop.eup %1418 }
 0x2a8   : > { %v1421_v8 = vpop.eup %1420 }
 0x315   : > { %v969_v6 = vpop.permute.xlu0 %968 }
 0x316   : > { %v974_v7 = vadd.f32 %v1419_v5, %v969_v6 }
 0x318   : > { %1422 = vrcp.f32 %v974_v7 }
 0x319   : > { %v971_v9 = vpop.permute.xlu1 %970 }
 0x31a   : > { %v975_v10 = vadd.f32 %v1421_v8, %v971_v9 }
 0x31c   : > { %1424 = vrcp.f32 %v975_v10 }
 0x325   : > { %v1423_v11 = vpop.eup %1422 }
 0x326   : > { %994 = vrot.lane.b32.xlu0 %v1423_v11, %s1540_s18  ;;  %v978_v12 = vmul.f32 %v1423_v11, %v1419_v5 }
 0x329   : > { %v1425_v13 = vpop.eup %1424 }
 0x32a   : > { %982 = vperm.xlu0 %1410, %v978_v12   ;;  %996 = vrot.lane.b32.xlu1 %v1425_v13, %s1540_s18  ;;  %v979_v14 = vmul.f32 %v1425_v13, %v1421_v8 }
 0x32e   : > { %987 = vperm.xlu1 %1411, %v979_v14   ;;  %1413 = vset.pattern.permute.xlu0 %v1542_v15 }
 0x332   : > { %1412 = vset.pattern.permute.xlu1 %v1542_v15 }
 0x398   : > { %v995_v16 = vpop.permute.xlu0 %994 }
 0x399   : > { %v1000_v18 = vmul.f32 %v1415_v0, %v995_v16 }
 0x39b   : > { %1004 = vperm.xlu1 %1412, %v1000_v18  }
 0x39c   : > { %v997_v19 = vpop.permute.xlu1 %996 }
 0x39d   : > { %v1001_v20 = vmul.f32 %v1417_v1, %v997_v19 }
 0x39f   : > { %1009 = vperm.xlu0 %1413, %v1001_v20  }
 0x3a5   : > { %v983_v24 = vpop.permute.xlu0 %982 }
 0x3a6   : > { %v990_v28 = vmul.f32 %v983_v24, %v885_v30 }
 0x3a9   : > { %v988_v21 = vpop.permute.xlu1 %987 }
 0x3aa   : > { %v991_v35 = vmul.f32 %v988_v21, %v886_v32 }
 0x416   : > { %v1005_v26 = vpop.permute.xlu1 %1004 }
 0x417   : > { %v1012_v31 = vmul.f32 %v1005_v26, %v898_v25 }
 0x419   : > { %v1014_v33 = vadd.f32 %v1012_v31, %v990_v28 }
 0x41a   : > { %v1010_v34 = vpop.permute.xlu0 %1009 }
 0x41b   : > { %1016 = vst.msk [vmem:[%s1703_s19] sm:$0xff] %vm489_vm3, %v1014_v33  ;;  %v1013_v36 = vmul.f32 %v1010_v34, %v899_v29 }
 0x41d   : > { %v1015_v37 = vadd.f32 %v1013_v36, %v991_v35 }
 0x41f   : > { %1017 = vst.msk [vmem:[%s1703_s19 + $0x8] sm:$0xff] %vm489_vm3, %v1015_v37 }
 0x420 PF: > { %s1224_s21 = sshll.u32 %s1514_s9, 1  ;;  %s1225_s26 = sshll.u32 %s1518_s10, 5 }
 0x421   : > { %s1034_s15 = sshll.u32 %s1703_s19, 4  ;;  %s1031_s24 = sadd.s32 %s1225_s26, %s1224_s21  ;;  %s1812_s15 = int_to_ptr.vmem [resolvable:$true] %s1034_s15 }
 0x422   : > { %s1226_s25 = sshll.u32 %s1031_s24, 7  ;;  %s1913_s23 = sld [smem:[#allocation18_spill]] }
 0x423   : > { %s1914_s27 = sand.u32 1, %s1502_s28   ;;  %s1426_s11 = scalar_lea.vmem %s1812_s15, 256 }
 0x424   : > { %s1821_s29 = scalar_lea.sflag [#allocation5], %s1914_s27  ;;  %p1427_p4 = scmp.ne.s32.totalorder %s1812_s15, %s1426_s11 }
 0x425   : > { %s1543_s9 = smov [#allocation4]  }
 0x426   : > { %p1428_p5 = pnand %p1427_p4, %p1653_p6  ;;  %s1430_s10 = sshll.u32 %s1543_s9, 4  ;;  %s1431_s10 = int_to_ptr.vmem [resolvable:$false] %s1430_s10 }
 0x427   : > { %s1432_s19 = scalar_lea.vmem %s1431_s10, 512  ;;  %p1433_p9 = scmp.lt.s32.totalorder %s1812_s15, %s1431_s10 }
 0x428   : > { %s1817_s8 = scalar_lea.hbm %s1913_s23, %s1226_s25  ;;  %p1429_p8 = pneg %p1428_p5 }
 0x429   : > { %p1434_p10 = scmp.lt.s32.totalorder %s1432_s19, %s1426_s11 }
 0x42b   : > { %p1435_p11 = por %p1434_p10, %p1433_p9 }
 0x42d   : > { %p1436_p12 = pnand %p1435_p11, %p1429_p8 }
 0x42f   : > { %1439 = shalt.err (!%p1436_p12)
}
 0x430   : > { %s1440_s30 = scalar_lea.hbm %s1817_s8, 256  ;;  %s1444_s14 = scalar_lea.hbm %s1913_s23, 8192 }
 0x431   : > { %p1441_p13 = scmp.ne.s32.totalorder %s1817_s8, %s1440_s30  ;;  %p1445_p2 = scmp.lt.s32.totalorder %s1817_s8, %s1913_s23 }
 0x432   : > { %p1446_p3 = scmp.lt.s32.totalorder %s1444_s14, %s1440_s30 }
 0x433   : > { %p1442_p0 = pnand %p1441_p13, %p1653_p6 }
 0x434   : > { %p1447_p4 = por %p1446_p3, %p1445_p2 }
 0x435   : > { %p1443_p1 = pneg %p1442_p0 }
 0x437   : > { %p1448_p5 = pnand %p1447_p4, %p1443_p1 }
 0x439   : > { %1451 = shalt.err (!%p1448_p5)
}
 0x43a   : > { %s1544_s21 = smov 128   ;;  %s1545_s26 = smov 8  }
 0x43b   : > { %1298 = dma.vmem_to_hbm [thread:$0]  (%p1653_p6), %s1812_s15, 256, %s1817_s8, %s1821_s29, %s1544_s21, %s1544_s21, %s1545_s26  }
 0x43c PF: > { %s1915_s24 = sld [smem:[#allocation12_spill]] }
 0x43d   : > { %s1916_s25 = sld [smem:[#allocation7_spill]] }
 0x442   : > { %p1304_p8 = scmp.ge.s32.totalorder %s1915_s24, 2 }
 0x443   : > { %s1049_s16 = sand.u32 1, %s1916_s25  }
 0x444   : > { %p1301_p9 = pnand %p1304_p8, %p1660_p7  ;;  %s1050_s27 = scalar_lea.sflag [#allocation5], %s1049_s16 }
 0x446   : > { %p1302_p10 = pneg %p1301_p9 }
 0x448   : > { %1493 = dma.done.wait (%p1302_p10), %s1050_s27, 256  }
 0x449   : > { %1495 = vsyncadd (%p1302_p10), %s1050_s27, 4294967040  ;;  %s21_s14 = sadd.s32 1, %s1915_s24   ;;  %s1918_s11 = sld [smem:[#allocation8_spill]] }
 0x44a   : > { %p18_p11 = scmp.ge.s32.totalorder %s21_s14, 98   ;;  %s1919_s29 = sld [smem:[#allocation17_spill]] }
 0x44b   : > { %s1920_s30 = sld [smem:[#allocation9_spill]]  ;;  %s1926_s27 = smov %s1502_s28 }
 0x44c   : > { %s1921_s9 = sld [smem:[#allocation10_spill]] }
 0x44d   : > { %s1922_s10 = sld [smem:[#allocation11_spill]] }
 0x44e   : > { %s1923_s20 = sld [smem:[#allocation13_spill]] }
 0x44f   : > { %s1924_s12 = sld [smem:[#allocation14_spill]]  ;;  %s1927_s28 = smov %s1918_s11 }
 0x450   : > { %s1925_s13 = sld [smem:[#allocation16_spill]]  ;;  %20 = sbr.rel (!%p18_p11) target bundleno = 8 (0x8), region = 108 }
 0x454   : > { %s1928_s11 = smov %s1923_s20 }
 0x455   :  { %1055 = vsyncpa [#allocation5], 1 }
 0x456   :  { %1057 = vsyncpa [#allocation5 + $0x1], 1 }

</bundles_post_ra>
